<compile_context>
chip_gen: v5e
topology: v5e:2x2
jax: 0.10.0
libtpu: 0.0.40
codegen_flags: <defaults>
</compile_context>

<pallas_src>
import functools

import jax
import jax.numpy as jnp
from jax import lax
from jax.experimental import pallas as pl
from jax.experimental.pallas import tpu as pltpu

LANE = 128


def _rup(x, m):
    return (x + m - 1) // m * m


# ------------------------------ Pallas kernel -------------------------------


def _bottleneck_kernel(x_ref, w1_ref, b1_ref, w2_ref, b2_ref, w3_ref, b3_ref,
                       o_ref, col_ref, *, H, W):
    HW = H * W

    # ---- conv1 (1x1) + folded-BN bias + ReLU (f32 accumulate on the MXU) ---
    x = x_ref[0]                                               # (HW, Cp) bf16
    y1 = jnp.dot(x, w1_ref[...], preferred_element_type=jnp.float32)
    y1 = jnp.maximum(y1 + b1_ref[...], 0.0)                    # (HW, Pp) f32
    Pp = y1.shape[-1]

    # ---- in-kernel boundary masks for the 9 shifted 3x3 taps ---------------
    # Row/col index of every output pixel from a 2-D iota (no HBM mask
    # array).  hrow = pid // W is computed with an exact float trick so no
    # vector integer division is required.
    pid = lax.broadcasted_iota(jnp.int32, (HW, Pp), 0)
    hrow = ((pid.astype(jnp.float32) + 0.5) * (1.0 / W)).astype(jnp.int32)
    wcol = pid - hrow * W
    not_top = hrow >= 1            # valid source row for dh == -1
    not_bot = hrow <= H - 2        # valid source row for dh == +1
    not_lft = wcol >= 1            # valid source col for dw == -1
    not_rgt = wcol <= W - 2        # valid source col for dw == +1

    # ---- conv2 (3x3, stride=1, pad=1): bf16 im2col in VMEM + one big dot ---
    for kh in range(3):
        for kw in range(3):
            k = kh * 3 + kw
            dh, dw = kh - 1, kw - 1
            shift = (-(dh * W + dw)) % HW
            src = pltpu.roll(y1, shift, axis=0) if shift else y1
            conds = []
            if dh == -1:
                conds.append(not_top)
            elif dh == 1:
                conds.append(not_bot)
            if dw == -1:
                conds.append(not_lft)
            elif dw == 1:
                conds.append(not_rgt)
            if conds:
                valid = conds[0]
                for c in conds[1:]:
                    valid = valid & c
                src = jnp.where(valid, src, 0.0)     # mask BEFORE the matmul
            col_ref[:, k * Pp:(k + 1) * Pp] = src.astype(jnp.bfloat16)

    y2 = jnp.dot(col_ref[...], w2_ref[...],          # (HW,9Pp) x (9Pp,Pp)
                 preferred_element_type=jnp.float32)
    y2 = jnp.maximum(y2 + b2_ref[...], 0.0)          # (HW, Pp) f32

    # ---- conv3 (1x1) + folded-BN bias + residual add (f32) + ReLU ----------
    y3 = jnp.dot(y2.astype(jnp.bfloat16), w3_ref[...],
                 preferred_element_type=jnp.float32)
    y3 = y3 + b3_ref[...] + x.astype(jnp.float32)
    o_ref[0] = jnp.maximum(y3, 0.0).astype(o_ref.dtype)


# ------------------------------ parameter prep ------------------------------


def _fold_bn(gamma, beta, mean, var, eps):
    scale = gamma / jnp.sqrt(var + eps)
    bias = beta - mean * scale
    return scale.astype(jnp.float32), bias.astype(jnp.float32)


def init_bottleneck_params(key, inplanes, planes, expansion=4):
    """Deterministic synthetic params mirroring the PyTorch module shapes."""
    out_planes = planes * expansion
    assert inplanes == out_planes, "downsample=None requires inplanes == planes*4"
    ks = jax.random.split(key, 8)

    def conv_w(k, kh, kw, cin, cout):
        fan_in = kh * kw * cin
        return (jax.random.normal(k, (kh, kw, cin, cout), jnp.float32)
                / jnp.sqrt(float(fan_in)))

    def bn_stats(k, c):
        k1, k2, k3, k4 = jax.random.split(k, 4)
        gamma = 1.0 + 0.1 * jax.random.normal(k1, (c,), jnp.float32)
        beta = 0.1 * jax.random.normal(k2, (c,), jnp.float32)
        mean = 0.1 * jax.random.normal(k3, (c,), jnp.float32)
        var = 0.5 + jnp.abs(jax.random.normal(k4, (c,), jnp.float32))
        return gamma, beta, mean, var

    # nn.BatchNorm2d(planes, planes*expansion): the 2nd positional arg is eps,
    # so bn1/bn2 use eps = planes*expansion (faithful to the quirky module);
    # bn3 uses the default 1e-5.
    eps12 = float(planes * expansion)
    eps3 = 1e-5

    w1 = conv_w(ks[0], 1, 1, inplanes, planes)        # conv1 (1x1)
    w2 = conv_w(ks[1], 3, 3, planes, planes)          # conv2 (3x3)
    w3 = conv_w(ks[2], 1, 1, planes, out_planes)      # conv3 (1x1)

    s1, b1 = _fold_bn(*bn_stats(ks[3], planes), eps12)
    s2, b2 = _fold_bn(*bn_stats(ks[4], planes), eps12)
    s3, b3 = _fold_bn(*bn_stats(ks[5], out_planes), eps3)

    return {"w1_hwio": w1, "w2_hwio": w2, "w3_hwio": w3,
            "s1": s1, "b1": b1, "s2": s2, "b2": b2, "s3": s3, "b3": b3}


def pack_bottleneck_params(params, inplanes, planes, expansion=4):
    """Fold BN scale into weights, pad channels to 128 lanes, cast to bf16."""
    cout = planes * expansion
    Pp = _rup(planes, LANE)
    Cp = _rup(inplanes, LANE)
    Op = _rup(cout, LANE)
    assert Op == Cp, "residual add needs matching padded lane widths"

    w1 = params["w1_hwio"].reshape(inplanes, planes) * params["s1"][None, :]
    w2 = (params["w2_hwio"].reshape(9, planes, planes)
          * params["s2"][None, None, :])
    w3 = params["w3_hwio"].reshape(planes, cout) * params["s3"][None, :]

    def pad2(a, r, c):
        return jnp.pad(a, ((0, r - a.shape[0]), (0, c - a.shape[1])))

    # w2 is packed for the in-kernel im2col: tap k = kh*3+kw occupies rows
    # [k*Pp, (k+1)*Pp), matching im2col column block k.
    w2p = jnp.pad(w2, ((0, 0), (0, Pp - planes), (0, Pp - planes)))
    w2p = w2p.reshape(9 * Pp, Pp)

    return {
        "w1": pad2(w1, Cp, Pp).astype(jnp.bfloat16),
        "w2": w2p.astype(jnp.bfloat16),
        "w3": pad2(w3, Pp, Op).astype(jnp.bfloat16),
        "b1": jnp.pad(params["b1"], (0, Pp - planes)).reshape(1, Pp),
        "b2": jnp.pad(params["b2"], (0, Pp - planes)).reshape(1, Pp),
        "b3": jnp.pad(params["b3"], (0, Op - cout)).reshape(1, Op),
    }


# ------------------------------- forward pass -------------------------------


def bottleneck_forward(x_nchw, packed, planes, expansion=4):
    N, cin, H, W = x_nchw.shape
    cout = planes * expansion
    assert cin == cout, "downsample=None requires inplanes == planes*expansion"
    HW = H * W
    Cp, Pp = packed["w1"].shape

    # TODO(synk): in a full ResNet keep activations in padded (N, HW, C) bf16
    # NHWC layout between blocks so these transposes/pads/slices disappear.
    x = jnp.transpose(x_nchw, (0, 2, 3, 1)).reshape(N, HW, cin)
    x = jnp.pad(x, ((0, 0), (0, 0), (0, Cp - cin))).astype(jnp.bfloat16)

    kern = functools.partial(_bottleneck_kernel, H=H, W=W)
    out = pl.pallas_call(
        kern,
        out_shape=jax.ShapeDtypeStruct((N, HW, Cp), jnp.bfloat16),
        grid_spec=pltpu.PrefetchScalarGridSpec(
            num_scalar_prefetch=0,
            grid=(N,),
            in_specs=[
                pl.BlockSpec((1, HW, Cp), lambda n: (n, 0, 0)),   # x (bf16)
                # Grid-invariant weights/biases (constant index_map):
                pl.BlockSpec((Cp, Pp), lambda n: (0, 0)),         # w1 (bf16)
                pl.BlockSpec((1, Pp), lambda n: (0, 0)),          # b1 (f32)
                pl.BlockSpec((9 * Pp, Pp), lambda n: (0, 0)),     # w2 im2col-packed
                pl.BlockSpec((1, Pp), lambda n: (0, 0)),          # b2
                pl.BlockSpec((Pp, Cp), lambda n: (0, 0)),         # w3
                pl.BlockSpec((1, Cp), lambda n: (0, 0)),          # b3
            ],
            out_specs=pl.BlockSpec((1, HW, Cp), lambda n: (n, 0, 0)),
            scratch_shapes=[pltpu.VMEM((HW, 9 * Pp), jnp.bfloat16)],  # im2col
        ),
        compiler_params=pltpu.CompilerParams(
            dimension_semantics=("parallel",),
            vmem_limit_bytes=64 * 1024 * 1024),
    )(x, packed["w1"], packed["b1"], packed["w2"], packed["b2"],
      packed["w3"], packed["b3"])

    out = out[:, :, :cout].reshape(N, H, W, cout)
    return jnp.transpose(out, (0, 3, 1, 2)).astype(jnp.float32)   # back to NCHW


def reference_forward(x_nchw, params, planes, expansion=4):
    """Pure-JAX reference (lax convs, f32) for a sanity check."""
    x = jnp.transpose(x_nchw, (0, 2, 3, 1))
    dn = ("NHWC", "HWIO", "NHWC")
    y = lax.conv_general_dilated(x, params["w1_hwio"], (1, 1), "VALID",
                                 dimension_numbers=dn)
    y = jnp.maximum(y * params["s1"] + params["b1"], 0.0)
    y = lax.conv_general_dilated(y, params["w2_hwio"], (1, 1), "SAME",
                                 dimension_numbers=dn)
    y = jnp.maximum(y * params["s2"] + params["b2"], 0.0)
    y = lax.conv_general_dilated(y, params["w3_hwio"], (1, 1), "VALID",
                                 dimension_numbers=dn)
    y = jnp.maximum(y * params["s3"] + params["b3"] + x, 0.0)
    return jnp.transpose(y, (0, 3, 1, 2))


if __name__ == "__main__":
    key = jax.random.PRNGKey(0)
    k_x, k_p = jax.random.split(key)

    planes = 4
    expansion = 4
    inplanes = planes * expansion          # 16 (so the residual add is valid)
    N, H, W = 2, 16, 16

    x = jax.random.normal(k_x, (N, inplanes, H, W), jnp.float32)   # NCHW
    params = init_bottleneck_params(k_p, inplanes, planes, expansion)
    packed = pack_bottleneck_params(params, inplanes, planes, expansion)

    out = jax.block_until_ready(bottleneck_forward(x, packed, planes, expansion))
    ref = jax.block_until_ready(reference_forward(x, params, planes, expansion))

    assert out.shape == (N, inplanes, H, W)
    max_err = float(jnp.max(jnp.abs(out - ref)))
    # bf16 I/O + bf16 MXU operands => a few 1e-2 absolute error is expected.
    assert jnp.allclose(out, ref, atol=5e-2, rtol=5e-2), max_err

    print("KERNEL_OK")
</pallas_src>

<mosaic_0001>
module attributes {stable_mosaic.version = 11 : i64} {
  func.func @_bottleneck_kernel(%arg0: i32, %arg1: memref<1x256x128xbf16, #tpu.memory_space<vmem>>, %arg2: memref<128x128xbf16, #tpu.memory_space<vmem>>, %arg3: memref<1x128xf32, #tpu.memory_space<vmem>>, %arg4: memref<1152x128xbf16, #tpu.memory_space<vmem>>, %arg5: memref<1x128xf32, #tpu.memory_space<vmem>>, %arg6: memref<128x128xbf16, #tpu.memory_space<vmem>>, %arg7: memref<1x128xf32, #tpu.memory_space<vmem>>, %arg8: memref<1x256x128xbf16, #tpu.memory_space<vmem>>, %arg9: memref<256x1152xbf16, #tpu.memory_space<vmem>>) attributes {dimension_semantics = [#tpu.dimension_semantics<parallel>], iteration_bounds = array<i64: 2>, scalar_prefetch = 0 : i64, scratch_operands = 1 : i64, tpu.core_type = #tpu.core_type<tc>, window_params = [{transform_indices = @transform_0, window_bounds = array<i64: 1, 256, 128>}, {pipeline_mode = #tpu.pipeline_mode<synchronous>, transform_indices = @transform_1, window_bounds = array<i64: 128, 128>}, {pipeline_mode = #tpu.pipeline_mode<synchronous>, transform_indices = @transform_2, window_bounds = array<i64: 1, 128>}, {pipeline_mode = #tpu.pipeline_mode<synchronous>, transform_indices = @transform_3, window_bounds = array<i64: 1152, 128>}, {pipeline_mode = #tpu.pipeline_mode<synchronous>, transform_indices = @transform_4, window_bounds = array<i64: 1, 128>}, {pipeline_mode = #tpu.pipeline_mode<synchronous>, transform_indices = @transform_5, window_bounds = array<i64: 128, 128>}, {pipeline_mode = #tpu.pipeline_mode<synchronous>, transform_indices = @transform_6, window_bounds = array<i64: 1, 128>}, {transform_indices = @transform_7, window_bounds = array<i64: 1, 256, 128>}]} {
    %c0 = arith.constant 0 : index
    %c0_0 = arith.constant 0 : index
    %c0_1 = arith.constant 0 : index
    %0 = vector.load %arg1[%c0, %c0_0, %c0_1] : memref<1x256x128xbf16, #tpu.memory_space<vmem>>, vector<1x256x128xbf16>
    %1 = vector.shape_cast %0 : vector<1x256x128xbf16> to vector<256x128xbf16>
    %c0_2 = arith.constant 0 : index
    %c0_3 = arith.constant 0 : index
    %2 = vector.load %arg2[%c0_2, %c0_3] : memref<128x128xbf16, #tpu.memory_space<vmem>>, vector<128x128xbf16>
    %cst = arith.constant dense<0.000000e+00> : vector<256x128xf32>
    %3 = tpu.matmul %1, %2, %cst {dimension_numbers = #tpu.dot_dimension_numbers<[1], [0], [0], [1], [0, 0, 1, 1], [], []>} : vector<256x128xbf16>, vector<128x128xbf16>, vector<256x128xf32> -> vector<256x128xf32>
    %c0_4 = arith.constant 0 : index
    %c0_5 = arith.constant 0 : index
    %4 = vector.load %arg3[%c0_4, %c0_5] : memref<1x128xf32, #tpu.memory_space<vmem>>, vector<1x128xf32>
    %5 = vector.broadcast %4 : vector<1x128xf32> to vector<256x128xf32>
    %6 = arith.addf %3, %5 : vector<256x128xf32>
    %cst_6 = arith.constant 0.000000e+00 : f32
    %7 = vector.broadcast %cst_6 : f32 to vector<256x128xf32>
    %8 = arith.maximumf %6, %7 : vector<256x128xf32>
    %9 = tpu.iota {dimensions = array<i32: 0>} : vector<256x128xi32>
    %10 = arith.sitofp %9 : vector<256x128xi32> to vector<256x128xf32>
    %cst_7 = arith.constant 5.000000e-01 : f32
    %11 = vector.broadcast %cst_7 : f32 to vector<256x128xf32>
    %12 = arith.addf %10, %11 : vector<256x128xf32>
    %cst_8 = arith.constant 6.250000e-02 : f32
    %13 = vector.broadcast %cst_8 : f32 to vector<256x128xf32>
    %14 = arith.mulf %12, %13 : vector<256x128xf32>
    %15 = arith.fptosi %14 : vector<256x128xf32> to vector<256x128xi32>
    %c16_i32 = arith.constant 16 : i32
    %16 = vector.broadcast %c16_i32 : i32 to vector<256x128xi32>
    %17 = arith.muli %15, %16 : vector<256x128xi32>
    %18 = arith.subi %9, %17 : vector<256x128xi32>
    %c1_i32 = arith.constant 1 : i32
    %19 = vector.broadcast %c1_i32 : i32 to vector<256x128xi32>
    %20 = arith.cmpi sge, %15, %19 : vector<256x128xi32>
    %c14_i32 = arith.constant 14 : i32
    %21 = vector.broadcast %c14_i32 : i32 to vector<256x128xi32>
    %22 = arith.cmpi sle, %15, %21 : vector<256x128xi32>
    %c1_i32_9 = arith.constant 1 : i32
    %23 = vector.broadcast %c1_i32_9 : i32 to vector<256x128xi32>
    %24 = arith.cmpi sge, %18, %23 : vector<256x128xi32>
    %c14_i32_10 = arith.constant 14 : i32
    %25 = vector.broadcast %c14_i32_10 : i32 to vector<256x128xi32>
    %26 = arith.cmpi sle, %18, %25 : vector<256x128xi32>
    %c17_i32 = arith.constant 17 : i32
    %27 = tpu.dynamic_rotate %8 by %c17_i32 dim 0 : vector<256x128xf32>, i32 -> vector<256x128xf32>
    %28 = arith.andi %20, %24 : vector<256x128xi1>
    %cst_11 = arith.constant 0.000000e+00 : f32
    %29 = vector.broadcast %cst_11 : f32 to vector<256x128xf32>
    %30 = arith.select %28, %27, %29 : vector<256x128xi1>, vector<256x128xf32>
    %31 = arith.truncf %30 : vector<256x128xf32> to vector<256x128xbf16>
    %c0_12 = arith.constant 0 : index
    %c0_13 = arith.constant 0 : index
    %32 = vector.load %arg9[%c0_12, %c0_13] : memref<256x1152xbf16, #tpu.memory_space<vmem>>, vector<256x128xbf16>
    tpu.vector_store %arg9[%c0_12, %c0_13], %31 {strides = array<i32>} : memref<256x1152xbf16, #tpu.memory_space<vmem>>, vector<256x128xbf16>,
    %c16_i32_14 = arith.constant 16 : i32
    %33 = tpu.dynamic_rotate %8 by %c16_i32_14 dim 0 : vector<256x128xf32>, i32 -> vector<256x128xf32>
    %cst_15 = arith.constant 0.000000e+00 : f32
    %34 = vector.broadcast %cst_15 : f32 to vector<256x128xf32>
    %35 = arith.select %20, %33, %34 : vector<256x128xi1>, vector<256x128xf32>
    %36 = arith.truncf %35 : vector<256x128xf32> to vector<256x128xbf16>
    %c0_16 = arith.constant 0 : index
    %c128 = arith.constant 128 : index
    %37 = vector.load %arg9[%c0_16, %c128] : memref<256x1152xbf16, #tpu.memory_space<vmem>>, vector<256x128xbf16>
    tpu.vector_store %arg9[%c0_16, %c128], %36 {strides = array<i32>} : memref<256x1152xbf16, #tpu.memory_space<vmem>>, vector<256x128xbf16>,
    %c15_i32 = arith.constant 15 : i32
    %38 = tpu.dynamic_rotate %8 by %c15_i32 dim 0 : vector<256x128xf32>, i32 -> vector<256x128xf32>
    %39 = arith.andi %20, %26 : vector<256x128xi1>
    %cst_17 = arith.constant 0.000000e+00 : f32
    %40 = vector.broadcast %cst_17 : f32 to vector<256x128xf32>
    %41 = arith.select %39, %38, %40 : vector<256x128xi1>, vector<256x128xf32>
    %42 = arith.truncf %41 : vector<256x128xf32> to vector<256x128xbf16>
    %c0_18 = arith.constant 0 : index
    %c256 = arith.constant 256 : index
    %43 = vector.load %arg9[%c0_18, %c256] : memref<256x1152xbf16, #tpu.memory_space<vmem>>, vector<256x128xbf16>
    tpu.vector_store %arg9[%c0_18, %c256], %42 {strides = array<i32>} : memref<256x1152xbf16, #tpu.memory_space<vmem>>, vector<256x128xbf16>,
    %c1_i32_19 = arith.constant 1 : i32
    %44 = tpu.dynamic_rotate %8 by %c1_i32_19 dim 0 : vector<256x128xf32>, i32 -> vector<256x128xf32>
    %cst_20 = arith.constant 0.000000e+00 : f32
    %45 = vector.broadcast %cst_20 : f32 to vector<256x128xf32>
    %46 = arith.select %24, %44, %45 : vector<256x128xi1>, vector<256x128xf32>
    %47 = arith.truncf %46 : vector<256x128xf32> to vector<256x128xbf16>
    %c0_21 = arith.constant 0 : index
    %c384 = arith.constant 384 : index
    %48 = vector.load %arg9[%c0_21, %c384] : memref<256x1152xbf16, #tpu.memory_space<vmem>>, vector<256x128xbf16>
    tpu.vector_store %arg9[%c0_21, %c384], %47 {strides = array<i32>} : memref<256x1152xbf16, #tpu.memory_space<vmem>>, vector<256x128xbf16>,
    %49 = arith.truncf %8 : vector<256x128xf32> to vector<256x128xbf16>
    %c0_22 = arith.constant 0 : index
    %c512 = arith.constant 512 : index
    %50 = vector.load %arg9[%c0_22, %c512] : memref<256x1152xbf16, #tpu.memory_space<vmem>>, vector<256x128xbf16>
    tpu.vector_store %arg9[%c0_22, %c512], %49 {strides = array<i32>} : memref<256x1152xbf16, #tpu.memory_space<vmem>>, vector<256x128xbf16>,
    %c255_i32 = arith.constant 255 : i32
    %51 = tpu.dynamic_rotate %8 by %c255_i32 dim 0 : vector<256x128xf32>, i32 -> vector<256x128xf32>
    %cst_23 = arith.constant 0.000000e+00 : f32
    %52 = vector.broadcast %cst_23 : f32 to vector<256x128xf32>
    %53 = arith.select %26, %51, %52 : vector<256x128xi1>, vector<256x128xf32>
    %54 = arith.truncf %53 : vector<256x128xf32> to vector<256x128xbf16>
    %c0_24 = arith.constant 0 : index
    %c640 = arith.constant 640 : index
    %55 = vector.load %arg9[%c0_24, %c640] : memref<256x1152xbf16, #tpu.memory_space<vmem>>, vector<256x128xbf16>
    tpu.vector_store %arg9[%c0_24, %c640], %54 {strides = array<i32>} : memref<256x1152xbf16, #tpu.memory_space<vmem>>, vector<256x128xbf16>,
    %c241_i32 = arith.constant 241 : i32
    %56 = tpu.dynamic_rotate %8 by %c241_i32 dim 0 : vector<256x128xf32>, i32 -> vector<256x128xf32>
    %57 = arith.andi %22, %24 : vector<256x128xi1>
    %cst_25 = arith.constant 0.000000e+00 : f32
    %58 = vector.broadcast %cst_25 : f32 to vector<256x128xf32>
    %59 = arith.select %57, %56, %58 : vector<256x128xi1>, vector<256x128xf32>
    %60 = arith.truncf %59 : vector<256x128xf32> to vector<256x128xbf16>
    %c0_26 = arith.constant 0 : index
    %c768 = arith.constant 768 : index
    %61 = vector.load %arg9[%c0_26, %c768] : memref<256x1152xbf16, #tpu.memory_space<vmem>>, vector<256x128xbf16>
    tpu.vector_store %arg9[%c0_26, %c768], %60 {strides = array<i32>} : memref<256x1152xbf16, #tpu.memory_space<vmem>>, vector<256x128xbf16>,
    %c240_i32 = arith.constant 240 : i32
    %62 = tpu.dynamic_rotate %8 by %c240_i32 dim 0 : vector<256x128xf32>, i32 -> vector<256x128xf32>
    %cst_27 = arith.constant 0.000000e+00 : f32
    %63 = vector.broadcast %cst_27 : f32 to vector<256x128xf32>
    %64 = arith.select %22, %62, %63 : vector<256x128xi1>, vector<256x128xf32>
    %65 = arith.truncf %64 : vector<256x128xf32> to vector<256x128xbf16>
    %c0_28 = arith.constant 0 : index
    %c896 = arith.constant 896 : index
    %66 = vector.load %arg9[%c0_28, %c896] : memref<256x1152xbf16, #tpu.memory_space<vmem>>, vector<256x128xbf16>
    tpu.vector_store %arg9[%c0_28, %c896], %65 {strides = array<i32>} : memref<256x1152xbf16, #tpu.memory_space<vmem>>, vector<256x128xbf16>,
    %c239_i32 = arith.constant 239 : i32
    %67 = tpu.dynamic_rotate %8 by %c239_i32 dim 0 : vector<256x128xf32>, i32 -> vector<256x128xf32>
    %68 = arith.andi %22, %26 : vector<256x128xi1>
    %cst_29 = arith.constant 0.000000e+00 : f32
    %69 = vector.broadcast %cst_29 : f32 to vector<256x128xf32>
    %70 = arith.select %68, %67, %69 : vector<256x128xi1>, vector<256x128xf32>
    %71 = arith.truncf %70 : vector<256x128xf32> to vector<256x128xbf16>
    %c0_30 = arith.constant 0 : index
    %c1024 = arith.constant 1024 : index
    %72 = vector.load %arg9[%c0_30, %c1024] : memref<256x1152xbf16, #tpu.memory_space<vmem>>, vector<256x128xbf16>
    tpu.vector_store %arg9[%c0_30, %c1024], %71 {strides = array<i32>} : memref<256x1152xbf16, #tpu.memory_space<vmem>>, vector<256x128xbf16>,
    %c0_31 = arith.constant 0 : index
    %c0_32 = arith.constant 0 : index
    %73 = vector.load %arg9[%c0_31, %c0_32] : memref<256x1152xbf16, #tpu.memory_space<vmem>>, vector<256x1152xbf16>
    %c0_33 = arith.constant 0 : index
    %c0_34 = arith.constant 0 : index
    %74 = vector.load %arg4[%c0_33, %c0_34] : memref<1152x128xbf16, #tpu.memory_space<vmem>>, vector<1152x128xbf16>
    %cst_35 = arith.constant dense<0.000000e+00> : vector<256x128xf32>
    %75 = tpu.matmul %73, %74, %cst_35 {dimension_numbers = #tpu.dot_dimension_numbers<[1], [0], [0], [1], [0, 0, 1, 1], [], []>} : vector<256x1152xbf16>, vector<1152x128xbf16>, vector<256x128xf32> -> vector<256x128xf32>
    %c0_36 = arith.constant 0 : index
    %c0_37 = arith.constant 0 : index
    %76 = vector.load %arg5[%c0_36, %c0_37] : memref<1x128xf32, #tpu.memory_space<vmem>>, vector<1x128xf32>
    %77 = vector.broadcast %76 : vector<1x128xf32> to vector<256x128xf32>
    %78 = arith.addf %75, %77 : vector<256x128xf32>
    %cst_38 = arith.constant 0.000000e+00 : f32
    %79 = vector.broadcast %cst_38 : f32 to vector<256x128xf32>
    %80 = arith.maximumf %78, %79 : vector<256x128xf32>
    %81 = arith.truncf %80 : vector<256x128xf32> to vector<256x128xbf16>
    %c0_39 = arith.constant 0 : index
    %c0_40 = arith.constant 0 : index
    %82 = vector.load %arg6[%c0_39, %c0_40] : memref<128x128xbf16, #tpu.memory_space<vmem>>, vector<128x128xbf16>
    %cst_41 = arith.constant dense<0.000000e+00> : vector<256x128xf32>
    %83 = tpu.matmul %81, %82, %cst_41 {dimension_numbers = #tpu.dot_dimension_numbers<[1], [0], [0], [1], [0, 0, 1, 1], [], []>} : vector<256x128xbf16>, vector<128x128xbf16>, vector<256x128xf32> -> vector<256x128xf32>
    %c0_42 = arith.constant 0 : index
    %c0_43 = arith.constant 0 : index
    %84 = vector.load %arg7[%c0_42, %c0_43] : memref<1x128xf32, #tpu.memory_space<vmem>>, vector<1x128xf32>
    %85 = vector.broadcast %84 : vector<1x128xf32> to vector<256x128xf32>
    %86 = arith.addf %83, %85 : vector<256x128xf32>
    %87 = arith.extf %1 : vector<256x128xbf16> to vector<256x128xf32>
    %88 = arith.addf %86, %87 : vector<256x128xf32>
    %cst_44 = arith.constant 0.000000e+00 : f32
    %89 = vector.broadcast %cst_44 : f32 to vector<256x128xf32>
    %90 = arith.maximumf %88, %89 : vector<256x128xf32>
    %91 = arith.truncf %90 : vector<256x128xf32> to vector<256x128xbf16>
    %c0_45 = arith.constant 0 : index
    %c0_46 = arith.constant 0 : index
    %c0_47 = arith.constant 0 : index
    %92 = vector.load %arg8[%c0_45, %c0_46, %c0_47] : memref<1x256x128xbf16, #tpu.memory_space<vmem>>, vector<1x256x128xbf16>
    %93 = vector.shape_cast %92 : vector<1x256x128xbf16> to vector<256x128xbf16>
    %94 = vector.shape_cast %91 : vector<256x128xbf16> to vector<1x256x128xbf16>
    tpu.vector_store %arg8[%c0_45, %c0_46, %c0_47], %94 {strides = array<i32>} : memref<1x256x128xbf16, #tpu.memory_space<vmem>>, vector<1x256x128xbf16>,
    return
  }
  func.func @transform_0(%arg0: i32) -> (i32, i32, i32) {
    %c0_i32 = arith.constant 0 : i32
    %c0_i32_0 = arith.constant 0 : i32
    %c0_i32_1 = arith.constant 0 : i32
    return %arg0, %c0_i32, %c0_i32_0 : i32, i32, i32
  }
  func.func @transform_1(%arg0: i32) -> (i32, i32) {
    %c0_i32 = arith.constant 0 : i32
    %c0_i32_0 = arith.constant 0 : i32
    %c0_i32_1 = arith.constant 0 : i32
    return %c0_i32, %c0_i32_0 : i32, i32
  }
  func.func @transform_2(%arg0: i32) -> (i32, i32) {
    %c0_i32 = arith.constant 0 : i32
    %c0_i32_0 = arith.constant 0 : i32
    %c0_i32_1 = arith.constant 0 : i32
    return %c0_i32, %c0_i32_0 : i32, i32
  }
  func.func @transform_3(%arg0: i32) -> (i32, i32) {
    %c0_i32 = arith.constant 0 : i32
    %c0_i32_0 = arith.constant 0 : i32
    %c0_i32_1 = arith.constant 0 : i32
    return %c0_i32, %c0_i32_0 : i32, i32
  }
  func.func @transform_4(%arg0: i32) -> (i32, i32) {
    %c0_i32 = arith.constant 0 : i32
    %c0_i32_0 = arith.constant 0 : i32
    %c0_i32_1 = arith.constant 0 : i32
    return %c0_i32, %c0_i32_0 : i32, i32
  }
  func.func @transform_5(%arg0: i32) -> (i32, i32) {
    %c0_i32 = arith.constant 0 : i32
    %c0_i32_0 = arith.constant 0 : i32
    %c0_i32_1 = arith.constant 0 : i32
    return %c0_i32, %c0_i32_0 : i32, i32
  }
  func.func @transform_6(%arg0: i32) -> (i32, i32) {
    %c0_i32 = arith.constant 0 : i32
    %c0_i32_0 = arith.constant 0 : i32
    %c0_i32_1 = arith.constant 0 : i32
    return %c0_i32, %c0_i32_0 : i32, i32
  }
  func.func @transform_7(%arg0: i32) -> (i32, i32, i32) {
    %c0_i32 = arith.constant 0 : i32
    %c0_i32_0 = arith.constant 0 : i32
    %c0_i32_1 = arith.constant 0 : i32
    return %arg0, %c0_i32, %c0_i32_0 : i32, i32, i32
  }
}

</mosaic_0001>

<bundles_post_ra>
// kernel: tpu_custom_call.1
= control target key start
LH: loop header
LB: loop body
LE: loop exit
PB: predicated region body
PF: predicated region fallthrough
CT: control target
= control target key end

     0   :  { %s10778_s0 = inlined_call_operand.hbm [shape: bf16[2,256,128], index: 0, kind: input, shape index: {}]   ;;  %s10779_s1 = inlined_call_operand.hbm [shape: bf16[128,128], index: 1, kind: input, shape index: {}]   ;;  %s10780_s2 = inlined_call_operand.vmem [shape: f32[1,128], index: 2, kind: input, shape index: {}]   ;;  %s10781_s3 = inlined_call_operand.hbm [shape: bf16[1152,128], index: 3, kind: input, shape index: {}]   ;;  %s10782_s4 = inlined_call_operand.vmem [shape: f32[1,128], index: 4, kind: input, shape index: {}]   ;;  %s10783_s5 = inlined_call_operand.hbm [shape: bf16[128,128], index: 5, kind: input, shape index: {}]   ;;  %s10784_s6 = inlined_call_operand.vmem [shape: f32[1,128], index: 6, kind: input, shape index: {}]   ;;  %s10785_s7 = inlined_call_operand.hbm [shape: bf16[2,256,128], index: 7, kind: output, shape index: {}]  }
   0x1   :  { %10871 = sst [smem:[#allocation93_spill]] %s10779_s1 }
   0x2   :  { %12 = vsyncpa [#allocation4], 0 }
   0x3   :  { %14 = vsyncpa [#allocation4 + $0x1], 0 }
   0x4   :  { %15 = vsyncpa [#allocation7], 0 }
   0x5   :  { %16 = vsyncpa [#allocation10], 0 }
   0x6   :  { %17 = vsyncpa [#allocation5], 0 }
   0x7   :  { %19 = vsyncpa [#allocation5 + $0x1], 0  ;;  %s6741_s24 = smov 0   ;;  %s6743_s25 = smov 0  }
   0x8   :  { %s6745_s26 = smov 0   ;;  %s6747_s27 = smov 0  }
   0x9 LB: > { %s6762_s28 = sadd.s32 4294967295, %s6692_s27   ;;  %s4869_s29 = sadd.s32 4294967294, %s6692_s27   ;;  %s6692_s27 = sphi %s6747_s27, %s11409_s27   ;;  %s6688_s26 = sphi %s6745_s26, %s11408_s26   ;;  %s6684_s25 = sphi %s6743_s25, %s11407_s25   ;;  %s6680_s24 = sphi %s6741_s24, %s11406_s24  }
   0xa   : > { %p45_p0 = scmp.ne.s32.totalorder %s6684_s25, %s6680_s24  ;;  %p46_p1 = scmp.eq.s32.totalorder %s6762_s28, 0 }
   0xb   : > { %p195_p2 = scmp.eq.s32.totalorder %s6762_s28, 1  ;;  %p201_p3 = scmp.eq.s32.totalorder %s4869_s29, 1 }
   0xc   : > { %p6771_p4 = por %p46_p1, %p45_p0  ;;  %p4870_p5 = scmp.ge.s32.totalorder %s6692_s27, 1 }
   0xd   : > { %p6776_p6 = por %p201_p3, %p45_p0  ;;  %p208_p7 = scmp.lt.s32.totalorder %s6692_s27, 3 }
   0xe   : > { %s10874_s1 = sld [smem:[#allocation93_spill]]  ;;  %s6694_s13 = smov [#allocation6]  }
   0xf   : > { %p6784_p8 = pnand %p4870_p5, %p208_p7  ;;  %s221_s14 = sshll.u32 %s6694_s13, 4  ;;  %s222_s14 = int_to_ptr.vmem [resolvable:$true] %s221_s14 }
  0x10   : > { %s236_s18 = sshll.u32 %s10781_s3, 4  ;;  %s10786_s19 = smov 64   ;;  %s237_s18 = int_to_ptr.hbm [resolvable:$true] %s236_s18 }
  0x11   : > { %p6426_p9 = pneg %p6784_p8  ;;  %s10787_s20 = smov 4  }
  0x12   : > { %s6697_s21 = smov [#allocation8]   ;;  %s253_s9 = sshll.u32 %s10783_s5, 4  ;;  %s254_s9 = int_to_ptr.hbm [resolvable:$true] %s253_s9 }
  0x13   : > { %p6792_p10 = pnand %p6426_p9, %p46_p1  ;;  %s238_s22 = sshll.u32 %s6697_s21, 4  ;;  %s239_s22 = int_to_ptr.vmem [resolvable:$true] %s238_s22 }
  0x14   : > { %s219_s11 = sshll.u32 %s10874_s1, 4  ;;  %s6698_s10 = smov [#allocation9]   ;;  %s220_s11 = int_to_ptr.hbm [resolvable:$true] %s219_s11 }
  0x15   : > { %6429 = dma.hbm_to_vmem [thread:$0]  (!%p6792_p10), %s220_s11, 1024, %s222_s14, [#allocation7], %s10786_s19, %s10786_s19, %s10787_s20  }
  0x16   : > { %6432 = dma.hbm_to_vmem [thread:$0]  (!%p6792_p10), %s237_s18, 9216, %s239_s22, [#allocation7], %s10786_s19, %s10786_s19, %s10787_s20  }
  0x17   : > { %s255_s11 = sshll.u32 %s6698_s10, 4  ;;  %s6814_s13 = sadd.s32 1, %s6692_s27   ;;  %s256_s11 = int_to_ptr.vmem [resolvable:$true] %s255_s11 }
  0x18   : > { %6435 = dma.hbm_to_vmem [thread:$0]  (!%p6792_p10), %s254_s9, 1024, %s256_s11, [#allocation10], %s10786_s19, %s10786_s19, %s10787_s20  }
  0x19   : > { %s29_s14 = ssub.s32 %s6692_s27, %s6814_s13  ;;  %s32_s16 = sadd.s32 1, %s6688_s26 }
  0x1a   : > { %p30_p12 = scmp.eq.s32.totalorder %s29_s14, 0  ;;  %p39_p13 = scmp.ne.s32.totalorder %s6688_s26, %s6684_s25 }
  0x1b   : > { %p40_p0 = scmp.eq.s32.totalorder %s6692_s27, 0  ;;  %p6447_p5 = scmp.lt.s32.totalorder %s6692_s27, 2 }
  0x1c   : > { %s6828_s17 = scalar_select %p30_p12, %s6688_s26, %s32_s16  }
  0x1d   : > { %p6832_p3 = por %p195_p2, %p39_p13  ;;  %s272_s21 = sand.u32 1, %s6688_s26  }
  0x1e   : > { %s5881_s15 = sshll.u32 %s6692_s27, 7  ;;  %p41_p7 = por %p40_p0, %p39_p13 }
  0x1f   : > { %s4875_s22 = sshll.u32 %s272_s21, 7  ;;  %s281_s9 = scalar_lea.hbm %s10778_s0, %s5881_s15 }
  0x20   : > { %s282_s10 = sshll.u32 %s281_s9, 4  ;;  %s276_s11 = scalar_lea.vmem [#allocation3], %s4875_s22  ;;  %s283_s10 = int_to_ptr.hbm [resolvable:$true] %s282_s10 }
  0x21   : > { %s284_s14 = sshll.u32 %s276_s11, 4  ;;  %p6842_p9 = pnand %p6447_p5, %p41_p7  ;;  %s285_s14 = int_to_ptr.vmem [resolvable:$true] %s284_s14 }
  0x22   : > { %s273_s19 = scalar_lea.sflag [#allocation4], %s272_s21  ;;  %s6588_s20 = sshra.s32 %s283_s10, 4  ;;  %s6589_s20 = int_to_ptr.hbm [resolvable:$true] %s6588_s20 }
  0x23   : > { %s6590_s1 = scalar_lea.hbm %s6589_s20, 128  ;;  %p6592_p10 = pneg %p6842_p9 }
  0x24   : > { %p6591_p2 = scmp.ne.s32.totalorder %s6589_s20, %s6590_s1  ;;  %s6595_s22 = scalar_lea.hbm %s10778_s0, 256 }
  0x25   : > { %p6596_p0 = scmp.lt.s32.totalorder %s6589_s20, %s10778_s0  ;;  %p6597_p5 = scmp.lt.s32.totalorder %s6595_s22, %s6590_s1 }
  0x26   : > { %p6593_p12 = pnand %p6592_p10, %p6591_p2 }
  0x27   : > { %p6598_p7 = por %p6597_p5, %p6596_p0 }
  0x28   : > { %p6594_p13 = pneg %p6593_p12 }
  0x2a   : > { %p6599_p11 = pnand %p6598_p7, %p6594_p13 }
  0x2c   : > { %6602 = shalt.err (!%p6599_p11)
}
  0x2d   : > { %s10879_s21 = smov 4   ;;  %s10880_s11 = smov 64  }
  0x2e   : > { %6439 = dma.hbm_to_vmem [thread:$0]  (!%p6842_p9), %s283_s10, 2048, %s285_s14, %s273_s19, %s10880_s11, %s10880_s11, %s10879_s21  }
  0x2f   : > { %296 = sbr.rel (%p6784_p8) target bundleno = 1465 (0x5b9), region = 48 }
  0x34   : > { %s6862_s15 = sand.u32 1, %s6684_s25  }
  0x35   : > { %s4879_s1 = sshll.u32 %s6862_s15, 7  ;;  %s299_s20 = scalar_lea.sflag [#allocation4], %s6862_s15 }
  0x36   : > { %s6868_s23 = scalar_lea.vmem [#allocation3], %s4879_s1 }
  0x37   : > { %6663 = dma.done.wait (%p6771_p4), %s299_s20, 2048  }
  0x38   : > { %6665 = vsyncadd (%p6771_p4), %s299_s20, 4294965248 }
  0x39   : > { %6667 = dma.done.wait (%p46_p1), [#allocation7], 10240  }
  0x3a   : > { %6669 = vsyncadd (%p46_p1), [#allocation7], 4294957056 }
  0x3b   : > { %6671 = dma.done.wait (%p46_p1), [#allocation10], 1024  }
  0x3c   : > { %6673 = vsyncadd (%p46_p1), [#allocation10], 4294966272  ;;  %v5905_v0 = vld [vmem:[#allocation6 + $0x38] sm:$0xff]  ;;  %v5904_v1 = vld [vmem:[#allocation6 + $0x30] sm:$0xff]  ;;  %v666_v18 = vlaneseq  ;;  %s10643_s19 = scalar_lea.vmem [#allocation11], %s4879_s1  ;;  %s6130_s1 = sshll.u32 %s6762_s28, 7 }
  0x3d   : > { %545 = vmatpush.bf16.msra.mxu0 %v5905_v0  ;;  %6226 = vmatpush.bf16.msra.mxu3 %v5905_v0  ;;  %v5903_v2 = vld [vmem:[#allocation6 + $0x28] sm:$0xff]  ;;  %v5902_v3 = vld [vmem:[#allocation6 + $0x20] sm:$0xff]  ;;  %v5901_v4 = vld [vmem:[#allocation6 + $0x18] sm:$0xff]  ;;  %s4763_s16 = scalar_lea.hbm %s10785_s7, %s6130_s1  ;;  %s4764_s22 = sshll.u32 %s10643_s19, 4  ;;  %s4765_s22 = int_to_ptr.vmem [resolvable:$true] %s4764_s22 }
  0x3e   : > { %v5900_v5 = vld [vmem:[#allocation6 + $0x10] sm:$0xff]  ;;  %v5899_v6 = vld [vmem:[#allocation6 + $0x8] sm:$0xff]  ;;  %v5898_v7 = vld [vmem:[#allocation6] sm:$0xff]  ;;  %v6892_v19 = vshrl.u32 %v666_v18, 7  ;;  %s4766_s29 = sshll.u32 %s4763_s16, 4  ;;  %s4752_s28 = scalar_lea.sflag [#allocation5], %s6862_s15  ;;  %s4767_s29 = int_to_ptr.hbm [resolvable:$true] %s4766_s29 }
  0x3f   : > { %v5882_v8 = vld [vmem:[%s6868_s23] sm:$0xff]  ;;  %v5883_v10 = vld [vmem:[%s6868_s23 + $0x8] sm:$0xff]  ;;  %v5884_v12 = vld [vmem:[%s6868_s23 + $0x10] sm:$0xff]  ;;  %s6638_s20 = scalar_lea.hbm %s10785_s7, 256 }
  0x40   : > { %v5894_v9 = vld [vmem:[%s6868_s23 + $0x60] sm:$0xff]  ;;  %v5895_v11 = vld [vmem:[%s6868_s23 + $0x68] sm:$0xff]  ;;  %v5896_v13 = vld [vmem:[%s6868_s23 + $0x70] sm:$0xff]  ;;  %v6895_v20 = vadd.s32 16, %v6892_v19  ;;  %v6898_v21 = vadd.s32 240, %v6892_v19  ;;  %v6903_v24 = vadd.s32 24, %v6892_v19  ;;  %v699_v54 = vcvt.s32.f32 %v6892_v19 }
  0x41   : > { %546 = vmatpush.bf16.msra.mxu0 %v5904_v1  ;;  %6227 = vmatpush.bf16.msra.mxu3 %v5904_v1  ;;  %v5885_v14 = vld [vmem:[%s6868_s23 + $0x18] sm:$0xff]  ;;  %v5886_v16 = vld [vmem:[%s6868_s23 + $0x20] sm:$0xff]  ;;  %v5887_v17 = vld [vmem:[%s6868_s23 + $0x28] sm:$0xff]  ;;  %v6907_v28 = vadd.s32 8, %v6892_v19  ;;  %v6910_v29 = vadd.s32 248, %v6892_v19  ;;  %v689_v42 = vadd.s32 176, %v6892_v19 }
  0x42   : > { %v5897_v15 = vld [vmem:[%s6868_s23 + $0x78] sm:$0xff]  ;;  %v701_v22 = vcvt.s32.f32 %v6895_v20  ;;  %v729_v23 = vcvt.s32.f32 %v6898_v21  ;;  %v5888_v25 = vld [vmem:[%s6868_s23 + $0x30] sm:$0xff]  ;;  %v702_v31 = vcvt.s32.f32 %v6903_v24  ;;  %v6917_v43 = vadd.s32 208, %v6892_v19 }
  0x43   : > { %v700_v30 = vcvt.s32.f32 %v6907_v28  ;;  %v730_v34 = vcvt.s32.f32 %v6910_v29  ;;  %v721_v46 = vcvt.s32.f32 %v689_v42  ;;  %v6921_v50 = vadd.s32 32, %v6892_v19  ;;  %v5889_v57 = vld [vmem:[%s6868_s23 + $0x38] sm:$0xff] }
  0x44   : > { %v733_v26 = vadd.f32 0.5, %v701_v22  ;;  %v761_v27 = vadd.f32 0.5, %v729_v23  ;;  %v734_v36 = vadd.f32 0.5, %v702_v31  ;;  %v725_v47 = vcvt.s32.f32 %v6917_v43 }
  0x45   : > { %547 = vmatpush.bf16.msra.mxu0 %v5903_v2  ;;  %6228 = vmatpush.bf16.msra.mxu3 %v5903_v2  ;;  %v732_v35 = vadd.f32 0.5, %v700_v30  ;;  %v762_v40 = vadd.f32 0.5, %v730_v34  ;;  %v753_v52 = vadd.f32 0.5, %v721_v46  ;;  %v703_v61 = vcvt.s32.f32 %v6921_v50 }
  0x46   : > { %v765_v32 = vmul.f32 0.0625, %v733_v26  ;;  %v793_v33 = vmul.f32 0.0625, %v761_v27  ;;  %v766_v45 = vmul.f32 0.0625, %v734_v36  ;;  %v757_v53 = vadd.f32 0.5, %v725_v47  ;;  %v6979_v47 = vld [vmem:[%s10780_s2] ss:$0 sm:$0xff] }
  0x47   : > { %v764_v44 = vmul.f32 0.0625, %v732_v35  ;;  %v794_v49 = vmul.f32 0.0625, %v762_v40  ;;  %v785_v58 = vmul.f32 0.0625, %v753_v52  ;;  %v6947_v31 = vadd.s32 184, %v6892_v19 }
  0x48   : > { %v6261_v37 = vceil.f32 %v765_v32  ;;  %v6262_v38 = vfloor.f32 %v765_v32  ;;  %v6401_v39 = vceil.f32 %v793_v33  ;;  %vm6260_vm0 = vcmp.lt.s32.totalorder %v765_v32, 0 }
  0x49   : > { %548 = vmatpush.bf16.msra.mxu0 %v5902_v3  ;;  %6229 = vmatpush.bf16.msra.mxu3 %v5902_v3  ;;  %v6402_v41 = vfloor.f32 %v793_v33  ;;  %vm6400_vm1 = vcmp.lt.s32.totalorder %v793_v33, 0  ;;  %vm6255_vm2 = vcmp.lt.s32.totalorder %v764_v44, 0  ;;  %vm6265_vm3 = vcmp.lt.s32.totalorder %v766_v45, 0 }
  0x4a   : > { %v6263_v48 = vsel %vm6260_vm0, %v6261_v37, %v6262_v38  ;;  %v6266_v55 = vceil.f32 %v766_v45  ;;  %v6267_v56 = vfloor.f32 %v766_v45  ;;  %v789_v59 = vmul.f32 0.0625, %v757_v53 }
  0x4b   : > { %v6403_v51 = vsel %vm6400_vm1, %v6401_v39, %v6402_v41  ;;  %v6256_v60 = vceil.f32 %v764_v44  ;;  %v6257_v62 = vfloor.f32 %v764_v44  ;;  %vm6405_vm4 = vcmp.lt.s32.totalorder %v794_v49, 0 }
  0x4c   : > { %v6406_v63 = vceil.f32 %v794_v49  ;;  %v6407_v0 = vfloor.f32 %v794_v49  ;;  %vm6360_vm5 = vcmp.lt.s32.totalorder %v785_v58, 0  ;;  %v6361_v1 = vceil.f32 %v785_v58 }
  0x4d   : > { %549 = vmatpush.bf16.msra.mxu0 %v5901_v4  ;;  %6230 = vmatpush.bf16.msra.mxu3 %v5901_v4  ;;  %v6362_v2 = vfloor.f32 %v785_v58  ;;  %v731_v3 = vadd.f32 0.5, %v699_v54  ;;  %v6926_v4 = vcvt.f32.s32 %v6263_v48  ;;  %vm6380_vm6 = vcmp.lt.s32.totalorder %v789_v59, 0 }
  0x4e   : > { %v6950_v32 = vadd.s32 200, %v6892_v19  ;;  %v6953_v33 = vadd.s32 216, %v6892_v19  ;;  %v722_v36 = vcvt.s32.f32 %v6947_v31  ;;  %v10882_v41 = vmov 0 }
  0x4f   : > { %vm10789_vm9 = vcmp.ge.s32.totalorder %v6926_v4, 1 }
  0x50   : > { %v724_v37 = vcvt.s32.f32 %v6950_v32  ;;  %v754_v44 = vadd.f32 0.5, %v722_v36 }
  0x51   : > { %550 = vmatpush.bf16.msra.mxu0 %v5900_v5  ;;  %6231 = vmatpush.bf16.msra.mxu3 %v5900_v5  ;;  %v6928_v5 = vcvt.f32.s32 %v6403_v51 }
  0x52   : > { %v756_v45 = vadd.f32 0.5, %v724_v37  ;;  %v786_v54 = vmul.f32 0.0625, %v754_v44 }
  0x53   : > { %vm10796_vm11 = vcmp.le.s32.totalorder %v6928_v5, 14 }
  0x54   : > { %vm6365_vm14 = vcmp.lt.s32.totalorder %v786_v54, 0 }
  0x55   : > { %551 = vmatpush.bf16.msra.mxu0 %v5899_v6  ;;  %6232 = vmatpush.bf16.msra.mxu3 %v5899_v6  ;;  %v6268_v6 = vsel %vm6265_vm3, %v6266_v55, %v6267_v56  ;;  %v788_v55 = vmul.f32 0.0625, %v756_v45 }
  0x57   : > { %vm6375_vm15 = vcmp.lt.s32.totalorder %v788_v55, 0 }
  0x59   : > { %552 = vmatpush.bf16.msra.mxu0 %v5898_v7  ;;  %6233 = vmatpush.bf16.msra.mxu3 %v5898_v7  ;;  %v6363_v7 = vsel %vm6360_vm5, %v6361_v1, %v6362_v2  ;;  %v6377_v1 = vfloor.f32 %v788_v55 }
  0x5c   : > { %553 = vmatmul.bf16.vlgmr.msra.gmra.mxu0 %v5882_v8  ;;  %613 = vmatmul.bf16.vlgmr.msra.gmra.mxu3 %v5894_v9  ;;  %v6381_v8 = vceil.f32 %v789_v59  ;;  %v6382_v9 = vfloor.f32 %v789_v59 }
  0x5e   : > { %v6383_v23 = vsel %vm6380_vm6, %v6381_v8, %v6382_v9  ;;  %vm1051_vm6 = vcmp.lt.s32.totalorder %v6892_v19, 1 }
  0x5f   : > { %v6965_v40 = vcvt.f32.s32 %v6383_v23 }
  0x61   : > { %10881 = vst [vmem:[#allocation16_spill] sm:$0xff] %v6965_v40  ;;  %v853_v58 = vmul.u32 16, %v6965_v40 }
  0x6c   : > { %558 = vmatmul.bf16.gmra.mxu0 %v5883_v10  ;;  %618 = vmatmul.bf16.gmra.mxu3 %v5895_v11  ;;  %v735_v10 = vadd.f32 0.5, %v703_v61  ;;  %v6931_v11 = vcvt.f32.s32 %v6363_v7 }
  0x6e   : > { %v849_v18 = vmul.u32 16, %v6931_v11  ;;  %v767_v22 = vmul.f32 0.0625, %v735_v10  ;;  %vm10791_vm7 = vcmp.le.s32.totalorder %v6931_v11, 14 }
  0x70   : > { %v6944_v30 = vsub.s32 %v689_v42, %v849_v18  ;;  %v6271_v38 = vceil.f32 %v767_v22  ;;  %v726_v42 = vcvt.s32.f32 %v6953_v33  ;;  %vm6270_vm13 = vcmp.lt.s32.totalorder %v767_v22, 0 }
  0x71   : > { %v6272_v46 = vfloor.f32 %v767_v22 }
  0x72   : > { %vm10788_vm10 = vcmp.ge.s32.totalorder %v6944_v30, 1  ;;  %v758_v52 = vadd.f32 0.5, %v726_v42 }
  0x73   : > { %vm6971_vm12 = vmand %vm10791_vm7, %vm10788_vm10  ;;  %v6273_v56 = vsel %vm6270_vm13, %v6271_v38, %v6272_v46  ;;  %vm10802_vm10 = vcmp.le.s32.totalorder %v6944_v30, 14 }
  0x74   : > { %v10883_v41 = vsel %vm6971_vm12, 4294967295, %v10882_v41  ;;  %v790_v59 = vmul.f32 0.0625, %v758_v52  ;;  %v6993_v61 = vcvt.f32.s32 %v6273_v56 }
  0x75   : > { %10884 = vst [vmem:[#allocation17_spill] sm:$0xff] %v10883_v41 }
  0x76   : > { %vm6385_vm1 = vcmp.lt.s32.totalorder %v790_v59, 0  ;;  %v6387_v7 = vfloor.f32 %v790_v59  ;;  %v831_v18 = vmul.u32 16, %v6993_v61 }
  0x7c   : > { %563 = vmatmul.bf16.gmra.mxu0 %v5884_v12  ;;  %623 = vmatmul.bf16.gmra.mxu3 %v5896_v13  ;;  %v6258_v12 = vsel %vm6255_vm2, %v6256_v60, %v6257_v62  ;;  %v6408_v13 = vsel %vm6405_vm4, %v6406_v63, %v6407_v0  ;;  %v6366_v62 = vceil.f32 %v786_v54  ;;  %v6367_v63 = vfloor.f32 %v786_v54 }
  0x7d   : > { %v6942_v26 = vcvt.f32.s32 %v6408_v13 }
  0x7f   : > { %v858_v51 = vmul.u32 16, %v6942_v26  ;;  %vm10795_vm3 = vcmp.le.s32.totalorder %v6942_v26, 14 }
  0x81   : > { %v7003_v9 = vsub.s32 %v6910_v29, %v858_v51 }
  0x8c   : > { %568 = vmatmul.bf16.gmra.mxu0 %v5885_v14  ;;  %628 = vmatmul.bf16.gmra.mxu3 %v5897_v15  ;;  %v6935_v14 = vcvt.f32.s32 %v6268_v6  ;;  %v763_v15 = vmul.f32 0.0625, %v731_v3  ;;  %v6368_v3 = vsel %vm6365_vm14, %v6366_v62, %v6367_v63  ;;  %v6386_v6 = vceil.f32 %v790_v59 }
  0x8d   : > { %v7006_v10 = vcvt.f32.s32 %v6368_v3  ;;  %vm10794_vm14 = vcmp.ge.s32.totalorder %v7003_v9, 1 }
  0x8e   : > { %v6251_v27 = vceil.f32 %v763_v15  ;;  %v830_v34 = vmul.u32 16, %v6935_v14  ;;  %vm6250_vm8 = vcmp.lt.s32.totalorder %v763_v15, 0  ;;  %v6252_v35 = vfloor.f32 %v763_v15 }
  0x8f   : > { %vm10793_vm2 = vcmp.ge.s32.totalorder %v6935_v14, 1  ;;  %v6388_v13 = vsel %vm6385_vm1, %v6386_v6, %v6387_v7 }
  0x90   : > { %v6987_v53 = vsub.s32 %v6903_v24, %v830_v34  ;;  %v6376_v24 = vceil.f32 %v788_v55  ;;  %v7029_v34 = vcvt.f32.s32 %v6388_v13 }
  0x92   : > { %vm10792_vm4 = vcmp.ge.s32.totalorder %v6987_v53, 1  ;;  %v854_v42 = vmul.u32 16, %v7029_v34 }
  0x9c   : > { %573 = vmatmul.bf16.gmra.mxu0 %v5886_v16  ;;  %v829_v16 = vmul.u32 16, %v6926_v4 }
  0x9e   : > { %v6962_v39 = vsub.s32 %v6895_v20, %v829_v16  ;;  %v6253_v20 = vsel %vm6250_vm8, %v6251_v27, %v6252_v35  ;;  %v850_v35 = vmul.u32 16, %v7006_v10 }
  0x9f   : > { %v6991_v60 = vcvt.f32.s32 %v6253_v20 }
  0xa0   : > { %vm10790_vm0 = vcmp.le.s32.totalorder %v6962_v39, 14  ;;  %v7038_v44 = vsub.s32 %v6947_v31, %v850_v35  ;;  %v7053_v31 = vsub.s32 %v6953_v33, %v854_v42  ;;  %v7139_v35 = vadd.s32 224, %v6892_v19 }
  0xa1   : > { %v827_v15 = vmul.u32 16, %v6991_v60  ;;  %vm7070_vm8 = vmand %vm10789_vm9, %vm10790_vm0 }
  0xa2   : > { %10887 = vst [vmem:[#allocation20_spill] sm:$0xff] %v7038_v44  ;;  %vm10800_vm13 = vcmp.ge.s32.totalorder %v7038_v44, 1  ;;  %vm10801_vm0 = vcmp.ge.s32.totalorder %v7053_v31, 1 }
  0xa3   : > { %v7041_v45 = vsub.s32 %v6892_v19, %v827_v15  ;;  %v5891_v15 = vld [vmem:[%s6868_s23 + $0x48] sm:$0xff] }
  0xa5   : > { %vm10799_vm1 = vcmp.le.s32.totalorder %v7041_v45, 14 }
  0xac   : > { %578 = vmatmul.bf16.gmra.mxu0 %v5887_v17  ;;  %v857_v17 = vmul.u32 16, %v6928_v5 }
  0xae   : > { %v6982_v48 = vsub.s32 %v6898_v21, %v857_v17  ;;  %v7020_v17 = vsub.s32 %v6917_v43, %v853_v58 }
  0xb0   : > { %vm10797_vm5 = vcmp.le.s32.totalorder %v6982_v48, 14  ;;  %10886 = vst [vmem:[#allocation19_spill] sm:$0xff] %v7020_v17 }
  0xbc   : > { %583 = vmatmul.bf16.gmra.mxu0 %v5888_v25  ;;  %v6940_v25 = vcvt.f32.s32 %v6258_v12  ;;  %v6378_v12 = vsel %vm6375_vm15, %v6376_v24, %v6377_v1  ;;  %vm10798_vm15 = vcmp.ge.s32.totalorder %v6965_v40, 1 }
  0xbe   : > { %v828_v49 = vmul.u32 16, %v6940_v25 }
  0xc0   : > { %v6998_v2 = vsub.s32 %v6907_v28, %v828_v49  ;;  %v7010_v28 = vcvt.f32.s32 %v6378_v12  ;;  %v7048_v49 = vsub.s32 %v6921_v50, %v831_v18 }
  0xc2   : > { %10885 = vst [vmem:[#allocation18_spill] sm:$0xff] %v7010_v28  ;;  %v852_v37 = vmul.u32 16, %v7010_v28 }
  0xc4   : > { %v7062_v56 = vsub.s32 %v6950_v32, %v852_v37 }
  0xc6   : > { %10889 = vst [vmem:[#allocation22_spill] sm:$0xff] %v7062_v56 }
  0xcc   : > { %588 = vmatmul.bf16.gmra.mxu0 %v5889_v57  ;;  %v5890_v57 = vld [vmem:[%s6868_s23 + $0x40] sm:$0xff] }
  0xd9   : > { %v554_v21 = vpop.f32.mrf.mxu0 }
  0xda   : > { %v555_v0 = vadd.f32 %v6979_v47, %v554_v21 }
  0xdc   : > { %v7000_v8 = vmax.f32 %v555_v0, 0.0  ;;  %593 = vmatmul.bf16.gmra.mxu0 %v5890_v57 }
  0xde   : > { %v1214_v29 = vsel %vm10789_vm9, %v7000_v8, 0.0  ;;  %v1597_v16 = vpack.c.bf16 %v7000_v8, %v7000_v8  ;;  %v1915_v23 = vsel %vm10796_vm11, %v7000_v8, 0.0  ;;  %v10808_v51 = vrot.slane %v7000_v8, 7  ;;  %vm7087_vm9 = vmand %vm10793_vm2, %vm10792_vm4 }
  0xdf   : > { %v1246_v22 = vpack.c.bf16 %v1214_v29, %v1214_v29  ;;  %v614_v27 = vpop.f32.mrf.mxu3  ;;  %v1947_v43 = vpack.c.bf16 %v1915_v23, %v1915_v23  ;;  %v10807_v52 = vrot.slane %v7000_v8, 1  ;;  %vm7104_vm4 = vmand %vm10795_vm3, %vm10794_vm14  ;;  %v7115_v29 = vadd.s32 192, %v6892_v19 }
  0xe0   : > { %1629 = vst [vmem:[#allocation2 + $0x10] sm:$0xf] %v1597_v16  ;;  %v615_v36 = vadd.f32 %v6979_v47, %v614_v27  ;;  %vm7121_vm14 = vmand %vm10796_vm11, %vm10797_vm5  ;;  %vm10899_vm5 = vcmp.ge.s32.totalorder %v6998_v2, 1  ;;  %vm10826_vm11 = vcmp.ge.s32.totalorder %v6962_v39, 1 }
  0xe1   : > { %1278 = vst [vmem:[#allocation2 + $0x4c] sm:$0xf] %v1246_v22  ;;  %v556_v38 = vpop.f32.mrf.mxu0 }
  0xe2   : > { %1979 = vst [vmem:[#allocation2 + $0x454] sm:$0xf] %v1947_v43  ;;  %v7043_v20 = vmax.f32 %v615_v36, 0.0  ;;  %v557_v46 = vadd.f32 %v6979_v47, %v556_v38 }
  0xe4   : > { %10888 = vst [vmem:[#allocation21_spill] sm:$0xff] %v7043_v20  ;;  %v1238_v54 = vsel %vm10798_vm15, %v7043_v20, 0.0  ;;  %v1621_v55 = vpack.c.bf16 %v7043_v20, %v7043_v20  ;;  %v1907_v32 = vsel %vm10791_vm7, %v7043_v20, 0.0  ;;  %v7078_v57 = vmax.f32 %v557_v46, 0.0 }
  0xe5   : > { %v1270_v33 = vpack.c.bf16 %v1238_v54, %v1238_v54  ;;  %v10806_v58 = vrot.slane %v7043_v20, 7  ;;  %v10803_v59 = vrot.slane %v7043_v20, 1  ;;  %v1939_v21 = vpack.c.bf16 %v1907_v32, %v1907_v32 }
  0xe6   : > { %1653 = vst [vmem:[#allocation2 + $0x370] sm:$0xf] %v1621_v55  ;;  %vm10804_vm7 = vcmp.le.s32.totalorder %v6987_v53, 14  ;;  %v1020_v63 = vrot.slane %v7078_v57, 7  ;;  %v1215_v0 = vsel %vm10793_vm2, %v7078_v57, 0.0  ;;  %v1309_v24 = vrot.slane %v7078_v57, 1 }
  0xe7   : > { %1302 = vst [vmem:[#allocation2 + $0x3ac] sm:$0xf] %v1270_v33  ;;  %v1598_v1 = vpack.c.bf16 %v7078_v57, %v7078_v57  ;;  %v616_v6 = vpop.f32.mrf.mxu3  ;;  %v1247_v7 = vpack.c.bf16 %v1215_v0, %v1215_v0  ;;  %v1916_v12 = vsel %vm10795_vm3, %v7078_v57, 0.0  ;;  %vm10898_vm3 = vcmp.lt.s32.totalorder %v6892_v19, 7 }
  0xe8   : > { %1971 = vst [vmem:[#allocation2 + $0x334] sm:$0xf] %v1939_v21  ;;  %v617_v13 = vadd.f32 %v6979_v47, %v616_v6  ;;  %v1082_v18 = vsel %vm1051_vm6, %v10808_v51, %v1020_v63  ;;  %v1371_v22 = vsel %vm10898_vm3, %v10807_v52, %v1309_v24  ;;  %v1948_v23 = vpack.c.bf16 %v1916_v12, %v1916_v12 }
  0xe9   : > { %1630 = vst [vmem:[#allocation2 + $0x34] sm:$0xf] %v1598_v1  ;;  %v559_v27 = vpop.f32.mrf.mxu0  ;;  %v1119_v43 = vsel %vm7087_vm9, %v1082_v18, 0.0  ;;  %v1407_v36 = vsel %vm7070_vm8, %v1371_v22, 0.0  ;;  %v1502_v37 = vsel %vm10899_vm5, %v1082_v18, 0.0  ;;  %v1820_v38 = vsel %vm7104_vm4, %v1082_v18, 0.0 }
  0xea   : > { %1279 = vst [vmem:[#allocation2 + $0x70] sm:$0xf] %v1247_v7  ;;  %vm10813_vm3 = vcmp.ge.s32.totalorder %v7041_v45, 1  ;;  %vm10812_vm2 = vcmp.le.s32.totalorder %v7003_v9, 14  ;;  %v1151_v42 = vpack.c.bf16 %v1119_v43, %v1119_v43  ;;  %v1439_v46 = vpack.c.bf16 %v1407_v36, %v1407_v36 }
  0xeb   : > { %v1534_v54 = vpack.c.bf16 %v1502_v37, %v1502_v37  ;;  %v1852_v55 = vpack.c.bf16 %v1820_v38, %v1820_v38  ;;  %1980 = vst [vmem:[#allocation2 + $0x478] sm:$0xf] %v1948_v23  ;;  %vm10900_vm8 = vcmp.le.s32.totalorder %v7020_v17, 14  ;;  %v2043_v33 = vsel %vm7121_vm14, %v1371_v22, 0.0 }
  0xec   : > { %vm7157_vm5 = vmand %vm10798_vm15, %vm10900_vm8  ;;  %v7163_v32 = vmax.f32 %v617_v13, 0.0  ;;  %v560_v21 = vadd.f32 %v6979_v47, %v559_v27  ;;  %v7168_v62 = vsel %vm10799_vm1, %v1371_v22, 0.0  ;;  %598 = vmatmul.bf16.gmra.mxu0 %v5891_v15  ;;  %1183 = vst [vmem:[#allocation2 + $0x6c] sm:$0xf] %v1151_v42  ;;  %v2075_v0 = vpack.c.bf16 %v2043_v33, %v2043_v33 }
  0xed   : > { %vm10822_vm4 = vcmp.ge.s32.totalorder %v7062_v56, 1  ;;  %vm10903_vm8 = vcmp.le.s32.totalorder %v7006_v10, 14  ;;  %vm10805_vm14 = vcmp.ge.s32.totalorder %v7048_v49, 1  ;;  %1471 = vst [vmem:[#allocation2 + $0x50] sm:$0xf] %v1439_v46  ;;  %vm10906_vm1 = vcmp.ge.s32.totalorder %v7029_v34, 1 }
  0xee   : > { %vm7175_vm15 = vmand %vm10903_vm8, %vm10800_vm13  ;;  %v1044_v6 = vrot.slane %v7163_v32, 7  ;;  %v1333_v13 = vrot.slane %v7163_v32, 1  ;;  %v723_v15 = vcvt.s32.f32 %v7115_v29  ;;  %1566 = vst [vmem:[#allocation2 + $0x30] sm:$0xf] %v1534_v54  ;;  %v1622_v18 = vpack.c.bf16 %v7163_v32, %v7163_v32 }
  0xef   : > { %vm7187_vm9 = vmand %vm10906_vm1, %vm10801_vm0  ;;  %v7198_v22 = vmax.f32 %v560_v21, 0.0  ;;  %v619_v23 = vpop.f32.mrf.mxu3  ;;  %v727_v27 = vcvt.s32.f32 %v7139_v35  ;;  %1884 = vst [vmem:[#allocation2 + $0x474] sm:$0xf] %v1852_v55  ;;  %vm10913_vm0 = vcmp.lt.s32.totalorder %v6892_v19, 7 }
  0xf0   : > { %vm10909_vm8 = vmmov %vm10906_vm1  ;;  %vm10910_vm1 = vcmp.le.s32.totalorder %v6931_v11, 14  ;;  %v1058_v36 = vsel %vm1051_vm6, %v10806_v58, %v1044_v6  ;;  %v7222_v37 = vsel %vm10913_vm0, %v10803_v59, %v1333_v13  ;;  %v620_v42 = vadd.f32 %v6979_v47, %v619_v23  ;;  %2107 = vst [vmem:[#allocation2 + $0x458] sm:$0xf] %v2075_v0 }
  0xf1   : > { %v1239_v12 = vsel %vm10909_vm8, %v7163_v32, 0.0  ;;  %vm7205_vm13 = vmand %vm10910_vm1, %vm10802_vm10  ;;  %vm10815_vm8 = vcmp.le.s32.totalorder %v7053_v31, 14  ;;  %vm10914_vm1 = vcmp.le.s32.totalorder %v7006_v10, 14  ;;  %v1143_v46 = vsel %vm7187_vm9, %v1058_v36, 0.0  ;;  %1654 = vst [vmem:[#allocation2 + $0x394] sm:$0xf] %v1622_v18 }
  0xf2   : > { %v1271_v16 = vpack.c.bf16 %v1239_v12, %v1239_v12  ;;  %v1908_v38 = vsel %vm10914_vm1, %v7163_v32, 0.0  ;;  %v1431_v54 = vsel %vm7157_vm5, %v7222_v37, 0.0  ;;  %v1526_v55 = vsel %vm10822_vm4, %v1058_v36, 0.0 }
  0xf3   : > { %v1812_v33 = vsel %vm7175_vm15, %v1058_v36, 0.0  ;;  %vm10818_vm0 = vcmp.ge.s32.totalorder %v7020_v17, 1  ;;  %vm10915_vm1 = vcmp.ge.s32.totalorder %v6935_v14, 1  ;;  %v1175_v0 = vpack.c.bf16 %v1143_v46, %v1143_v46 }
  0xf4   : > { %vm7242_vm10 = vmand %vm10915_vm1, %vm10804_vm7  ;;  %1303 = vst [vmem:[#allocation2 + $0x3d0] sm:$0xf] %v1271_v16  ;;  %v1463_v50 = vpack.c.bf16 %v1431_v54, %v1431_v54  ;;  %v1558_v7 = vpack.c.bf16 %v1526_v55, %v1526_v55  ;;  %v1844_v12 = vpack.c.bf16 %v1812_v33, %v1812_v33  ;;  %v2035_v1 = vsel %vm7205_vm13, %v7222_v37, 0.0 }
  0xf5   : > { %v10810_v23 = vrot.slane %v7198_v22, 7  ;;  %vm10918_vm15 = vcmp.ge.s32.totalorder %v6993_v61, 1  ;;  %v10809_v18 = vrot.slane %v7198_v22, 1  ;;  %vm10811_vm1 = vcmp.le.s32.totalorder %v7038_v44, 14  ;;  %1207 = vst [vmem:[#allocation2 + $0x3cc] sm:$0xf] %v1175_v0 }
  0xf6   : > { %vm7254_vm9 = vmand %vm10918_vm15, %vm10805_vm14  ;;  %v1940_v43 = vpack.c.bf16 %v1908_v38, %v1908_v38  ;;  %v2067_v46 = vpack.c.bf16 %v2035_v1, %v2035_v1  ;;  %vm10922_vm13 = vcmp.le.s32.totalorder %v6991_v60, 14  ;;  %v755_v55 = vadd.f32 0.5, %v723_v15  ;;  %1495 = vst [vmem:[#allocation2 + $0x3b0] sm:$0xf] %v1463_v50 }
  0xf7   : > { %vm10921_vm5 = vmmov %vm10918_vm15  ;;  %v7266_v54 = vsel %vm10922_vm13, %v7198_v22, 0.0  ;;  %v1081_v33 = vsel %vm1051_vm6, %v1020_v63, %v10810_v23  ;;  %vm10923_vm15 = vcmp.lt.s32.totalorder %v6892_v19, 7  ;;  %v7288_v0 = vmax.f32 %v620_v42, 0.0  ;;  %1590 = vst [vmem:[#allocation2 + $0x390] sm:$0xf] %v1558_v7 }
  0xf8   : > { %v1216_v16 = vsel %vm10921_vm5, %v7198_v22, 0.0  ;;  %v1370_v38 = vsel %vm10923_vm15, %v1309_v24, %v10809_v18  ;;  %vm10924_vm5 = vmmov %vm10922_vm13  ;;  %vm10927_vm7 = vcmp.le.s32.totalorder %v6942_v26, 14  ;;  %v1120_v57 = vsel %vm7254_vm9, %v1081_v33, 0.0  ;;  %1876 = vst [vmem:[#allocation2 + $0x354] sm:$0xf] %v1844_v12  ;;  %v561_v18 = vpop.f32.mrf.mxu0 }
  0xf9   : > { %v1248_v59 = vpack.c.bf16 %v1216_v16, %v1216_v16  ;;  %vm7284_vm13 = vmand %vm10924_vm5, %vm10813_vm3  ;;  %v1408_v24 = vsel %vm7242_vm10, %v1370_v38, 0.0  ;;  %v1503_v50 = vsel %vm10826_vm11, %v1081_v33, 0.0  ;;  %vm10930_vm15 = vcmp.le.s32.totalorder %v6998_v2, 14  ;;  %1972 = vst [vmem:[#allocation2 + $0x358] sm:$0xf] %v1940_v43 }
  0xfa   : > { %vm7294_vm14 = vmand %vm10927_vm7, %vm10812_vm2  ;;  %v1662_v42 = vsel %vm10930_vm15, %v1370_v38, 0.0  ;;  %v1152_v1 = vpack.c.bf16 %v1120_v57, %v1120_v57  ;;  %v1440_v16 = vpack.c.bf16 %v1408_v24, %v1408_v24  ;;  %v1599_v58 = vpack.c.bf16 %v7198_v22, %v7198_v22  ;;  %2099 = vst [vmem:[#allocation2 + $0x338] sm:$0xf] %v2067_v46 }
  0xfb   : > { %v1917_v7 = vpack.c.bf16 %v7266_v54, %v7266_v54  ;;  %vm10814_vm7 = vcmp.le.s32.totalorder %v7048_v49, 14  ;;  %v1535_v21 = vpack.c.bf16 %v1503_v50, %v1503_v50  ;;  %v1789_v36 = vsel %vm7284_vm13, %v1081_v33, 0.0  ;;  %1280 = vst [vmem:[#allocation2 + $0x94] sm:$0xf] %v1248_v59 }
  0xfc   : > { %v759_v52 = vadd.f32 0.5, %v727_v27  ;;  %v787_v51 = vmul.f32 0.0625, %v755_v55  ;;  %v1694_v12 = vpack.c.bf16 %v1662_v42, %v1662_v42  ;;  %v1821_v57 = vpack.c.bf16 %v1789_v36, %v1789_v36  ;;  %1184 = vst [vmem:[#allocation2 + $0x90] sm:$0xf] %v1152_v1  ;;  %v5892_v36 = vld [vmem:[%s6868_s23 + $0x50] sm:$0xff] }
  0xfd   : > { %v2044_v24 = vsel %vm7294_vm14, %v1370_v38, 0.0  ;;  %v1045_v23 = vrot.slane %v7288_v0, 7  ;;  %vm10931_vm9 = vcmp.ge.s32.totalorder %v7029_v34, 1  ;;  %vm10819_vm13 = vcmp.le.s32.totalorder %v7062_v56, 14  ;;  %1472 = vst [vmem:[#allocation2 + $0x74] sm:$0xf] %v1440_v16  ;;  %603 = vmatmul.bf16.gmra.mxu0 %v5892_v36 }
  0xfe   : > { %v791_v54 = vmul.f32 0.0625, %v759_v52  ;;  %vm6370_vm10 = vcmp.lt.s32.totalorder %v787_v51, 0  ;;  %v6371_v43 = vceil.f32 %v787_v51  ;;  %v6372_v3 = vfloor.f32 %v787_v51  ;;  %vm7320_vm5 = vmand %vm10931_vm9, %vm10815_vm8  ;;  %1567 = vst [vmem:[#allocation2 + $0x54] sm:$0xf] %v1535_v21 }
  0xff   : > { %v7331_v52 = vsel %vm1051_vm6, %v1044_v6, %v1045_v23  ;;  %v1334_v51 = vrot.slane %v7288_v0, 1  ;;  %v562_v46 = vadd.f32 %v6979_v47, %v561_v18  ;;  %v2076_v59 = vpack.c.bf16 %v2044_v24, %v2044_v24  ;;  %1631 = vst [vmem:[#allocation2 + $0x58] sm:$0xf] %v1599_v58 }
 0x100   : > { %v6373_v55 = vsel %vm6370_vm10, %v6371_v43, %v6372_v3  ;;  %vm6390_vm14 = vcmp.lt.s32.totalorder %v791_v54, 0  ;;  %v6391_v33 = vceil.f32 %v791_v54  ;;  %v6392_v38 = vfloor.f32 %v791_v54  ;;  %1726 = vst [vmem:[#allocation2 + $0x38] sm:$0xf] %v1694_v12 }
 0x101   : > { %v7335_v15 = vcvt.f32.s32 %v6373_v55  ;;  %vm10935_vm15 = vcmp.lt.s32.totalorder %v6892_v19, 7  ;;  %v1527_v18 = vsel %vm10818_vm0, %v7331_v52, 0.0  ;;  %v1623_v50 = vpack.c.bf16 %v7288_v0, %v7288_v0  ;;  %1853 = vst [vmem:[#allocation2 + $0x18] sm:$0xf] %v1821_v57 }
 0x102   : > { %v1346_v6 = vsel %vm10935_vm15, %v1333_v13, %v1334_v51  ;;  %v6393_v3 = vsel %vm6390_vm14, %v6391_v33, %v6392_v38  ;;  %vm10936_vm10 = vcmp.le.s32.totalorder %v7006_v10, 14  ;;  %v10939_v58 = vpack.c.bf16 %v7168_v62, %v7168_v62  ;;  %1949 = vst [vmem:[#allocation2 + $0x1c] sm:$0xf] %v1917_v7 }
 0x103   : > { %10934 = vst [vmem:[#allocation23_spill] sm:$0xff] %v7335_v15  ;;  %v1432_v63 = vsel %vm7320_vm5, %v1346_v6, 0.0  ;;  %v1686_v42 = vsel %vm10819_vm13, %v1346_v6, 0.0  ;;  %vm7356_vm9 = vmand %vm10936_vm10, %vm10811_vm1  ;;  %v7363_v13 = vcvt.f32.s32 %v6393_v3  ;;  %v851_v1 = vmul.u32 16, %v7335_v15 }
 0x104   : > { %1725 = vst [vmem:[#allocation2 + $0x14] sm:$0xf] %v10939_v58  ;;  %v1559_v16 = vpack.c.bf16 %v1527_v18, %v1527_v18  ;;  %v7366_v21 = vmax.f32 %v562_v46, 0.0  ;;  %vm947_vm5 = vcmp.le.s32.totalorder %v7335_v15, 14  ;;  %v1464_v24 = vpack.c.bf16 %v1432_v63, %v1432_v63 }
 0x105   : > { %v1718_v54 = vpack.c.bf16 %v1686_v42, %v1686_v42  ;;  %v7371_v43 = vadd.s32 40, %v6892_v19  ;;  %v855_v62 = vmul.u32 16, %v7363_v13  ;;  %v7375_v27 = vsub.s32 %v7115_v29, %v851_v1  ;;  %2108 = vst [vmem:[#allocation2 + $0x47c] sm:$0xf] %v2076_v59 }
 0x106   : > { %vm919_vm14 = vcmp.ge.s32.totalorder %v7363_v13, 1  ;;  %v1909_v46 = vsel %vm947_vm5, %v7288_v0, 0.0  ;;  %v2036_v57 = vsel %vm7356_vm9, %v1346_v6, 0.0  ;;  %vm924_vm15 = vcmp.le.s32.totalorder %v6940_v25, 14  ;;  %1496 = vst [vmem:[#allocation2 + $0x3d4] sm:$0xf] %v1464_v24 }
 0x107   : > { %10940 = vst [vmem:[#allocation24_spill] sm:$0xff] %v7375_v27  ;;  %v1240_v12 = vsel %vm919_vm14, %v7288_v0, 0.0  ;;  %v704_v55 = vcvt.s32.f32 %v7371_v43  ;;  %vm10941_vm10 = vcmp.ge.s32.totalorder %v6993_v61, 1  ;;  %v7397_v7 = vsub.s32 %v7139_v35, %v855_v62 }
 0x108   : > { %vm7392_vm1 = vmand %vm10941_vm10, %vm10814_vm7  ;;  %vm10816_vm2 = vcmp.ge.s32.totalorder %v7375_v27, 1  ;;  %vm10821_vm9 = vcmp.le.s32.totalorder %v7375_v27, 14  ;;  %v1272_v33 = vpack.c.bf16 %v1240_v12, %v1240_v12  ;;  %v10825_v59 = vrot.slane %v7366_v21, 7  ;;  %1591 = vst [vmem:[#allocation2 + $0x3b4] sm:$0xf] %v1559_v16 }
 0x109   : > { %v1685_v38 = vsel %vm10821_vm9, %v7222_v37, 0.0  ;;  %vm1781_vm10 = vmand %vm947_vm5, %vm10816_vm2  ;;  %v736_v6 = vadd.f32 0.5, %v704_v55  ;;  %v10820_v35 = vrot.slane %v7366_v21, 1  ;;  %vm10817_vm3 = vcmp.ge.s32.totalorder %v7397_v7, 1  ;;  %1655 = vst [vmem:[#allocation2 + $0x3b8] sm:$0xf] %v1623_v50 }
 0x10a   : > { %1304 = vst [vmem:[#allocation2 + $0x3f4] sm:$0xf] %v1272_v33  ;;  %v1717_v18 = vpack.c.bf16 %v1685_v38, %v1685_v38  ;;  %v1813_v3 = vsel %vm1781_vm10, %v7331_v52, 0.0  ;;  %v1941_v63 = vpack.c.bf16 %v1909_v46, %v1909_v46  ;;  %vm10944_vm7 = vcmp.ge.s32.totalorder %v6998_v2, 1  ;;  %vm1112_vm2 = vmand %vm919_vm14, %vm10817_vm3  ;;  %v564_v38 = vpop.f32.mrf.mxu0 }
 0x10b   : > { %vm7416_vm8 = vmand %vm924_vm15, %vm10944_vm7  ;;  %v2068_v42 = vpack.c.bf16 %v2036_v57, %v2036_v57  ;;  %v768_v32 = vmul.f32 0.0625, %v736_v6  ;;  %v10947_v58 = vrot.slane %v7198_v22, 7  ;;  %v10948_v36 = vrot.slane %v7198_v22, 1  ;;  %1750 = vst [vmem:[#allocation2 + $0x398] sm:$0xf] %v1718_v54  ;;  %v621_v54 = vpop.f32.mrf.mxu3 }
 0x10c   : > { %vm10949_vm7 = vcmp.lt.s32.totalorder %v6892_v19, 7  ;;  %v1144_v62 = vsel %vm1112_vm2, %v7331_v52, 0.0  ;;  %v1845_v16 = vpack.c.bf16 %v1813_v3, %v1813_v3  ;;  %vm10950_vm10 = vcmp.ge.s32.totalorder %v6987_v53, 1  ;;  %1749 = vst [vmem:[#allocation2 + $0x374] sm:$0xf] %v1717_v18 }
 0x10d   : > { %v7430_v1 = vsel %vm1051_vm6, %v10947_v58, %v10825_v59  ;;  %v1369_v24 = vsel %vm10949_vm7, %v10948_v36, %v10820_v35  ;;  %vm10951_vm3 = vcmp.le.s32.totalorder %v7041_v45, 14  ;;  %vm10952_vm0 = vcmp.le.s32.totalorder %v6991_v60, 14  ;;  %1973 = vst [vmem:[#allocation2 + $0x37c] sm:$0xf] %v1941_v63 }
 0x10e   : > { %v1409_v46 = vsel %vm7392_vm1, %v1369_v24, 0.0  ;;  %v1504_v12 = vsel %vm10950_vm10, %v7430_v1, 0.0  ;;  %vm7448_vm13 = vmand %vm10952_vm0, %vm10951_vm3  ;;  %v1176_v57 = vpack.c.bf16 %v1144_v62, %v1144_v62  ;;  %vm6275_vm2 = vcmp.lt.s32.totalorder %v768_v32, 0  ;;  %1877 = vst [vmem:[#allocation2 + $0x378] sm:$0xf] %v1845_v16 }
 0x10f   : > { %v6276_v52 = vceil.f32 %v768_v32  ;;  %v6277_v50 = vfloor.f32 %v768_v32  ;;  %vm10832_vm7 = vcmp.le.s32.totalorder %v7397_v7, 14  ;;  %v1600_v55 = vpack.c.bf16 %v7366_v21, %v7366_v21  ;;  %2100 = vst [vmem:[#allocation2 + $0x35c] sm:$0xf] %v2068_v42 }
 0x110   : > { %vm10955_vm1 = vcmp.le.s32.totalorder %v6962_v39, 14  ;;  %v1790_v33 = vsel %vm7416_vm8, %v7430_v1, 0.0  ;;  %1208 = vst [vmem:[#allocation2 + $0x3f0] sm:$0xf] %v1176_v57  ;;  %v1441_v18 = vpack.c.bf16 %v1409_v46, %v1409_v46  ;;  %v1536_v3 = vpack.c.bf16 %v1504_v12, %v1504_v12  ;;  %vm7488_vm0 = vmand %vm919_vm14, %vm10832_vm7 }
 0x111   : > { %v1663_v29 = vsel %vm10955_vm1, %v1369_v24, 0.0  ;;  %v6278_v6 = vsel %vm6275_vm2, %v6276_v52, %v6277_v50  ;;  %v1886_v32 = vsel %vm924_vm15, %v7366_v21, 0.0  ;;  %v2013_v62 = vsel %vm7448_vm13, %v1369_v24, 0.0  ;;  %vm7501_vm13 = vmand %vm947_vm5, %vm10821_vm9  ;;  %1632 = vst [vmem:[#allocation2 + $0x7c] sm:$0xf] %v1600_v55 }
 0x112   : > { %v7463_v58 = vcvt.f32.s32 %v6278_v6  ;;  %v1695_v36 = vpack.c.bf16 %v1663_v29, %v1663_v29  ;;  %v622_v37 = vadd.f32 %v6979_v47, %v621_v54  ;;  %v1822_v35 = vpack.c.bf16 %v1790_v33, %v1790_v33  ;;  %1473 = vst [vmem:[#allocation2 + $0x98] sm:$0xf] %v1441_v18 }
 0x113   : > { %v1918_v57 = vpack.c.bf16 %v1886_v32, %v1886_v32  ;;  %v7469_v46 = vadd.s32 232, %v6892_v19  ;;  %v565_v12 = vadd.f32 %v6979_v47, %v564_v38  ;;  %v7477_v22 = vadd.s32 48, %v6892_v19  ;;  %1568 = vst [vmem:[#allocation2 + $0x78] sm:$0xf] %v1536_v3  ;;  %v624_v59 = vpop.f32.mrf.mxu3 }
 0x114   : > { %v832_v52 = vmul.u32 16, %v7463_v58  ;;  %vm896_vm3 = vcmp.ge.s32.totalorder %v7463_v58, 1  ;;  %v7474_v16 = vmax.f32 %v622_v37, 0.0  ;;  %v2045_v24 = vpack.c.bf16 %v2013_v62, %v2013_v62  ;;  %1727 = vst [vmem:[#allocation2 + $0x5c] sm:$0xf] %v1695_v36 }
 0x115   : > { %v1217_v63 = vsel %vm896_vm3, %v7366_v21, 0.0  ;;  %v728_v50 = vcvt.s32.f32 %v7469_v46  ;;  %vm948_vm8 = vcmp.le.s32.totalorder %v7010_v28, 14  ;;  %v7507_v54 = vmax.f32 %v565_v12, 0.0  ;;  %1854 = vst [vmem:[#allocation2 + $0x3c] sm:$0xf] %v1822_v35 }
 0x116   : > { %v7493_v29 = vsub.s32 %v7371_v43, %v832_v52  ;;  %v1249_v33 = vpack.c.bf16 %v1217_v63, %v1217_v63  ;;  %v10824_v38 = vrot.slane %v7474_v16, 7  ;;  %v10823_v6 = vrot.slane %v7474_v16, 1  ;;  %vm7529_vm2 = vmand %vm948_vm8, %vm10822_vm4  ;;  %1950 = vst [vmem:[#allocation2 + $0x40] sm:$0xf] %v1918_v57 }
 0x117   : > { %v760_v32 = vadd.f32 0.5, %v728_v50  ;;  %v1624_v43 = vpack.c.bf16 %v7474_v16, %v7474_v16  ;;  %vm925_vm14 = vcmp.le.s32.totalorder %v6926_v4, 14  ;;  %vm10960_vm5 = vcmp.lt.s32.totalorder %v6892_v19, 7  ;;  %2077 = vst [vmem:[#allocation2 + $0x20] sm:$0xf] %v2045_v24 }
 0x118   : > { %vm10846_vm10 = vcmp.ge.s32.totalorder %v7493_v29, 1  ;;  %1281 = vst [vmem:[#allocation2 + $0xb8] sm:$0xf] %v1249_v33  ;;  %v7517_v3 = vsel %vm1051_vm6, %v1045_v23, %v10824_v38  ;;  %v1345_v55 = vsel %vm10960_vm5, %v1334_v51, %v10823_v6  ;;  %v705_v37 = vcvt.s32.f32 %v7477_v22 }
 0x119   : > { %vm1089_vm1 = vmand %vm896_vm3, %vm10846_vm10  ;;  %v792_v23 = vmul.f32 0.0625, %v760_v32  ;;  %v1433_v0 = vsel %vm7488_vm0, %v1345_v55, 0.0  ;;  %vm10963_vm5 = vcmp.ge.s32.totalorder %v7053_v31, 1  ;;  %v1910_v12 = vsel %vm948_vm8, %v7474_v16, 0.0  ;;  %1656 = vst [vmem:[#allocation2 + $0x3dc] sm:$0xf] %v1624_v43 }
 0x11a   : > { %v1528_v51 = vsel %vm10963_vm5, %v7517_v3, 0.0  ;;  %v1121_v52 = vsel %vm1089_vm1, %v7430_v1, 0.0  ;;  %v1465_v63 = vpack.c.bf16 %v1433_v0, %v1433_v0  ;;  %vm10964_vm9 = vcmp.le.s32.totalorder %v7020_v17, 14 }
 0x11b   : > { %v1560_v50 = vpack.c.bf16 %v1528_v51, %v1528_v51  ;;  %v1687_v36 = vsel %vm10964_vm9, %v1345_v55, 0.0  ;;  %v1153_v33 = vpack.c.bf16 %v1121_v52, %v1121_v52  ;;  %vm6395_vm4 = vcmp.lt.s32.totalorder %v792_v23, 0 }
 0x11c   : > { %v6396_v42 = vceil.f32 %v792_v23  ;;  %v6397_v32 = vfloor.f32 %v792_v23  ;;  %vm10827_vm0 = vcmp.le.s32.totalorder %v7493_v29, 14  ;;  %v1814_v6 = vsel %vm7529_vm2, %v7517_v3, 0.0  ;;  %1497 = vst [vmem:[#allocation2 + $0x3f8] sm:$0xf] %v1465_v63  ;;  %vm7585_vm2 = vmand %vm925_vm14, %vm10826_vm11 }
 0x11d   : > { %v2037_v35 = vsel %vm7501_vm13, %v1345_v55, 0.0  ;;  %v737_v1 = vadd.f32 0.5, %v705_v37  ;;  %1185 = vst [vmem:[#allocation2 + $0xb4] sm:$0xf] %v1153_v33  ;;  %v1719_v51 = vpack.c.bf16 %v1687_v36, %v1687_v36  ;;  %v1942_v38 = vpack.c.bf16 %v1910_v12, %v1910_v12  ;;  %vm7564_vm13 = vmand %vm896_vm3, %vm10827_vm0 }
 0x11e   : > { %v6398_v0 = vsel %vm6395_vm4, %v6396_v42, %v6397_v32  ;;  %v10834_v57 = vrot.slane %v7507_v54, 7  ;;  %vm10829_vm9 = vcmp.ge.s32.totalorder %v6982_v48, 1  ;;  %v1846_v24 = vpack.c.bf16 %v1814_v6, %v1814_v6  ;;  %1592 = vst [vmem:[#allocation2 + $0x3d8] sm:$0xf] %v1560_v50 }
 0x11f   : > { %v7557_v23 = vcvt.f32.s32 %v6398_v0  ;;  %v769_v52 = vmul.f32 0.0625, %v737_v1  ;;  %v10833_v62 = vrot.slane %v7507_v54, 1  ;;  %v2069_v55 = vpack.c.bf16 %v2037_v35, %v2037_v35  ;;  %1751 = vst [vmem:[#allocation2 + $0x3bc] sm:$0xf] %v1719_v51 }
 0x120   : > { %v10967_v37 = vrot.slane %v7366_v21, 7  ;;  %v1601_v12 = vpack.c.bf16 %v7507_v54, %v7507_v54  ;;  %v625_v63 = vadd.f32 %v6979_v47, %v624_v59  ;;  %v10970_v43 = vrot.slane %v7366_v21, 1  ;;  %1878 = vst [vmem:[#allocation2 + $0x39c] sm:$0xf] %v1846_v24 }
 0x121   : > { %v856_v36 = vmul.u32 16, %v7557_v23  ;;  %vm920_vm4 = vcmp.ge.s32.totalorder %v7557_v23, 1  ;;  %vm6280_vm3 = vcmp.lt.s32.totalorder %v769_v52, 0  ;;  %v6281_v50 = vceil.f32 %v769_v52  ;;  %1974 = vst [vmem:[#allocation2 + $0x3a0] sm:$0xf] %v1942_v38  ;;  %v7626_v38 = vpop.f32.mrf.mxu0 }
 0x122   : > { %v7574_v6 = vsel %vm1051_vm6, %v10967_v37, %v10834_v57  ;;  %v1241_v42 = vsel %vm920_vm4, %v7474_v16, 0.0  ;;  %v6282_v59 = vfloor.f32 %v769_v52  ;;  %vm10971_vm1 = vcmp.lt.s32.totalorder %v6892_v19, 7  ;;  %2101 = vst [vmem:[#allocation2 + $0x380] sm:$0xf] %v2069_v55 }
 0x123   : > { %v1368_v32 = vsel %vm10971_vm1, %v10970_v43, %v10833_v62  ;;  %vm10972_vm5 = vcmp.ge.s32.totalorder %v7048_v49, 1  ;;  %v7602_v1 = vsub.s32 %v7469_v46, %v856_v36  ;;  %v1273_v0 = vpack.c.bf16 %v1241_v42, %v1241_v42  ;;  %1633 = vst [vmem:[#allocation2 + $0xa0] sm:$0xf] %v1601_v12 }
 0x124   : > { %v1505_v35 = vsel %vm10972_vm5, %v7574_v6, 0.0  ;;  %v1410_v51 = vsel %vm7564_vm13, %v1368_v32, 0.0  ;;  %vm10973_vm11 = vcmp.le.s32.totalorder %v6998_v2, 14  ;;  %v6283_v37 = vsel %vm6280_vm3, %v6281_v50, %v6282_v59 }
 0x125   : > { %v1537_v52 = vpack.c.bf16 %v1505_v35, %v1505_v35  ;;  %vm7610_vm0 = vmand %vm924_vm15, %vm10973_vm11  ;;  %v1442_v43 = vpack.c.bf16 %v1410_v51, %v1410_v51  ;;  %vm10976_vm1 = vcmp.le.s32.totalorder %v6987_v53, 14  ;;  %v1791_v24 = vsel %vm7585_vm2, %v7574_v6, 0.0  ;;  %1305 = vst [vmem:[#allocation2 + $0x418] sm:$0xf] %v1273_v0 }
 0x126   : > { %v1664_v46 = vsel %vm10976_vm1, %v1368_v32, 0.0  ;;  %vm10854_vm13 = vcmp.ge.s32.totalorder %v7602_v1, 1  ;;  %v7620_v18 = vcvt.f32.s32 %v6283_v37  ;;  %v1887_v36 = vsel %vm925_vm14, %v7507_v54, 0.0 }
 0x127   : > { %vm921_vm11 = vcmp.ge.s32.totalorder %v6928_v5, 1  ;;  %vm10828_vm15 = vcmp.le.s32.totalorder %v7602_v1, 14  ;;  %vm1113_vm3 = vmand %vm920_vm4, %vm10854_vm13  ;;  %v1696_v50 = vpack.c.bf16 %v1664_v46, %v1664_v46  ;;  %v1823_v33 = vpack.c.bf16 %v1791_v24, %v1791_v24  ;;  %1474 = vst [vmem:[#allocation2 + $0xbc] sm:$0xf] %v1442_v43  ;;  %v7664_v43 = vld [vmem:[#allocation8 + $0x78] sm:$0xff] }
 0x128   : > { %v7633_v42 = vmax.f32 %v625_v63, 0.0  ;;  %v1145_v59 = vsel %vm1113_vm3, %v7517_v3, 0.0  ;;  %v833_v35 = vmul.u32 16, %v7620_v18  ;;  %vm897_vm2 = vcmp.ge.s32.totalorder %v7620_v18, 1  ;;  %1569 = vst [vmem:[#allocation2 + $0x9c] sm:$0xf] %v1537_v52  ;;  %vm1114_vm1 = vmand %vm921_vm11, %vm10829_vm9  ;;  %3674 = vmatpush.bf16.msra.mxu2 %v7664_v43 }
 0x129   : > { %v2014_v0 = vsel %vm7610_vm0, %v1368_v32, 0.0  ;;  %v1177_v51 = vpack.c.bf16 %v1145_v59, %v1145_v59  ;;  %v1218_v37 = vsel %vm897_vm2, %v7507_v54, 0.0  ;;  %vm949_vm5 = vcmp.le.s32.totalorder %v6965_v40, 14  ;;  %vm7653_vm0 = vmand %vm920_vm4, %vm10828_vm15  ;;  %1728 = vst [vmem:[#allocation2 + $0x80] sm:$0xf] %v1696_v50  ;;  %v7716_v3 = vld [vmem:[#allocation8 + $0x70] sm:$0xff] }
 0x12a   : > { %v10831_v55 = vrot.slane %v7633_v42, 7  ;;  %v7658_v63 = vsub.s32 %v7477_v22, %v833_v35  ;;  %v1250_v32 = vpack.c.bf16 %v1218_v37, %v1218_v37  ;;  %v1242_v52 = vsel %vm921_vm11, %v7633_v42, 0.0  ;;  %1855 = vst [vmem:[#allocation2 + $0x60] sm:$0xf] %v1823_v33 }
 0x12b   : > { %v10830_v21 = vrot.slane %v7633_v42, 1  ;;  %1209 = vst [vmem:[#allocation2 + $0x414] sm:$0xf] %v1177_v51  ;;  %vm10979_vm4 = vcmp.le.s32.totalorder %v7062_v56, 14  ;;  %v1919_v22 = vpack.c.bf16 %v1887_v36, %v1887_v36  ;;  %v2046_v12 = vpack.c.bf16 %v2014_v0, %v2014_v0 }
 0x12c   : > { %vm7670_vm3 = vmand %vm948_vm8, %vm10979_vm4  ;;  %v10982_v24 = vrot.slane %v7474_v16, 7  ;;  %vm10845_vm15 = vcmp.ge.s32.totalorder %v7658_v63, 1  ;;  %1282 = vst [vmem:[#allocation2 + $0xdc] sm:$0xf] %v1250_v32  ;;  %v10983_v51 = vrot.slane %v7474_v16, 1  ;;  %vm10984_vm8 = vcmp.lt.s32.totalorder %v6892_v19, 7  ;;  %3675 = vmatpush.bf16.msra.mxu2 %v7716_v3 }
 0x12d   : > { %vm10985_vm4 = vcmp.ge.s32.totalorder %v7020_v17, 1  ;;  %v7698_v0 = vsel %vm949_vm5, %v7633_v42, 0.0  ;;  %v5893_v32 = vld [vmem:[%s6868_s23 + $0x58] sm:$0xff]  ;;  %v1274_v16 = vpack.c.bf16 %v1242_v52, %v1242_v52  ;;  %vm10842_vm7 = vcmp.le.s32.totalorder %v7658_v63, 14  ;;  %1951 = vst [vmem:[#allocation2 + $0x64] sm:$0xf] %v1919_v22  ;;  %v569_v22 = vpop.f32.mrf.mxu0 }
 0x12e   : > { %v1055_v59 = vsel %vm1051_vm6, %v10982_v24, %v10831_v55  ;;  %v1344_v37 = vsel %vm10984_vm8, %v10983_v51, %v10830_v21  ;;  %vm7691_vm9 = vmand %vm949_vm5, %vm10985_vm4  ;;  %vm10988_vm8 = vcmp.ge.s32.totalorder %v7397_v7, 1  ;;  %vm10989_vm4 = vcmp.le.s32.totalorder %v7053_v31, 14  ;;  %v6057_v55 = vld [vmem:[#allocation8 + $0x38] sm:$0xff]  ;;  %608 = vmatmul.bf16.gmra.mxu0 %v5893_v32  ;;  %2078 = vst [vmem:[#allocation2 + $0x44] sm:$0xf] %v2046_v12 }
 0x12f   : > { %v1146_v35 = vsel %vm1114_vm1, %v1055_v59, 0.0  ;;  %vm1090_vm1 = vmand %vm897_vm2, %vm10845_vm15  ;;  %v1434_v24 = vsel %vm7653_vm0, %v1344_v37, 0.0  ;;  %v1529_v51 = vsel %vm10988_vm8, %v1055_v59, 0.0  ;;  %v1688_v21 = vsel %vm10989_vm4, %v1344_v37, 0.0  ;;  %v6081_v52 = vld [vmem:[#allocation8 + $0xf8] sm:$0xff]  ;;  %3585 = vmatpush.bf16.msra.mxu1 %v6057_v55  ;;  %6234 = vmatpush.bf16.msrb.mxu3 %v6057_v55 }
 0x130   : > { %v1122_v62 = vsel %vm1090_vm1, %v7574_v6, 0.0  ;;  %v1178_v57 = vpack.c.bf16 %v1146_v35, %v1146_v35  ;;  %v1625_v50 = vpack.c.bf16 %v7633_v42, %v7633_v42  ;;  %v1466_v20 = vpack.c.bf16 %v1434_v24, %v1434_v24  ;;  %3852 = vmatpush.bf16.msrb.mxu0 %v6081_v52  ;;  %vm7739_vm0 = vmand %vm897_vm2, %vm10842_vm7  ;;  %1306 = vst [vmem:[#allocation2 + $0x43c] sm:$0xf] %v1274_v16 }
 0x131   : > { %v1154_v41 = vpack.c.bf16 %v1122_v62, %v1122_v62  ;;  %v1815_v56 = vsel %vm7691_vm9, %v1055_v59, 0.0  ;;  %v2038_v28 = vsel %vm7670_vm3, %v1344_v37, 0.0  ;;  %v1561_v6 = vpack.c.bf16 %v1529_v51, %v1529_v51  ;;  %v626_v62 = vpop.f32.mrf.mxu3 }
 0x132   : > { %v1720_v33 = vpack.c.bf16 %v1688_v21, %v1688_v21  ;;  %v567_v35 = vadd.f32 %v6979_v47, %v7626_v38  ;;  %v7725_v32 = vadd.s32 56, %v6892_v19  ;;  %v1847_v36 = vpack.c.bf16 %v1815_v56, %v1815_v56  ;;  %1210 = vst [vmem:[#allocation2 + $0x438] sm:$0xf] %v1178_v57 }
 0x133   : > { %1186 = vst [vmem:[#allocation2 + $0xd8] sm:$0xf] %v1154_v41  ;;  %v1943_v46 = vpack.c.bf16 %v7698_v0, %v7698_v0  ;;  %v627_v59 = vadd.f32 %v6979_v47, %v626_v62  ;;  %v2070_v55 = vpack.c.bf16 %v2038_v28, %v2038_v28  ;;  %vm926_vm9 = vcmp.le.s32.totalorder %v6935_v14, 14 }
 0x134   : > { %v7731_v21 = vmax.f32 %v567_v35, 0.0  ;;  %v706_v38 = vcvt.s32.f32 %v7725_v32  ;;  %vm922_vm3 = vcmp.ge.s32.totalorder %v6942_v26, 1  ;;  %vm950_vm1 = vcmp.le.s32.totalorder %v7029_v34, 14  ;;  %1498 = vst [vmem:[#allocation2 + $0x41c] sm:$0xf] %v1466_v20 }
 0x135   : > { %v7743_v56 = vmax.f32 %v627_v59, 0.0  ;;  %v7748_v28 = vadd.f32 %v6979_v47, %v569_v22  ;;  %vm10992_vm2 = vcmp.ge.s32.totalorder %v6987_v53, 1  ;;  %v7761_v16 = vadd.s32 64, %v6892_v19  ;;  %1593 = vst [vmem:[#allocation2 + $0x3fc] sm:$0xf] %v1561_v6 }
 0x136   : > { %v738_v57 = vadd.f32 0.5, %v706_v38  ;;  %v10844_v12 = vrot.slane %v7731_v21, 7  ;;  %v10843_v37 = vrot.slane %v7731_v21, 1  ;;  %vm7756_vm8 = vmand %vm926_vm9, %vm10992_vm2  ;;  %v1602_v47 = vpack.c.bf16 %v7731_v21, %v7731_v21  ;;  %1657 = vst [vmem:[#allocation2 + $0x400] sm:$0xf] %v1625_v50 }
 0x137   : > { %v7768_v20 = vsel %vm926_vm9, %v7731_v21, 0.0  ;;  %v7772_v51 = vadd.s32 72, %v6892_v19  ;;  %vm10995_vm4 = vcmp.le.s32.totalorder %v6962_v39, 14  ;;  %v10998_v35 = vrot.slane %v7507_v54, 7  ;;  %1752 = vst [vmem:[#allocation2 + $0x3e0] sm:$0xf] %v1720_v33 }
 0x138   : > { %vm7778_vm2 = vmand %vm925_vm14, %vm10995_vm4  ;;  %v770_v6 = vmul.f32 0.0625, %v738_v57  ;;  %v10999_v22 = vrot.slane %v7507_v54, 1  ;;  %vm11000_vm7 = vcmp.lt.s32.totalorder %v6892_v19, 7  ;;  %vm11001_vm14 = vcmp.le.s32.totalorder %v7048_v49, 14  ;;  %1879 = vst [vmem:[#allocation2 + $0x3c0] sm:$0xf] %v1847_v36 }
 0x139   : > { %v7788_v62 = vsel %vm1051_vm6, %v10998_v35, %v10844_v12  ;;  %vm927_vm15 = vcmp.le.s32.totalorder %v6993_v61, 14  ;;  %1975 = vst [vmem:[#allocation2 + $0x3c4] sm:$0xf] %v1943_v46  ;;  %v1920_v41 = vpack.c.bf16 %v7768_v20, %v7768_v20  ;;  %v11006_v27 = vrot.slane %v7743_v56, 7 }
 0x13a   : > { %v1367_v59 = vsel %vm11000_vm7, %v10999_v22, %v10843_v37  ;;  %v1506_v57 = vsel %vm10846_vm10, %v7788_v62, 0.0  ;;  %v1792_v54 = vsel %vm7756_vm8, %v7788_v62, 0.0  ;;  %vm6285_vm4 = vcmp.lt.s32.totalorder %v770_v6, 0  ;;  %2102 = vst [vmem:[#allocation2 + $0x3a4] sm:$0xf] %v2070_v55 }
 0x13b   : > { %v1411_v50 = vsel %vm7739_vm0, %v1367_v59, 0.0  ;;  %v1665_v35 = vsel %vm11001_vm14, %v1367_v59, 0.0  ;;  %v6286_v22 = vceil.f32 %v770_v6  ;;  %v6287_v37 = vfloor.f32 %v770_v6  ;;  %1634 = vst [vmem:[#allocation2 + $0xc4] sm:$0xf] %v1602_v47 }
 0x13c   : > { %v1443_v12 = vpack.c.bf16 %v1411_v50, %v1411_v50  ;;  %vm11002_vm7 = vcmp.ge.s32.totalorder %v7003_v9, 1  ;;  %vm11003_vm10 = vcmp.le.s32.totalorder %v6982_v48, 14  ;;  %v1538_v36 = vpack.c.bf16 %v1506_v57, %v1506_v57  ;;  %1952 = vst [vmem:[#allocation2 + $0x88] sm:$0xf] %v1920_v41  ;;  %v6079_v41 = vld [vmem:[#allocation8 + $0xe8] sm:$0xff] }
 0x13d   : > { %vm1115_vm0 = vmand %vm922_vm3, %vm11002_vm7  ;;  %v2015_v0 = vsel %vm7778_vm2, %v1367_v59, 0.0  ;;  %v7827_v6 = vsel %vm922_vm3, %v7743_v56, 0.0  ;;  %v6288_v50 = vsel %vm6285_vm4, %v6286_v22, %v6287_v37  ;;  %v1697_v38 = vpack.c.bf16 %v1665_v35, %v1665_v35  ;;  %v6080_v22 = vld [vmem:[#allocation8 + $0xf0] sm:$0xff] }
 0x13e   : > { %vm7816_vm14 = vmand %vm921_vm11, %vm11003_vm10  ;;  %v1824_v24 = vpack.c.bf16 %v1792_v54, %v1792_v54  ;;  %v11007_v46 = vrot.slane %v7633_v42, 7  ;;  %v7835_v20 = vcvt.f32.s32 %v6288_v50  ;;  %1475 = vst [vmem:[#allocation2 + $0xe0] sm:$0xf] %v1443_v12  ;;  %v11008_v59 = vrot.slane %v7743_v56, 1  ;;  %v6056_v54 = vld [vmem:[#allocation8 + $0x30] sm:$0xff]  ;;  %3853 = vmatpush.bf16.msrb.mxu0 %v6080_v22 }
 0x13f   : > { %v11009_v15 = vrot.slane %v7633_v42, 1  ;;  %vm11010_vm10 = vcmp.lt.s32.totalorder %v6892_v19, 7  ;;  %vm11011_vm11 = vcmp.ge.s32.totalorder %v7053_v31, 1  ;;  %1570 = vst [vmem:[#allocation2 + $0xc0] sm:$0xf] %v1538_v36  ;;  %v2047_v12 = vpack.c.bf16 %v2015_v0, %v2015_v0  ;;  %3586 = vmatpush.bf16.msra.mxu1 %v6056_v54  ;;  %6235 = vmatpush.bf16.msrb.mxu3 %v6056_v54  ;;  %v7925_v54 = vld [vmem:[#allocation8 + $0x60] sm:$0xff] }
 0x140   : > { %v1054_v57 = vsel %vm1051_vm6, %v11007_v46, %v11006_v27  ;;  %vm7851_vm8 = vmand %vm950_vm1, %vm11011_vm11  ;;  %v1275_v42 = vpack.c.bf16 %v7827_v6, %v7827_v6  ;;  %vm11014_vm2 = vcmp.le.s32.totalorder %v7020_v17, 14  ;;  %v834_v36 = vmul.u32 16, %v7835_v20  ;;  %v7875_v6 = vld [vmem:[#allocation8 + $0x68] sm:$0xff]  ;;  %1729 = vst [vmem:[#allocation2 + $0xa4] sm:$0xf] %v1697_v38  ;;  %v629_v17 = vpop.f32.mrf.mxu3 }
 0x141   : > { %v1147_v52 = vsel %vm1115_vm0, %v1054_v57, 0.0  ;;  %v1343_v55 = vsel %vm11010_vm10, %v11009_v15, %v11008_v59  ;;  %v7845_v37 = vsel %vm10854_vm13, %v1054_v57, 0.0  ;;  %vm7863_vm4 = vmand %vm949_vm5, %vm11014_vm2  ;;  %vm898_vm7 = vcmp.ge.s32.totalorder %v7835_v20, 1  ;;  %1856 = vst [vmem:[#allocation2 + $0x84] sm:$0xf] %v1824_v24  ;;  %3676 = vmatpush.bf16.msra.mxu2 %v7875_v6 }
 0x142   : > { %v1179_v35 = vpack.c.bf16 %v1147_v52, %v1147_v52  ;;  %v1435_v15 = vsel %vm7816_vm14, %v1343_v55, 0.0  ;;  %vm11017_vm0 = vcmp.le.s32.totalorder %v7397_v7, 14  ;;  %v1219_v46 = vsel %vm898_vm7, %v7731_v21, 0.0  ;;  %2079 = vst [vmem:[#allocation2 + $0x68] sm:$0xf] %v2047_v12  ;;  %3854 = vmatpush.bf16.msrb.mxu0 %v6079_v41 }
 0x143   : > { %v7873_v33 = vsel %vm11017_vm0, %v1343_v55, 0.0  ;;  %v7884_v47 = vsel %vm7851_vm8, %v1054_v57, 0.0  ;;  %v7889_v59 = vsel %vm950_vm1, %v7743_v56, 0.0  ;;  %v7892_v0 = vsub.s32 %v7725_v32, %v834_v36  ;;  %v7907_v32 = vld [vmem:[%s10780_s2] ss:$0 sm:$0xff] }
 0x144   : > { %v1251_v40 = vpack.c.bf16 %v1219_v46, %v1219_v46  ;;  %v1467_v38 = vpack.c.bf16 %v1435_v15, %v1435_v15  ;;  %v1721_v52 = vpack.c.bf16 %v7873_v33, %v7873_v33  ;;  %v7898_v57 = vsel %vm7863_vm4, %v1343_v55, 0.0  ;;  %v6055_v15 = vld [vmem:[#allocation8 + $0x28] sm:$0xff]  ;;  %1211 = vst [vmem:[#allocation2 + $0x45c] sm:$0xf] %v1179_v35 }
 0x145   : > { %v7901_v27 = vmax.f32 %v7748_v28, 0.0  ;;  %v707_v22 = vcvt.s32.f32 %v7761_v16  ;;  %v630_v24 = vadd.f32 %v7907_v32, %v629_v17  ;;  %vm962_vm5 = vcmp.ge.s32.totalorder %v7892_v0, 1  ;;  %3587 = vmatpush.bf16.msra.mxu1 %v6055_v15  ;;  %1307 = vst [vmem:[#allocation2 + $0x460] sm:$0xf] %v1275_v42  ;;  %3677 = vmatpush.bf16.msra.mxu2 %v7925_v54 }
 0x146   : > { %vm10853_vm14 = vcmp.le.s32.totalorder %v7892_v0, 14  ;;  %1283 = vst [vmem:[#allocation2 + $0x100] sm:$0xf] %v1251_v40  ;;  %v1848_v28 = vpack.c.bf16 %v7884_v47, %v7884_v47  ;;  %v1944_v55 = vpack.c.bf16 %v7889_v59, %v7889_v59  ;;  %vm11018_vm10 = vcmp.ge.s32.totalorder %v7048_v49, 1  ;;  %vm1091_vm8 = vmand %vm898_vm7, %vm962_vm5  ;;  %6236 = vmatpush.bf16.msrb.mxu3 %v6055_v15 }
 0x147   : > { %vm7921_vm11 = vmand %vm927_vm15, %vm11018_vm10  ;;  %v2071_v40 = vpack.c.bf16 %v7898_v57, %v7898_v57  ;;  %v739_v50 = vadd.f32 0.5, %v707_v22  ;;  %v10856_v36 = vrot.slane %v7901_v27, 7  ;;  %v10855_v46 = vrot.slane %v7901_v27, 1  ;;  %1499 = vst [vmem:[#allocation2 + $0x440] sm:$0xf] %v1467_v38 }
 0x148   : > { %v1123_v47 = vsel %vm1091_vm8, %v7788_v62, 0.0  ;;  %vm1380_vm2 = vmand %vm898_vm7, %vm10853_vm14  ;;  %v7940_v59 = vmax.f32 %v630_v24, 0.0  ;;  %vm891_vm4 = vcmp.ge.s32.totalorder %v6991_v60, 1  ;;  %vm951_vm0 = vcmp.le.s32.totalorder %v7363_v13, 14  ;;  %1753 = vst [vmem:[#allocation2 + $0x404] sm:$0xf] %v1721_v52 }
 0x149   : > { %v1155_v12 = vpack.c.bf16 %v1123_v47, %v1123_v47  ;;  %v771_v57 = vmul.f32 0.0625, %v739_v50  ;;  %v11021_v22 = vrot.slane %v7731_v21, 7  ;;  %v11022_v35 = vrot.slane %v7731_v21, 1  ;;  %1880 = vst [vmem:[#allocation2 + $0x3e4] sm:$0xf] %v1848_v28 }
 0x14a   : > { %vm11023_vm7 = vcmp.lt.s32.totalorder %v6892_v19, 7  ;;  %vm11024_vm10 = vcmp.le.s32.totalorder %v6987_v53, 14  ;;  %vm11027_vm14 = vcmp.ge.s32.totalorder %v7658_v63, 1  ;;  %vm11028_vm13 = vcmp.le.s32.totalorder %v7493_v29, 14  ;;  %1976 = vst [vmem:[#allocation2 + $0x3e8] sm:$0xf] %v1944_v55 }
 0x14b   : > { %v7950_v62 = vsel %vm1051_vm6, %v11021_v22, %v10856_v36  ;;  %v1366_v24 = vsel %vm11023_vm7, %v11022_v35, %v10855_v46  ;;  %vm7963_vm8 = vmand %vm926_vm9, %vm11024_vm10  ;;  %v7977_v53 = vsel %vm927_vm15, %v7901_v27, 0.0  ;;  %1187 = vst [vmem:[#allocation2 + $0xfc] sm:$0xf] %v1155_v12  ;;  %vm6290_vm9 = vcmp.lt.s32.totalorder %v771_v57, 0 }
 0x14c   : > { %v1412_v41 = vsel %vm1380_vm2, %v1366_v24, 0.0  ;;  %v1507_v50 = vsel %vm11027_vm14, %v7950_v62, 0.0  ;;  %v7972_v21 = vsel %vm11028_vm13, %v1366_v24, 0.0  ;;  %v6291_v14 = vceil.f32 %v771_v57  ;;  %2103 = vst [vmem:[#allocation2 + $0x3c8] sm:$0xf] %v2071_v40 }
 0x14d   : > { %v6292_v47 = vfloor.f32 %v771_v57  ;;  %v7982_v38 = vsel %vm7921_vm11, %v7950_v62, 0.0  ;;  %vm11029_vm14 = vcmp.ge.s32.totalorder %v7397_v7, 1  ;;  %v11032_v15 = vpack.c.bf16 %v7845_v37, %v7845_v37 }
 0x14e   : > { %vm7988_vm13 = vmand %vm951_vm0, %vm11029_vm14  ;;  %v1444_v12 = vpack.c.bf16 %v1412_v41, %v1412_v41  ;;  %v1539_v35 = vpack.c.bf16 %v1507_v50, %v1507_v50  ;;  %v1603_v57 = vpack.c.bf16 %v7901_v27, %v7901_v27  ;;  %v1698_v17 = vpack.c.bf16 %v7972_v21, %v7972_v21 }
 0x14f   : > { %1594 = vst [vmem:[#allocation2 + $0x420] sm:$0xf] %v11032_v15  ;;  %vm11033_vm11 = vcmp.le.s32.totalorder %v7397_v7, 14  ;;  %v11036_v37 = vpack.c.bf16 %v7743_v56, %v7743_v56  ;;  %v6293_v41 = vsel %vm6290_vm9, %v6291_v14, %v6292_v47  ;;  %v8012_v50 = vsel %vm7963_vm8, %v1366_v24, 0.0  ;;  %v571_v14 = vpop.f32.mrf.mxu0 }
 0x150   : > { %vm8003_vm2 = vmand %vm951_vm0, %vm11033_vm11  ;;  %v10859_v15 = vrot.slane %v7940_v59, 7  ;;  %vm11037_vm7 = vcmp.ge.s32.totalorder %v7041_v45, 1  ;;  %v8026_v21 = vsel %vm891_vm4, %v7940_v59, 0.0  ;;  %vm11040_vm9 = vcmp.le.s32.totalorder %v7003_v9, 14  ;;  %1476 = vst [vmem:[#allocation2 + $0x104] sm:$0xf] %v1444_v12  ;;  %v631_v12 = vpop.f32.mrf.mxu3 }
 0x151   : > { %1658 = vst [vmem:[#allocation2 + $0x424] sm:$0xf] %v11036_v37  ;;  %vm8019_vm10 = vmand %vm891_vm4, %vm11037_vm7  ;;  %v8039_v42 = vcvt.f32.s32 %v6293_v41  ;;  %v1825_v47 = vpack.c.bf16 %v7982_v38, %v7982_v38  ;;  %v1921_v37 = vpack.c.bf16 %v7977_v53, %v7977_v53  ;;  %v10860_v36 = vrot.slane %v7940_v59, 1 }
 0x152   : > { %vm8032_vm8 = vmand %vm922_vm3, %vm11040_vm9  ;;  %v2048_v26 = vpack.c.bf16 %v8012_v50, %v8012_v50  ;;  %v11043_v44 = vrot.slane %v7743_v56, 7  ;;  %v1244_v52 = vpack.c.bf16 %v8026_v21, %v8026_v21  ;;  %v8059_v53 = vsel %vm951_vm0, %v7940_v59, 0.0  ;;  %1571 = vst [vmem:[#allocation2 + $0xe4] sm:$0xf] %v1539_v35 }
 0x153   : > { %vm11044_vm3 = vcmp.le.s32.totalorder %v7053_v31, 14  ;;  %v835_v38 = vmul.u32 16, %v8039_v42  ;;  %vm899_vm11 = vcmp.ge.s32.totalorder %v8039_v42, 1  ;;  %v11047_v13 = vrot.slane %v7743_v56, 1  ;;  %1635 = vst [vmem:[#allocation2 + $0xe8] sm:$0xf] %v1603_v57 }
 0x154   : > { %v1053_v33 = vsel %vm1051_vm6, %v11043_v44, %v10859_v15  ;;  %vm8065_vm14 = vmand %vm950_vm1, %vm11044_vm3  ;;  %vm11048_vm0 = vcmp.lt.s32.totalorder %v6892_v19, 7  ;;  %v1220_v34 = vsel %vm899_vm11, %v7901_v27, 0.0  ;;  %vm11049_vm1 = vcmp.ge.s32.totalorder %v6982_v48, 1  ;;  %1730 = vst [vmem:[#allocation2 + $0xc8] sm:$0xf] %v1698_v17 }
 0x155   : > { %v1116_v44 = vsel %vm8019_vm10, %v1053_v33, 0.0  ;;  %v1342_v31 = vsel %vm11048_vm0, %v11047_v13, %v10860_v36  ;;  %v8088_v41 = vsel %vm11049_vm1, %v1053_v33, 0.0  ;;  %v572_v7 = vadd.f32 %v7907_v32, %v571_v14  ;;  %1857 = vst [vmem:[#allocation2 + $0xa8] sm:$0xf] %v1825_v47 }
 0x156   : > { %v8084_v55 = vsel %vm8032_vm8, %v1342_v31, 0.0  ;;  %v8092_v56 = vsub.s32 %v7761_v16, %v835_v38  ;;  %v1252_v15 = vpack.c.bf16 %v1220_v34, %v1220_v34  ;;  %v1148_v40 = vpack.c.bf16 %v1116_v44, %v1116_v44  ;;  %1953 = vst [vmem:[#allocation2 + $0xac] sm:$0xf] %v1921_v37 }
 0x157   : > { %v1627_v13 = vpack.c.bf16 %v7940_v59, %v7940_v59  ;;  %v1468_v24 = vpack.c.bf16 %v8084_v55, %v8084_v55  ;;  %vm11050_vm7 = vcmp.le.s32.totalorder %v7602_v1, 14  ;;  %v8104_v14 = vsel %vm7988_vm13, %v1053_v33, 0.0  ;;  %v574_v57 = vpop.f32.mrf.mxu0  ;;  %2080 = vst [vmem:[#allocation2 + $0x8c] sm:$0xf] %v2048_v26 }
 0x158   : > { %v8100_v36 = vsel %vm11050_vm7, %v1342_v31, 0.0  ;;  %v8108_v16 = vsel %vm8065_vm14, %v1342_v31, 0.0  ;;  %vm963_vm10 = vcmp.ge.s32.totalorder %v8092_v56, 1  ;;  %vm10861_vm9 = vcmp.le.s32.totalorder %v8092_v56, 14  ;;  %1284 = vst [vmem:[#allocation2 + $0x124] sm:$0xf] %v1252_v15 }
 0x159   : > { %v1563_v35 = vpack.c.bf16 %v8088_v41, %v8088_v41  ;;  %vm1092_vm13 = vmand %vm899_vm11, %vm963_vm10  ;;  %v8122_v33 = vmax.f32 %v572_v7, 0.0  ;;  %v708_v28 = vcvt.s32.f32 %v7772_v51  ;;  %vm928_vm8 = vcmp.le.s32.totalorder %v7463_v58, 14  ;;  %v6078_v31 = vld [vmem:[#allocation8 + $0xe0] sm:$0xff]  ;;  %1180 = vst [vmem:[#allocation2] sm:$0xf] %v1148_v40 }
 0x15a   : > { %v1124_v15 = vsel %vm1092_vm13, %v7950_v62, 0.0  ;;  %vm8131_vm3 = vmand %vm899_vm11, %vm10861_vm9  ;;  %v632_v34 = vadd.f32 %v7907_v32, %v631_v12  ;;  %vm11053_vm14 = vcmp.ge.s32.totalorder %v7493_v29, 1  ;;  %vm11056_vm0 = vcmp.le.s32.totalorder %v7493_v29, 14  ;;  %v6054_v12 = vld [vmem:[#allocation8 + $0x20] sm:$0xff]  ;;  %3855 = vmatpush.bf16.msrb.mxu0 %v6078_v31  ;;  %1276 = vst [vmem:[#allocation2 + $0x4] sm:$0xf] %v1244_v52 }
 0x15b   : > { %v1156_v7 = vpack.c.bf16 %v1124_v15, %v1124_v15  ;;  %v740_v62 = vadd.f32 0.5, %v708_v28  ;;  %v10863_v38 = vrot.slane %v8122_v33, 7  ;;  %v10862_v22 = vrot.slane %v8122_v33, 1  ;;  %vm8146_vm11 = vmand %vm928_vm8, %vm11053_vm14  ;;  %3588 = vmatpush.bf16.msra.mxu1 %v6054_v12  ;;  %6237 = vmatpush.bf16.msrb.mxu3 %v6054_v12  ;;  %1500 = vst [vmem:[#allocation2 + $0x464] sm:$0xf] %v1468_v24  ;;  %v6053_v24 = vld [vmem:[#allocation8 + $0x18] sm:$0xff] }
 0x15c   : > { %v8155_v47 = vsel %vm928_vm8, %v8122_v33, 0.0  ;;  %vm8161_vm1 = vmand %vm928_vm8, %vm11056_vm0  ;;  %vm892_vm7 = vcmp.ge.s32.totalorder %v6940_v25, 1  ;;  %vm952_vm13 = vcmp.le.s32.totalorder %v7557_v23, 14  ;;  %vm11059_vm14 = vcmp.le.s32.totalorder %v7048_v49, 14  ;;  %v6077_v12 = vld [vmem:[#allocation8 + $0xd8] sm:$0xff] }
 0x15d   : > { %1188 = vst [vmem:[#allocation2 + $0x120] sm:$0xf] %v1156_v7  ;;  %vm8171_vm9 = vmand %vm927_vm15, %vm11059_vm14  ;;  %v772_v29 = vmul.f32 0.0625, %v740_v62  ;;  %v11062_v58 = vrot.slane %v7901_v27, 7  ;;  %v11063_v7 = vrot.slane %v7901_v27, 1  ;;  %vm11064_vm8 = vcmp.lt.s32.totalorder %v6892_v19, 7 }
 0x15e   : > { %v8189_v49 = vmax.f32 %v632_v34, 0.0  ;;  %vm11065_vm15 = vcmp.le.s32.totalorder %v7658_v63, 14  ;;  %v8208_v34 = vadd.f32 %v7907_v32, %v574_v57  ;;  %v8223_v57 = vld [vmem:[#allocation8 + $0x58] sm:$0xff]  ;;  %1595 = vst [vmem:[#allocation2 + $0x444] sm:$0xf] %v1563_v35  ;;  %v11082_v41 = vrot.slane %v7940_v59, 7  ;;  %3856 = vmatpush.bf16.msrb.mxu0 %v6077_v12 }
 0x15f   : > { %v8181_v15 = vsel %vm1051_vm6, %v11062_v58, %v10863_v38  ;;  %v1365_v61 = vsel %vm11064_vm8, %v11063_v7, %v10862_v22  ;;  %vm6295_vm0 = vcmp.lt.s32.totalorder %v772_v29, 0  ;;  %v6296_v50 = vceil.f32 %v772_v29  ;;  %3678 = vmatpush.bf16.msra.mxu2 %v8223_v57  ;;  %v8285_v22 = vld [vmem:[#allocation8 + $0x50] sm:$0xff]  ;;  %1659 = vst [vmem:[#allocation2 + $0x448] sm:$0xf] %v1627_v13  ;;  %3589 = vmatpush.bf16.msra.mxu1 %v6053_v24  ;;  %v6051_v7 = vld [vmem:[#allocation8 + $0x8] sm:$0xff] }
 0x160   : > { %v8196_v62 = vsel %vm8131_vm3, %v1365_v61, 0.0  ;;  %v8201_v58 = vsel %vm962_vm5, %v8181_v15, 0.0  ;;  %v8205_v27 = vsel %vm11065_vm15, %v1365_v61, 0.0  ;;  %v6297_v26 = vfloor.f32 %v772_v29  ;;  %6238 = vmatpush.bf16.msrb.mxu3 %v6053_v24 }
 0x161   : > { %v8213_v44 = vsel %vm8146_vm11, %v8181_v15, 0.0  ;;  %vm11066_vm3 = vcmp.ge.s32.totalorder %v7602_v1, 1  ;;  %v1445_v40 = vpack.c.bf16 %v8196_v62, %v8196_v62  ;;  %v1540_v17 = vpack.c.bf16 %v8201_v58, %v8201_v58 }
 0x162   : > { %vm8219_vm14 = vmand %vm952_vm13, %vm11066_vm3  ;;  %v8236_v38 = vsel %vm8171_vm9, %v1365_v61, 0.0  ;;  %vm11069_vm11 = vcmp.le.s32.totalorder %v7602_v1, 14  ;;  %v6298_v52 = vsel %vm6295_vm0, %v6296_v50, %v6297_v26  ;;  %v1699_v31 = vpack.c.bf16 %v8205_v27, %v8205_v27 }
 0x163   : > { %vm8242_vm8 = vmand %vm952_vm13, %vm11069_vm11  ;;  %v1050_v37 = vrot.slane %v8189_v49, 7  ;;  %vm11072_vm9 = vcmp.ge.s32.totalorder %v6998_v2, 1  ;;  %v8264_v55 = vsel %vm892_vm7, %v8189_v49, 0.0  ;;  %vm11075_vm0 = vcmp.ge.s32.totalorder %v6962_v39, 1  ;;  %3679 = vmatpush.bf16.msra.mxu2 %v8285_v22  ;;  %1477 = vst [vmem:[#allocation2 + $0x128] sm:$0xf] %v1445_v40 }
 0x164   : > { %vm8257_vm15 = vmand %vm892_vm7, %vm11072_vm9  ;;  %vm11076_vm3 = vcmp.ge.s32.totalorder %v6926_v4, 1  ;;  %v8278_v61 = vcvt.f32.s32 %v6298_v52  ;;  %v1339_v39 = vrot.slane %v8189_v49, 1  ;;  %vm11079_vm9 = vcmp.le.s32.totalorder %v7041_v45, 14  ;;  %1572 = vst [vmem:[#allocation2 + $0x108] sm:$0xf] %v1540_v17  ;;  %v6075_v40 = vld [vmem:[#allocation8 + $0xc8] sm:$0xff] }
 0x165   : > { %vm8271_vm11 = vmand %vm11076_vm3, %vm11075_vm0  ;;  %v1052_v35 = vsel %vm1051_vm6, %v11082_v41, %v1050_v37  ;;  %v11083_v52 = vrot.slane %v7000_v8, 7  ;;  %v1245_v60 = vpack.c.bf16 %v8264_v55, %v8264_v55  ;;  %v11084_v50 = vpack.c.bf16 %v8100_v36, %v8100_v36  ;;  %v6076_v36 = vld [vmem:[#allocation8 + $0xd0] sm:$0xff]  ;;  %1731 = vst [vmem:[#allocation2 + $0xec] sm:$0xf] %v1699_v31 }
 0x166   : > { %vm8291_vm0 = vmand %vm891_vm4, %vm11079_vm9  ;;  %v836_v13 = vmul.u32 16, %v8278_v61  ;;  %vm900_vm4 = vcmp.ge.s32.totalorder %v8278_v61, 1  ;;  %v8315_v41 = vsel %vm8257_vm15, %v1052_v35, 0.0  ;;  %vm11085_vm3 = vcmp.le.s32.totalorder %v6998_v2, 14  ;;  %3857 = vmatpush.bf16.msrb.mxu0 %v6076_v36 }
 0x167   : > { %v1083_v26 = vsel %vm1051_vm6, %v1050_v37, %v11083_v52  ;;  %1754 = vst [vmem:[#allocation2 + $0x428] sm:$0xf] %v11084_v50  ;;  %vm8321_vm9 = vmand %vm892_vm7, %vm11085_vm3  ;;  %v11088_v12 = vpack.c.bf16 %v8104_v14, %v8104_v14  ;;  %v1221_v1 = vsel %vm900_vm4, %v8122_v33, 0.0  ;;  %v11089_v25 = vrot.slane %v7940_v59, 1 }
 0x168   : > { %v8335_v2 = vsel %vm8271_vm11, %v1083_v26, 0.0  ;;  %vm11090_vm7 = vcmp.lt.s32.totalorder %v6892_v19, 7  ;;  %v8344_v24 = vsel %vm952_vm13, %v8189_v49, 0.0  ;;  %v11091_v14 = vpack.c.bf16 %v8059_v53, %v8059_v53  ;;  %1277 = vst [vmem:[#allocation2 + $0x28] sm:$0xf] %v1245_v60 }
 0x169   : > { %1881 = vst [vmem:[#allocation2 + $0x408] sm:$0xf] %v11088_v12  ;;  %v1341_v50 = vsel %vm11090_vm7, %v11089_v25, %v1339_v39  ;;  %v8351_v29 = vsub.s32 %v7772_v51, %v836_v13  ;;  %v1253_v52 = vpack.c.bf16 %v1221_v1, %v1221_v1  ;;  %v11092_v59 = vrot.slane %v7000_v8, 1  ;;  %vm11093_vm15 = vmmov %vm11090_vm7  ;;  %v6052_v25 = vld [vmem:[#allocation8 + $0x10] sm:$0xff]  ;;  %v576_v13 = vpop.f32.mrf.mxu0  ;;  %v8385_v1 = vld [vmem:[#allocation8 + $0x48] sm:$0xff] }
 0x16a   : > { %1977 = vst [vmem:[#allocation2 + $0x40c] sm:$0xf] %v11091_v14  ;;  %v8359_v23 = vsel %vm8291_vm0, %v1341_v50, 0.0  ;;  %vm11094_vm13 = vcmp.ge.s32.totalorder %v6982_v48, 1  ;;  %vm11095_vm11 = vcmp.le.s32.totalorder %v6928_v5, 14  ;;  %v11098_v8 = vpack.c.bf16 %v8108_v16, %v8108_v16  ;;  %3590 = vmatpush.bf16.msra.mxu1 %v6052_v25  ;;  %3680 = vmatpush.bf16.msra.mxu2 %v8385_v1 }
 0x16b   : > { %v1372_v12 = vsel %vm11093_vm15, %v1339_v39, %v11092_v59  ;;  %vm8365_vm3 = vmand %vm11095_vm11, %vm11094_vm13  ;;  %v1149_v51 = vpack.c.bf16 %v8315_v41, %v8315_v41  ;;  %vm11099_vm0 = vcmp.ge.s32.totalorder %v7041_v45, 1  ;;  %v8383_v5 = vmax.f32 %v8208_v34, 0.0  ;;  %1285 = vst [vmem:[#allocation2 + $0x148] sm:$0xf] %v1253_v52  ;;  %6239 = vmatpush.bf16.msrb.mxu3 %v6052_v25  ;;  %v8438_v25 = vld [vmem:[#allocation8 + $0x40] sm:$0xff]  ;;  %3858 = vmatpush.bf16.msrb.mxu0 %v6075_v40 }
 0x16c   : > { %2104 = vst [vmem:[#allocation2 + $0x3ec] sm:$0xf] %v11098_v8  ;;  %v8376_v39 = vsel %vm8321_vm9, %v1372_v12, 0.0  ;;  %v8380_v4 = vsel %vm11099_vm0, %v1083_v26, 0.0  ;;  %vm964_vm7 = vcmp.ge.s32.totalorder %v8351_v29, 1  ;;  %v1150_v16 = vpack.c.bf16 %v8335_v2, %v8335_v2 }
 0x16d   : > { %v1437_v37 = vpack.c.bf16 %v8359_v23, %v8359_v23  ;;  %vm11100_vm9 = vcmp.ge.s32.totalorder %v7003_v9, 1  ;;  %vm10864_vm15 = vcmp.le.s32.totalorder %v8351_v29, 14  ;;  %vm1093_vm13 = vmand %vm900_vm4, %vm964_vm7  ;;  %vm11101_vm11 = vcmp.le.s32.totalorder %v6982_v48, 14  ;;  %1181 = vst [vmem:[#allocation2 + $0x24] sm:$0xf] %v1149_v51 }
 0x16e   : > { %v8394_v45 = vsel %vm11100_vm9, %v1052_v35, 0.0  ;;  %v8406_v34 = vsel %vm11101_vm11, %v1341_v50, 0.0  ;;  %vm11102_vm0 = vcmp.le.s32.totalorder %v7003_v9, 14  ;;  %v8414_v36 = vsel %vm8219_vm14, %v1052_v35, 0.0  ;;  %vm8444_vm14 = vmand %vm900_vm4, %vm10864_vm15  ;;  %3591 = vmatpush.bf16.msra.mxu1 %v6051_v7  ;;  %3681 = vmatpush.bf16.msra.mxu2 %v8438_v25  ;;  %1182 = vst [vmem:[#allocation2 + $0x48] sm:$0xf] %v1150_v16 }
 0x16f   : > { %v8410_v14 = vsel %vm11102_vm0, %v1372_v12, 0.0  ;;  %v1125_v52 = vsel %vm1093_vm13, %v8181_v15, 0.0  ;;  %v1438_v48 = vpack.c.bf16 %v8376_v39, %v8376_v39  ;;  %v1533_v9 = vpack.c.bf16 %v8380_v4, %v8380_v4  ;;  %6240 = vmatpush.bf16.msrb.mxu3 %v6051_v7  ;;  %1469 = vst [vmem:[#allocation2 + $0x8] sm:$0xf] %v1437_v37 }
 0x170   : > { %v8427_v62 = vsel %vm8365_vm3, %v1083_v26, 0.0  ;;  %v1157_v35 = vpack.c.bf16 %v1125_v52, %v1125_v52  ;;  %v11103_v15 = vpack.c.bf16 %v8122_v33, %v8122_v33  ;;  %v1564_v58 = vpack.c.bf16 %v8394_v45, %v8394_v45 }
 0x171   : > { %v8455_v8 = vsel %vm8003_vm2, %v1341_v50, 0.0  ;;  %v8458_v52 = vadd.s32 80, %v6892_v19  ;;  %vm929_vm3 = vcmp.le.s32.totalorder %v7620_v18, 14  ;;  %v8465_v27 = vsel %vm8242_vm8, %v1372_v12, 0.0  ;;  %1470 = vst [vmem:[#allocation2 + $0x2c] sm:$0xf] %v1438_v48 }
 0x172   : > { %1636 = vst [vmem:[#allocation2 + $0x10c] sm:$0xf] %v11103_v15  ;;  %v1027_v31 = vrot.slane %v8383_v5, 7  ;;  %v1316_v46 = vrot.slane %v8383_v5, 1  ;;  %vm11106_vm2 = vcmp.ge.s32.totalorder %v7658_v63, 1  ;;  %v11109_v21 = vpack.c.bf16 %v8213_v44, %v8213_v44 }
 0x173   : > { %1189 = vst [vmem:[#allocation2 + $0x144] sm:$0xf] %v1157_v35  ;;  %vm8473_vm4 = vmand %vm929_vm3, %vm11106_vm2  ;;  %v709_v40 = vcvt.s32.f32 %v8458_v52  ;;  %v8487_v35 = vsel %vm929_vm3, %v8383_v5, 0.0  ;;  %vm11110_vm8 = vcmp.le.s32.totalorder %v7658_v63, 14  ;;  %v577_v44 = vadd.f32 %v7907_v32, %v576_v13 }
 0x174   : > { %1858 = vst [vmem:[#allocation2 + $0xcc] sm:$0xf] %v11109_v21  ;;  %vm8493_vm9 = vmand %vm929_vm3, %vm11110_vm8  ;;  %v11113_v21 = vpack.c.bf16 %v8155_v47, %v8155_v47  ;;  %v11114_v15 = vrot.slane %v8122_v33, 7  ;;  %v11115_v18 = vrot.slane %v8122_v33, 1  ;;  %vm11116_vm13 = vcmp.lt.s32.totalorder %v6892_v19, 7  ;;  %v6050_v47 = vld [vmem:[#allocation8] sm:$0xff] }
 0x175   : > { %v8516_v53 = vadd.s32 88, %v6892_v19  ;;  %v11117_v12 = vpack.c.bf16 %v8236_v38, %v8236_v38  ;;  %v741_v59 = vadd.f32 0.5, %v709_v40  ;;  %vm11118_vm11 = vcmp.le.s32.totalorder %v7892_v0, 14  ;;  %3592 = vmatpush.bf16.msra.mxu1 %v6050_v47  ;;  %6241 = vmatpush.bf16.msrb.mxu3 %v6050_v47  ;;  %1565 = vst [vmem:[#allocation2 + $0xc] sm:$0xf] %v1533_v9 }
 0x176   : > { %1954 = vst [vmem:[#allocation2 + $0xd0] sm:$0xf] %v11113_v21  ;;  %v8507_v63 = vsel %vm1051_vm6, %v11114_v15, %v1027_v31  ;;  %v1364_v13 = vsel %vm11116_vm13, %v11115_v18, %v1316_v46  ;;  %v6074_v21 = vld [vmem:[#allocation8 + $0xc0] sm:$0xff]  ;;  %v2074_v15 = vpack.c.bf16 %v8465_v27, %v8465_v27  ;;  %v579_v18 = vpop.f32.mrf.mxu0  ;;  %v1923_v40 = vpack.c.bf16 %v8487_v35, %v8487_v35  ;;  %vm11121_vm3 = vmmov %vm11118_vm11 }
 0x177   : > { %2081 = vst [vmem:[#allocation2 + $0xb0] sm:$0xf] %v11117_v12  ;;  %v8525_v17 = vsel %vm8444_vm14, %v1364_v13, 0.0  ;;  %v8530_v33 = vsel %vm963_vm10, %v8507_v63, 0.0  ;;  %v8541_v26 = vsel %vm11118_vm11, %v1364_v13, 0.0  ;;  %v773_v41 = vmul.f32 0.0625, %v741_v59  ;;  %3859 = vmatpush.bf16.msrb.mxu0 %v6074_v21 }
 0x178   : > { %v1541_v51 = vpack.c.bf16 %v8530_v33, %v8530_v33  ;;  %v8553_v12 = vsel %vm8473_vm4, %v8507_v63, 0.0  ;;  %v8555_v38 = vmax.f32 %v577_v44, 0.0  ;;  %v8562_v2 = vsel %vm8161_vm1, %v1364_v13, 0.0  ;;  %1596 = vst [vmem:[#allocation2 + $0x468] sm:$0xf] %v1564_v58 }
 0x179   : > { %v710_v16 = vcvt.s32.f32 %v8516_v53  ;;  %vm930_vm0 = vcmp.le.s32.totalorder %v7835_v20, 14  ;;  %v580_v59 = vadd.f32 %v7907_v32, %v579_v18  ;;  %6242 = vmatpush.bf16.msra.mxu3 %v7664_v43  ;;  %vm6300_vm14 = vcmp.lt.s32.totalorder %v773_v41, 0  ;;  %2106 = vst [vmem:[#allocation2 + $0x434] sm:$0xf] %v2074_v15  ;;  %v4992_v33 = vld [vmem:[#allocation2 + $0x2c] sm:$0xf0] }
 0x17a   : > { %v6301_v50 = vceil.f32 %v773_v41  ;;  %v6302_v55 = vfloor.f32 %v773_v41  ;;  %v1028_v60 = vrot.slane %v8555_v38, 7  ;;  %vm8574_vm1 = vmand %vm930_vm0, %vm962_vm5  ;;  %v1700_v43 = vpack.c.bf16 %v8541_v26, %v8541_v26  ;;  %1573 = vst [vmem:[#allocation2 + $0x12c] sm:$0xf] %v1541_v51 }
 0x17b   : > { %v742_v20 = vadd.f32 0.5, %v710_v16  ;;  %v1317_v23 = vrot.slane %v8555_v38, 1  ;;  %v8585_v37 = vsel %vm930_vm0, %v8555_v38, 0.0  ;;  %vm8589_vm2 = vmand %vm930_vm0, %vm11121_vm3  ;;  %v1827_v48 = vpack.c.bf16 %v8553_v12, %v8553_v12  ;;  %1955 = vst [vmem:[#allocation2 + $0xf4] sm:$0xf] %v1923_v40 }
 0x17c   : > { %v6303_v39 = vsel %vm6300_vm14, %v6301_v50, %v6302_v55  ;;  %v2050_v13 = vpack.c.bf16 %v8562_v2, %v8562_v2  ;;  %v8602_v47 = vsel %vm1051_vm6, %v1027_v31, %v1028_v60  ;;  %vm11124_vm5 = vmmov %vm11116_vm13  ;;  %v11125_v31 = vpack.c.bf16 %v8189_v49, %v8189_v49  ;;  %1732 = vst [vmem:[#allocation2 + $0x110] sm:$0xf] %v1700_v43 }
 0x17d   : > { %v8607_v0 = vcvt.f32.s32 %v6303_v39  ;;  %v774_v21 = vmul.f32 0.0625, %v742_v20  ;;  %v1363_v4 = vsel %vm11124_vm5, %v1316_v46, %v1317_v23  ;;  %v8616_v9 = vsel %vm964_vm7, %v8602_v47, 0.0  ;;  %6243 = vmatpush.bf16.msra.mxu3 %v7716_v3  ;;  %1859 = vst [vmem:[#allocation2 + $0xf0] sm:$0xf] %v1827_v48 }
 0x17e   : > { %1660 = vst [vmem:[#allocation2 + $0x46c] sm:$0xf] %v11125_v31  ;;  %v1606_v45 = vpack.c.bf16 %v8555_v38, %v8555_v38  ;;  %vm11126_vm4 = vcmp.le.s32.totalorder %v8092_v56, 14  ;;  %v8630_v18 = vmax.f32 %v580_v59, 0.0  ;;  %v11127_v41 = vpack.c.bf16 %v8406_v34, %v8406_v34  ;;  %v8637_v16 = vpop.f32.mrf.mxu0 }
 0x17f   : > { %v8626_v58 = vsel %vm11126_vm4, %v1363_v4, 0.0  ;;  %v837_v3 = vmul.u32 16, %v8607_v0  ;;  %vm901_vm8 = vcmp.ge.s32.totalorder %v8607_v0, 1  ;;  %vm6305_vm13 = vcmp.lt.s32.totalorder %v774_v21, 0  ;;  %2082 = vst [vmem:[#allocation2 + $0xd4] sm:$0xf] %v2050_v13 }
 0x180   : > { %1755 = vst [vmem:[#allocation2 + $0x44c] sm:$0xf] %v11127_v41  ;;  %v6306_v49 = vceil.f32 %v774_v21  ;;  %v11128_v50 = vpack.c.bf16 %v8410_v14, %v8410_v14  ;;  %v1222_v59 = vsel %vm901_vm8, %v8383_v5, 0.0  ;;  %v6307_v55 = vfloor.f32 %v774_v21 }
 0x181   : > { %v1542_v34 = vpack.c.bf16 %v8616_v9, %v8616_v9  ;;  %v8650_v20 = vsel %vm8574_vm1, %v8602_v47, 0.0  ;;  %v11129_v39 = vpack.c.bf16 %v8414_v36, %v8414_v36  ;;  %v8656_v14 = vsub.s32 %v8458_v52, %v837_v3  ;;  %6244 = vmatpush.bf16.msra.mxu3 %v7875_v6  ;;  %vm11133_vm1 = vmmov %vm11124_vm5  ;;  %1638 = vst [vmem:[#allocation2 + $0x154] sm:$0xf] %v1606_v45 }
 0x182   : > { %1756 = vst [vmem:[#allocation2 + $0x470] sm:$0xf] %v11128_v50  ;;  %v1701_v31 = vpack.c.bf16 %v8626_v58, %v8626_v58  ;;  %v8662_v41 = vsel %vm8493_vm9, %v1363_v4, 0.0  ;;  %v8665_v50 = vadd.s32 96, %v6892_v19  ;;  %v11130_v28 = vpack.c.bf16 %v8427_v62, %v8427_v62 }
 0x183   : > { %1882 = vst [vmem:[#allocation2 + $0x42c] sm:$0xf] %v11129_v39  ;;  %v1254_v36 = vpack.c.bf16 %v1222_v59, %v1222_v59  ;;  %v6308_v52 = vsel %vm6305_vm13, %v6306_v49, %v6307_v55  ;;  %v1029_v3 = vrot.slane %v8630_v18, 7  ;;  %v1318_v39 = vrot.slane %v8630_v18, 1 }
 0x184   : > { %1883 = vst [vmem:[#allocation2 + $0x450] sm:$0xf] %v11130_v28  ;;  %v11131_v7 = vpack.c.bf16 %v8344_v24, %v8344_v24  ;;  %vm965_vm9 = vcmp.ge.s32.totalorder %v8656_v14, 1  ;;  %vm997_vm11 = vcmp.le.s32.totalorder %v8656_v14, 14  ;;  %v8679_v6 = vcvt.f32.s32 %v6308_v52  ;;  %v4984_v52 = vld [vmem:[#allocation2 + $0x24] sm:$0xf0] }
 0x185   : > { %v711_v62 = vcvt.s32.f32 %v8665_v50  ;;  %v11132_v21 = vpack.c.bf16 %v8455_v8, %v8455_v8  ;;  %vm1094_vm0 = vmand %vm901_vm8, %vm965_vm9  ;;  %v1828_v24 = vpack.c.bf16 %v8650_v20, %v8650_v20  ;;  %vm931_vm14 = vcmp.le.s32.totalorder %v8039_v42, 14  ;;  %6245 = vmatpush.bf16.msra.mxu3 %v7925_v54  ;;  %1286 = vst [vmem:[#allocation2 + $0x16c] sm:$0xf] %v1254_v36  ;;  %v5916_v20 = vld [vmem:[#allocation2 + $0x54] sm:$0xf] }
 0x186   : > { %1978 = vst [vmem:[#allocation2 + $0x430] sm:$0xf] %v11131_v7  ;;  %v8696_v49 = vsel %vm1051_vm6, %v1028_v60, %v1029_v3  ;;  %v1362_v8 = vsel %vm11133_vm1, %v1317_v23, %v1318_v39  ;;  %v1126_v59 = vsel %vm1094_vm0, %v8507_v63, 0.0  ;;  %vm1383_vm3 = vmand %vm901_vm8, %vm997_vm11  ;;  %v838_v55 = vmul.u32 16, %v8679_v6  ;;  %v5906_v23 = vld [vmem:[#allocation2 + $0x4] sm:$0xf]  ;;  %v584_v46 = vpop.f32.mrf.mxu0 }
 0x187   : > { %2105 = vst [vmem:[#allocation2 + $0x410] sm:$0xf] %v11132_v21  ;;  %vm902_vm5 = vcmp.ge.s32.totalorder %v8679_v6, 1  ;;  %v743_v60 = vadd.f32 0.5, %v711_v62  ;;  %v1158_v28 = vpack.c.bf16 %v1126_v59, %v1126_v59  ;;  %v8716_v15 = vsel %vm1383_vm3, %v1363_v4, 0.0  ;;  %vm8735_vm4 = vmand %vm931_vm14, %vm963_vm10 }
 0x188   : > { %v1223_v27 = vsel %vm902_vm5, %v8555_v38, 0.0  ;;  %v4982_v7 = vld [vmem:[#allocation2] sm:$0xf]  ;;  %v5910_v21 = vld [vmem:[#allocation2 + $0x20] sm:$0xf0]  ;;  %v11134_v62 = vpack.c.bf16 %v8525_v17, %v8525_v17  ;;  %v8724_v54 = vsub.s32 %v8516_v53, %v838_v55  ;;  %v8729_v4 = vsel %vm965_vm9, %v8696_v49, 0.0 }
 0x189   : > { %v775_v36 = vmul.f32 0.0625, %v743_v60  ;;  %v8742_v17 = vsel %vm931_vm14, %v8630_v18, 0.0  ;;  %1190 = vst [vmem:[#allocation2 + $0x168] sm:$0xf] %v1158_v28  ;;  %v1255_v53 = vpack.c.bf16 %v1223_v27, %v1223_v27  ;;  %v1447_v55 = vpack.c.bf16 %v8716_v15, %v8716_v15  ;;  %v5907_v63 = vld [vmem:[#allocation2 + $0xc] sm:$0xf]  ;;  %6246 = vmatpush.bf16.msra.mxu3 %v8223_v57 }
 0x18a   : > { %1478 = vst [vmem:[#allocation2 + $0x14c] sm:$0xf] %v11134_v62  ;;  %v8750_v62 = vsel %vm10864_vm15, %v1362_v8, 0.0  ;;  %vm10865_vm10 = vcmp.ge.s32.totalorder %v8724_v54, 1  ;;  %vm998_vm8 = vcmp.le.s32.totalorder %v8724_v54, 14  ;;  %v11137_v27 = vpack.c.bf16 %v8383_v5, %v8383_v5 }
 0x18b   : > { %vm6310_vm13 = vcmp.lt.s32.totalorder %v775_v36, 0  ;;  %v6311_v28 = vceil.f32 %v775_v36  ;;  %vm1095_vm0 = vmand %vm902_vm5, %vm10865_vm10  ;;  %v6312_v15 = vfloor.f32 %v775_v36  ;;  %v8770_v51 = vsel %vm8735_vm4, %v8696_v49, 0.0  ;;  %1287 = vst [vmem:[#allocation2 + $0x190] sm:$0xf] %v1255_v53 }
 0x18c   : > { %1637 = vst [vmem:[#allocation2 + $0x130] sm:$0xf] %v11137_v27  ;;  %v1127_v5 = vsel %vm1095_vm0, %v8602_v47, 0.0  ;;  %vm1384_vm1 = vmand %vm902_vm5, %vm998_vm8  ;;  %v4987_v59 = vor.u32 %v5906_v23, %v4984_v52  ;;  %v4983_v60 = vor.u32 %v5910_v21, %v4982_v7  ;;  %v8790_v43 = vsel %vm8589_vm2, %v1362_v8, 0.0  ;;  %v8832_v21 = vld [vmem:[#allocation2 + $0x6c] sm:$0xf0] }
 0x18d   : > { %v1159_v57 = vpack.c.bf16 %v1127_v5, %v1127_v5  ;;  %v6313_v26 = vsel %vm6310_vm13, %v6311_v28, %v6312_v15  ;;  %v4995_v47 = vor.u32 %v5907_v63, %v4992_v33  ;;  %v8797_v23 = vsel %vm1384_vm1, %v1362_v8, 0.0  ;;  %6247 = vmatpush.bf16.msra.mxu3 %v8285_v22  ;;  %1479 = vst [vmem:[#allocation2 + $0x170] sm:$0xf] %v1447_v55  ;;  %v5915_v28 = vld [vmem:[#allocation2 + $0x4c] sm:$0xf] }
 0x18e   : > { %v8795_v27 = vcvt.f32.s32 %v6313_v26  ;;  %3682 = vmatmul.bf16.vlgmr.msra.gmra.mxu2 %v4987_v59  ;;  %3593 = vmatmul.bf16.vlgmr.msra.gmra.mxu1 %v4983_v60  ;;  %v582_v12 = vadd.f32 %v7907_v32, %v8637_v16  ;;  %v8802_v48 = vadd.s32 104, %v6892_v19  ;;  %v1829_v35 = vpack.c.bf16 %v8770_v51, %v8770_v51  ;;  %1574 = vst [vmem:[#allocation2 + $0x150] sm:$0xf] %v1542_v34 }
 0x18f   : > { %3860 = vmatmul.bf16.vlgmr.msrb.gmra.mxu0 %v4995_v47  ;;  %v585_v40 = vadd.f32 %v7907_v32, %v584_v46  ;;  %v8811_v44 = vadd.s32 112, %v6892_v19  ;;  %1191 = vst [vmem:[#allocation2 + $0x18c] sm:$0xf] %v1159_v57  ;;  %v1448_v32 = vpack.c.bf16 %v8797_v23, %v8797_v23  ;;  %v2052_v22 = vpack.c.bf16 %v8790_v43, %v8790_v43 }
 0x190   : > { %v839_v16 = vmul.u32 16, %v8795_v27  ;;  %vm903_vm2 = vcmp.ge.s32.totalorder %v8795_v27, 1  ;;  %v8816_v8 = vmax.f32 %v582_v12, 0.0  ;;  %v712_v2 = vcvt.s32.f32 %v8802_v48  ;;  %1733 = vst [vmem:[#allocation2 + $0x134] sm:$0xf] %v1701_v31 }
 0x191   : > { %v1224_v13 = vsel %vm903_vm2, %v8630_v18, 0.0  ;;  %v713_v46 = vcvt.s32.f32 %v8811_v44  ;;  %vm10866_vm3 = vcmp.le.s32.totalorder %v8278_v61, 14  ;;  %v8838_v60 = vmax.f32 %v585_v40, 0.0  ;;  %6248 = vmatpush.bf16.msra.mxu3 %v8385_v1  ;;  %1860 = vst [vmem:[#allocation2 + $0x114] sm:$0xf] %v1828_v24 }
 0x192   : > { %v8828_v63 = vsub.s32 %v8665_v50, %v839_v16  ;;  %v744_v52 = vadd.f32 0.5, %v712_v2  ;;  %v1030_v7 = vrot.slane %v8816_v8, 7  ;;  %v1256_v36 = vpack.c.bf16 %v1224_v13, %v1224_v13  ;;  %v8841_v50 = vpop.f32.mrf.mxu0  ;;  %vm8859_vm0 = vmand %vm10866_vm3, %vm964_vm7  ;;  %1480 = vst [vmem:[#allocation2 + $0x194] sm:$0xf] %v1448_v32 }
 0x193   : > { %v1319_v53 = vrot.slane %v8816_v8, 1  ;;  %vm933_vm5 = vcmp.le.s32.totalorder %v8607_v0, 14  ;;  %vm11140_vm15 = vcmp.lt.s32.totalorder %v6892_v19, 7  ;;  %v8882_v58 = vsel %vm10866_vm3, %v8816_v8, 0.0  ;;  %1861 = vst [vmem:[#allocation2 + $0x138] sm:$0xf] %v1829_v35 }
 0x194   : > { %vm967_vm4 = vcmp.ge.s32.totalorder %v8828_v63, 1  ;;  %vm999_vm13 = vcmp.le.s32.totalorder %v8828_v63, 14  ;;  %v776_v9 = vmul.f32 0.0625, %v744_v52  ;;  %v8853_v34 = vsel %vm1051_vm6, %v1029_v3, %v1030_v7  ;;  %1288 = vst [vmem:[#allocation2 + $0x1b4] sm:$0xf] %v1256_v36 }
 0x195   : > { %vm1096_vm1 = vmand %vm903_vm2, %vm967_vm4  ;;  %v1361_v38 = vsel %vm11140_vm15, %v1318_v39, %v1319_v53  ;;  %v8877_v45 = vsel %vm10865_vm10, %v8853_v34, 0.0  ;;  %v745_v31 = vadd.f32 0.5, %v713_v46  ;;  %v11141_v15 = vpack.c.bf16 %v8585_v37, %v8585_v37  ;;  %6249 = vmatpush.bf16.msra.mxu3 %v8438_v25  ;;  %2084 = vst [vmem:[#allocation2 + $0x11c] sm:$0xf] %v2052_v22  ;;  %v9035_v22 = vld [vmem:[%s10780_s2] ss:$0 sm:$0xff] }
 0x196   : > { %v1128_v3 = vsel %vm1096_vm1, %v8696_v49, 0.0  ;;  %vm1385_vm7 = vmand %vm903_vm2, %vm999_vm13  ;;  %vm6315_vm15 = vcmp.lt.s32.totalorder %v776_v9, 0  ;;  %v6316_v39 = vceil.f32 %v776_v9  ;;  %v6317_v55 = vfloor.f32 %v776_v9  ;;  %v5028_v9 = vld [vmem:[#allocation2 + $0x74] sm:$0xf0] }
 0x197   : > { %1956 = vst [vmem:[#allocation2 + $0x118] sm:$0xf] %v11141_v15  ;;  %v1160_v33 = vpack.c.bf16 %v1128_v3, %v1128_v3  ;;  %vm11142_vm10 = vcmp.le.s32.totalorder %v8092_v56, 14  ;;  %v8903_v24 = vsel %vm1385_vm7, %v1361_v38, 0.0  ;;  %v8907_v49 = vsel %vm997_vm11, %v1361_v38, 0.0 }
 0x198   : > { %vm8899_vm3 = vmand %vm931_vm14, %vm11142_vm10  ;;  %v5023_v57 = vor.u32 %v5915_v28, %v8832_v21  ;;  %v11145_v37 = vpack.c.bf16 %v8662_v41, %v8662_v41  ;;  %v6318_v56 = vsel %vm6315_vm15, %v6316_v39, %v6317_v55  ;;  %v1608_v42 = vpack.c.bf16 %v8816_v8, %v8816_v8  ;;  %v5018_v3 = vld [vmem:[#allocation2 + $0x48] sm:$0xf]  ;;  %v5919_v39 = vld [vmem:[#allocation2 + $0x68] sm:$0xf0] }
 0x199   : > { %v8919_v5 = vsel %vm8859_vm0, %v8853_v34, 0.0  ;;  %v1926_v59 = vpack.c.bf16 %v8882_v58, %v8882_v58  ;;  %1192 = vst [vmem:[#allocation2 + $0x1b0] sm:$0xf] %v1160_v33  ;;  %v8923_v26 = vcvt.f32.s32 %v6318_v56  ;;  %v1544_v25 = vpack.c.bf16 %v8877_v45, %v8877_v45 }
 0x19a   : > { %2083 = vst [vmem:[#allocation2 + $0xf8] sm:$0xf] %v11145_v37  ;;  %v777_v41 = vmul.f32 0.0625, %v745_v31  ;;  %v1031_v47 = vrot.slane %v8838_v60, 7  ;;  %v1449_v23 = vpack.c.bf16 %v8903_v24, %v8903_v24  ;;  %v1703_v12 = vpack.c.bf16 %v8907_v49, %v8907_v49  ;;  %v589_v55 = vpop.f32.mrf.mxu0 }
 0x19b   : > { %v8934_v40 = vsel %vm8899_vm3, %v1361_v38, 0.0  ;;  %v1320_v16 = vrot.slane %v8838_v60, 1  ;;  %v840_v2 = vmul.u32 16, %v8923_v26  ;;  %vm904_vm14 = vcmp.ge.s32.totalorder %v8923_v26, 1  ;;  %vm8959_vm3 = vmand %vm933_vm5, %vm965_vm9  ;;  %1576 = vst [vmem:[#allocation2 + $0x198] sm:$0xf] %v1544_v25 }
 0x19c   : > { %vm6320_vm10 = vcmp.lt.s32.totalorder %v777_v41, 0  ;;  %v6321_v13 = vceil.f32 %v777_v41  ;;  %v11146_v46 = vpack.c.bf16 %v8729_v4, %v8729_v4  ;;  %v1225_v52 = vsel %vm904_vm14, %v8816_v8, 0.0  ;;  %1481 = vst [vmem:[#allocation2 + $0x1b8] sm:$0xf] %v1449_v23 }
 0x19d   : > { %v6322_v21 = vfloor.f32 %v777_v41  ;;  %v8949_v32 = vsel %vm1051_vm6, %v1030_v7, %v1031_v47  ;;  %vm11147_vm2 = vcmp.lt.s32.totalorder %v6892_v19, 7  ;;  %v11150_v1 = vpack.c.bf16 %v8630_v18, %v8630_v18  ;;  %1640 = vst [vmem:[#allocation2 + $0x19c] sm:$0xf] %v1608_v42 }
 0x19e   : > { %1575 = vst [vmem:[#allocation2 + $0x174] sm:$0xf] %v11146_v46  ;;  %v1360_v36 = vsel %vm11147_vm2, %v1319_v53, %v1320_v16  ;;  %v8967_v7 = vsub.s32 %v8802_v48, %v840_v2  ;;  %v1830_v38 = vpack.c.bf16 %v8919_v5, %v8919_v5  ;;  %v2053_v53 = vpack.c.bf16 %v8934_v40, %v8934_v40 }
 0x19f   : > { %1639 = vst [vmem:[#allocation2 + $0x178] sm:$0xf] %v11150_v1  ;;  %v8976_v31 = vsel %vm967_vm4, %v8949_v32, 0.0  ;;  %v11151_v18 = vpack.c.bf16 %v8750_v62, %v8750_v62  ;;  %v1257_v48 = vpack.c.bf16 %v1225_v52, %v1225_v52  ;;  %v6323_v28 = vsel %vm6320_vm10, %v6321_v13, %v6322_v21  ;;  %3687 = vmatmul.bf16.gmra.mxu2 %v5023_v57 }
 0x1a0   : > { %v1609_v15 = vpack.c.bf16 %v8838_v60, %v8838_v60  ;;  %v8986_v33 = vsel %vm998_vm8, %v1360_v36, 0.0  ;;  %vm968_vm9 = vcmp.ge.s32.totalorder %v8967_v7, 1  ;;  %v8992_v62 = vcvt.f32.s32 %v6323_v28  ;;  %1735 = vst [vmem:[#allocation2 + $0x17c] sm:$0xf] %v1703_v12 }
 0x1a1   : > { %1734 = vst [vmem:[#allocation2 + $0x158] sm:$0xf] %v11151_v18  ;;  %v8997_v24 = vsel %vm8959_vm3, %v8949_v32, 0.0  ;;  %v9002_v37 = vsel %vm933_vm5, %v8838_v60, 0.0  ;;  %v11152_v57 = vpack.c.bf16 %v8742_v17, %v8742_v17  ;;  %vm1000_vm0 = vcmp.le.s32.totalorder %v8967_v7, 14  ;;  %vm1097_vm1 = vmand %vm904_vm14, %vm968_vm9 }
 0x1a2   : > { %v1545_v51 = vpack.c.bf16 %v8976_v31, %v8976_v31  ;;  %v5019_v35 = vor.u32 %v5919_v39, %v5018_v3  ;;  %v5031_v56 = vor.u32 %v5916_v20, %v5028_v9  ;;  %v1129_v41 = vsel %vm1097_vm1, %v8853_v34, 0.0  ;;  %1289 = vst [vmem:[#allocation2 + $0x1d8] sm:$0xf] %v1257_v48  ;;  %vm9043_vm3 = vmand %vm904_vm14, %vm1000_vm0  ;;  %v9105_v49 = vpop.f32.mrf.mxu0 }
 0x1a3   : > { %1957 = vst [vmem:[#allocation2 + $0x13c] sm:$0xf] %v11152_v57  ;;  %v841_v17 = vmul.u32 16, %v8992_v62  ;;  %vm905_vm7 = vcmp.ge.s32.totalorder %v8992_v62, 1  ;;  %v1704_v2 = vpack.c.bf16 %v8986_v33, %v8986_v33  ;;  %v1161_v13 = vpack.c.bf16 %v1129_v41, %v1129_v41 }
 0x1a4   : > { %vm11153_vm15 = vcmp.le.s32.totalorder %v8351_v29, 14  ;;  %vm11154_vm10 = vcmp.le.s32.totalorder %v8278_v61, 14  ;;  %v1831_v43 = vpack.c.bf16 %v8997_v24, %v8997_v24  ;;  %3598 = vmatmul.bf16.gmra.mxu1 %v5019_v35  ;;  %3865 = vmatmul.bf16.gmra.mxu0 %v5031_v56  ;;  %v587_v34 = vadd.f32 %v9035_v22, %v8841_v50  ;;  %1862 = vst [vmem:[#allocation2 + $0x15c] sm:$0xf] %v1830_v38 }
 0x1a5   : > { %vm9026_vm2 = vmand %vm11154_vm10, %vm11153_vm15  ;;  %v9048_v29 = vsub.s32 %v8811_v44, %v841_v17  ;;  %v1226_v52 = vsel %vm905_vm7, %v8838_v60, 0.0  ;;  %v1927_v21 = vpack.c.bf16 %v9002_v37, %v9002_v37  ;;  %v9056_v50 = vadd.s32 120, %v6892_v19  ;;  %1193 = vst [vmem:[#allocation2 + $0x1d4] sm:$0xf] %v1161_v13  ;;  %v5928_v60 = vld [vmem:[#allocation2 + $0xb0] sm:$0xf0] }
 0x1a6   : > { %v9058_v4 = vmax.f32 %v587_v34, 0.0  ;;  %vm934_vm14 = vcmp.le.s32.totalorder %v8679_v6, 14  ;;  %v590_v23 = vadd.f32 %v9035_v22, %v589_v55  ;;  %v9063_v44 = vadd.s32 128, %v6892_v19  ;;  %1958 = vst [vmem:[#allocation2 + $0x160] sm:$0xf] %v1926_v59 }
 0x1a7   : > { %vm969_vm1 = vcmp.ge.s32.totalorder %v9048_v29, 1  ;;  %vm10867_vm15 = vcmp.le.s32.totalorder %v9048_v29, 14  ;;  %v9072_v9 = vsel %vm9026_vm2, %v1360_v36, 0.0  ;;  %v714_v1 = vcvt.s32.f32 %v9056_v50  ;;  %2085 = vst [vmem:[#allocation2 + $0x140] sm:$0xf] %v2053_v53 }
 0x1a8   : > { %vm1098_vm10 = vmand %vm905_vm7, %vm969_vm1  ;;  %v1258_v45 = vpack.c.bf16 %v1226_v52, %v1226_v52  ;;  %v1418_v25 = vsel %vm9043_vm3, %v1360_v36, 0.0  ;;  %v1032_v3 = vrot.slane %v9058_v4, 7  ;;  %v1321_v39 = vrot.slane %v9058_v4, 1  ;;  %1577 = vst [vmem:[#allocation2 + $0x1bc] sm:$0xf] %v1545_v51 }
 0x1a9   : > { %v1130_v8 = vsel %vm1098_vm10, %v8949_v32, 0.0  ;;  %vm9094_vm2 = vmand %vm905_vm7, %vm10867_vm15  ;;  %v746_v55 = vadd.f32 0.5, %v714_v1  ;;  %v9101_v36 = vsel %vm934_vm14, %v9058_v4, 0.0  ;;  %v9103_v18 = vmax.f32 %v590_v23, 0.0  ;;  %v5056_v1 = vld [vmem:[#allocation2 + $0xb4] sm:$0xf0] }
 0x1aa   : > { %v1162_v12 = vpack.c.bf16 %v1130_v8, %v1130_v8  ;;  %v9114_v32 = vsel %vm1051_vm6, %v1031_v47, %v1032_v3  ;;  %vm11161_vm7 = vcmp.lt.s32.totalorder %v6892_v19, 7  ;;  %v715_v28 = vcvt.s32.f32 %v9063_v44  ;;  %1290 = vst [vmem:[#allocation2 + $0x1fc] sm:$0xf] %v1258_v45 }
 0x1ab   : > { %v1359_v48 = vsel %vm11161_vm7, %v1320_v16, %v1321_v39  ;;  %v1450_v5 = vpack.c.bf16 %v1418_v25, %v1418_v25  ;;  %v2054_v38 = vpack.c.bf16 %v9072_v9, %v9072_v9  ;;  %v778_v20 = vmul.f32 0.0625, %v746_v55  ;;  %vm9153_vm7 = vmand %vm933_vm5, %vm997_vm11  ;;  %1641 = vst [vmem:[#allocation2 + $0x1c0] sm:$0xf] %v1609_v15  ;;  %v5064_v55 = vld [vmem:[#allocation2 + $0xbc] sm:$0xf0] }
 0x1ac   : > { %vm11162_vm3 = vcmp.ge.s32.totalorder %v8724_v54, 1  ;;  %vm935_vm15 = vcmp.le.s32.totalorder %v8795_v27, 14  ;;  %v9136_v58 = vsel %vm9094_vm2, %v1359_v48, 0.0  ;;  %v9141_v59 = vsel %vm968_vm9, %v9114_v32, 0.0  ;;  %1194 = vst [vmem:[#allocation2 + $0x1f8] sm:$0xf] %v1162_v12  ;;  %v594_v12 = vpop.f32.mrf.mxu0 }
 0x1ad   : > { %vm1768_vm10 = vmand %vm934_vm14, %vm11162_vm3  ;;  %v1610_v47 = vpack.c.bf16 %v9058_v4, %v9058_v4  ;;  %v9147_v16 = vsel %vm999_vm13, %v1359_v48, 0.0  ;;  %vm6325_vm2 = vcmp.lt.s32.totalorder %v778_v20, 0  ;;  %v6326_v53 = vceil.f32 %v778_v20  ;;  %1482 = vst [vmem:[#allocation2 + $0x1dc] sm:$0xf] %v1450_v5 }
 0x1ae   : > { %v6327_v57 = vfloor.f32 %v778_v20  ;;  %v1928_v35 = vpack.c.bf16 %v9101_v36, %v9101_v36  ;;  %v9160_v56 = vsel %vm1768_vm10, %v9114_v32, 0.0  ;;  %v747_v41 = vadd.f32 0.5, %v715_v28  ;;  %1736 = vst [vmem:[#allocation2 + $0x1a0] sm:$0xf] %v1704_v2  ;;  %vm9236_vm10 = vmand %vm935_vm15, %vm967_vm4 }
 0x1af   : > { %v1033_v17 = vrot.slane %v9103_v18, 7  ;;  %v1322_v14 = vrot.slane %v9103_v18, 1  ;;  %v1451_v13 = vpack.c.bf16 %v9136_v58, %v9136_v58  ;;  %v1546_v46 = vpack.c.bf16 %v9141_v59, %v9141_v59  ;;  %1863 = vst [vmem:[#allocation2 + $0x180] sm:$0xf] %v1831_v43  ;;  %v5925_v59 = vld [vmem:[#allocation2 + $0x9c] sm:$0xf] }
 0x1b0   : > { %v6328_v0 = vsel %vm6325_vm2, %v6326_v53, %v6327_v57  ;;  %v1705_v34 = vpack.c.bf16 %v9147_v16, %v9147_v16  ;;  %v9177_v52 = vsel %vm9153_vm7, %v1359_v48, 0.0  ;;  %v779_v23 = vmul.f32 0.0625, %v747_v41  ;;  %1959 = vst [vmem:[#allocation2 + $0x184] sm:$0xf] %v1927_v21  ;;  %v5054_v21 = vld [vmem:[#allocation2 + $0x90] sm:$0xf]  ;;  %vm9251_vm2 = vmand %vm934_vm14, %vm998_vm8 }
 0x1b1   : > { %v9173_v61 = vcvt.f32.s32 %v6328_v0  ;;  %v9183_v9 = vsel %vm1051_vm6, %v1032_v3, %v1033_v17  ;;  %v1832_v31 = vpack.c.bf16 %v9160_v56, %v9160_v56  ;;  %vm11165_vm11 = vcmp.lt.s32.totalorder %v6892_v19, 7  ;;  %2086 = vst [vmem:[#allocation2 + $0x164] sm:$0xf] %v2054_v38 }
 0x1b2   : > { %v9194_v51 = vsel %vm11165_vm11, %v1321_v39, %v1322_v14  ;;  %v9199_v45 = vsel %vm969_vm1, %v9183_v9, 0.0  ;;  %v9204_v25 = vsel %vm935_vm15, %v9103_v18, 0.0  ;;  %vm6330_vm3 = vcmp.lt.s32.totalorder %v779_v23, 0  ;;  %v5924_v39 = vld [vmem:[#allocation2 + $0x94] sm:$0xf] }
 0x1b3   : > { %v842_v15 = vmul.u32 16, %v9173_v61  ;;  %vm906_vm5 = vcmp.ge.s32.totalorder %v9173_v61, 1  ;;  %v6331_v3 = vceil.f32 %v779_v23  ;;  %v2055_v42 = vpack.c.bf16 %v9177_v52, %v9177_v52  ;;  %1483 = vst [vmem:[#allocation2 + $0x200] sm:$0xf] %v1451_v13 }
 0x1b4   : > { %v1227_v8 = vsel %vm906_vm5, %v9058_v4, 0.0  ;;  %v6332_v33 = vfloor.f32 %v779_v23  ;;  %v1611_v2 = vpack.c.bf16 %v9103_v18, %v9103_v18  ;;  %v9230_v48 = vsel %vm1000_vm0, %v9194_v51, 0.0  ;;  %1578 = vst [vmem:[#allocation2 + $0x1e0] sm:$0xf] %v1546_v46 }
 0x1b5   : > { %v9225_v24 = vsub.s32 %v9056_v50, %v842_v15  ;;  %v1259_v43 = vpack.c.bf16 %v1227_v8, %v1227_v8  ;;  %v1929_v37 = vpack.c.bf16 %v9204_v25, %v9204_v25  ;;  %v1547_v5 = vpack.c.bf16 %v9199_v45, %v9199_v45  ;;  %1642 = vst [vmem:[#allocation2 + $0x1e4] sm:$0xf] %v1610_v47 }
 0x1b6   : > { %v6333_v50 = vsel %vm6330_vm3, %v6331_v3, %v6332_v33  ;;  %v5059_v20 = vor.u32 %v5924_v39, %v5056_v1  ;;  %v5055_v58 = vor.u32 %v5928_v60, %v5054_v21  ;;  %v5067_v53 = vor.u32 %v5925_v59, %v5064_v55  ;;  %1737 = vst [vmem:[#allocation2 + $0x1c4] sm:$0xf] %v1705_v34 }
 0x1b7   : > { %vm970_vm7 = vcmp.ge.s32.totalorder %v9225_v24, 1  ;;  %vm1002_vm4 = vcmp.le.s32.totalorder %v9225_v24, 14  ;;  %1291 = vst [vmem:[#allocation2 + $0x220] sm:$0xf] %v1259_v43  ;;  %v9255_v38 = vcvt.f32.s32 %v6333_v50  ;;  %v1706_v57 = vpack.c.bf16 %v9230_v48, %v9230_v48  ;;  %v6089_v50 = vld [vmem:[#allocation8 + $0x138] sm:$0xff] }
 0x1b8   : > { %vm1099_vm11 = vmand %vm906_vm5, %vm970_vm7  ;;  %v9266_v6 = vsel %vm9236_vm10, %v9183_v9, 0.0  ;;  %3692 = vmatmul.bf16.gmra.mxu2 %v5059_v20  ;;  %3603 = vmatmul.bf16.gmra.mxu1 %v5055_v58  ;;  %v592_v54 = vadd.f32 %v9035_v22, %v9105_v49  ;;  %v9271_v41 = vadd.s32 136, %v6892_v19  ;;  %v9281_v23 = vadd.s32 144, %v6892_v19  ;;  %1864 = vst [vmem:[#allocation2 + $0x1a4] sm:$0xf] %v1832_v31 }
 0x1b9   : > { %v1131_v0 = vsel %vm1099_vm11, %v9114_v32, 0.0  ;;  %vm1388_vm8 = vmand %vm906_vm5, %vm1002_vm4  ;;  %v843_v13 = vmul.u32 16, %v9255_v38  ;;  %vm907_vm14 = vcmp.ge.s32.totalorder %v9255_v38, 1  ;;  %3870 = vmatmul.bf16.gmra.mxu0 %v5067_v53  ;;  %vm936_vm5 = vcmp.le.s32.totalorder %v8923_v26, 14  ;;  %1960 = vst [vmem:[#allocation2 + $0x1a8] sm:$0xf] %v1928_v35  ;;  %3941 = vmatpush.bf16.msrb.mxu1 %v6089_v50 }
 0x1ba   : > { %v1163_v49 = vpack.c.bf16 %v1131_v0, %v1131_v0  ;;  %v1228_v32 = vsel %vm907_vm14, %v9103_v18, 0.0  ;;  %v1420_v1 = vsel %vm1388_vm8, %v9194_v51, 0.0  ;;  %v9290_v46 = vmax.f32 %v592_v54, 0.0  ;;  %2087 = vst [vmem:[#allocation2 + $0x188] sm:$0xf] %v2055_v42 }
 0x1bb   : > { %v9296_v60 = vsub.s32 %v9063_v44, %v843_v13  ;;  %v716_v15 = vcvt.s32.f32 %v9271_v41  ;;  %v595_v4 = vadd.f32 %v9035_v22, %v594_v12  ;;  %v1260_v47 = vpack.c.bf16 %v1228_v32, %v1228_v32  ;;  %v5933_v53 = vld [vmem:[#allocation2 + $0xdc] sm:$0xf]  ;;  %1579 = vst [vmem:[#allocation2 + $0x204] sm:$0xf] %v1547_v5 }
 0x1bc   : > { %1195 = vst [vmem:[#allocation2 + $0x21c] sm:$0xf] %v1163_v49  ;;  %v9304_v3 = vsel %vm9251_vm2, %v9194_v51, 0.0  ;;  %v1034_v39 = vrot.slane %v9290_v46, 7  ;;  %v1323_v16 = vrot.slane %v9290_v46, 1  ;;  %v1452_v44 = vpack.c.bf16 %v1420_v1, %v1420_v1  ;;  %v9338_v51 = vpop.f32.mrf.mxu0 }
 0x1bd   : > { %vm971_vm3 = vcmp.ge.s32.totalorder %v9296_v60, 1  ;;  %vm1003_vm10 = vcmp.le.s32.totalorder %v9296_v60, 14  ;;  %v748_v34 = vadd.f32 0.5, %v716_v15  ;;  %vm11170_vm11 = vcmp.lt.s32.totalorder %v6892_v19, 7  ;;  %1292 = vst [vmem:[#allocation2 + $0x244] sm:$0xf] %v1260_v47 }
 0x1be   : > { %vm1100_vm2 = vmand %vm907_vm14, %vm971_vm3  ;;  %v9324_v56 = vsel %vm1051_vm6, %v1033_v17, %v1034_v39  ;;  %v1357_v31 = vsel %vm11170_vm11, %v1322_v14, %v1323_v16  ;;  %v9335_v36 = vsel %vm936_vm5, %v9290_v46, 0.0  ;;  %v717_v35 = vcvt.s32.f32 %v9281_v23  ;;  %1484 = vst [vmem:[#allocation2 + $0x224] sm:$0xf] %v1452_v44  ;;  %v5937_v13 = vld [vmem:[#allocation2 + $0xf8] sm:$0xf0] }
 0x1bf   : > { %v1132_v17 = vsel %vm1100_vm2, %v9183_v9, 0.0  ;;  %vm1389_vm8 = vmand %vm907_vm14, %vm1003_vm10  ;;  %v780_v14 = vmul.f32 0.0625, %v748_v34  ;;  %v9351_v8 = vsel %vm970_vm7, %v9324_v56, 0.0  ;;  %v9353_v33 = vmax.f32 %v595_v4, 0.0  ;;  %1643 = vst [vmem:[#allocation2 + $0x208] sm:$0xf] %v1611_v2 }
 0x1c0   : > { %v1164_v55 = vpack.c.bf16 %v1132_v17, %v1132_v17  ;;  %v1833_v52 = vpack.c.bf16 %v9266_v6, %v9266_v6  ;;  %v1421_v42 = vsel %vm1389_vm8, %v1357_v31, 0.0  ;;  %vm11171_vm2 = vcmp.le.s32.totalorder %v9048_v29, 14  ;;  %vm9367_vm11 = vmand %vm936_vm5, %vm968_vm9  ;;  %v5092_v6 = vld [vmem:[#allocation2 + $0xfc] sm:$0xf0]  ;;  %1738 = vst [vmem:[#allocation2 + $0x1e8] sm:$0xf] %v1706_v57 }
 0x1c1   : > { %v9359_v9 = vsel %vm11171_vm2, %v1357_v31, 0.0  ;;  %v2056_v12 = vpack.c.bf16 %v9304_v3, %v9304_v3  ;;  %vm6335_vm14 = vcmp.lt.s32.totalorder %v780_v14, 0  ;;  %v6336_v43 = vceil.f32 %v780_v14  ;;  %vm9375_vm8 = vmand %vm935_vm15, %vm999_vm13  ;;  %v5090_v15 = vld [vmem:[#allocation2 + $0xd8] sm:$0xf]  ;;  %1961 = vst [vmem:[#allocation2 + $0x1cc] sm:$0xf] %v1929_v37 }
 0x1c2   : > { %v6337_v28 = vfloor.f32 %v780_v14  ;;  %1196 = vst [vmem:[#allocation2 + $0x240] sm:$0xf] %v1164_v55  ;;  %v1548_v20 = vpack.c.bf16 %v9351_v8, %v9351_v8  ;;  %v1612_v58 = vpack.c.bf16 %v9290_v46, %v9290_v46  ;;  %v1930_v59 = vpack.c.bf16 %v9335_v36, %v9335_v36  ;;  %v5100_v37 = vld [vmem:[#allocation2 + $0x104] sm:$0xf0]  ;;  %v5934_v14 = vld [vmem:[#allocation2 + $0xe4] sm:$0xf] }
 0x1c3   : > { %v749_v40 = vadd.f32 0.5, %v717_v35  ;;  %v1453_v63 = vpack.c.bf16 %v1421_v42, %v1421_v42  ;;  %v1707_v54 = vpack.c.bf16 %v9359_v9, %v9359_v9  ;;  %v1035_v0 = vrot.slane %v9353_v33, 7  ;;  %1865 = vst [vmem:[#allocation2 + $0x1c8] sm:$0xf] %v1833_v52 }
 0x1c4   : > { %v6338_v27 = vsel %vm6335_vm14, %v6336_v43, %v6337_v28  ;;  %v1802_v32 = vsel %vm9367_vm11, %v9324_v56, 0.0  ;;  %v1324_v5 = vrot.slane %v9353_v33, 1  ;;  %v9405_v1 = vsel %vm9375_vm8, %v1357_v31, 0.0  ;;  %2088 = vst [vmem:[#allocation2 + $0x1ac] sm:$0xf] %v2056_v12  ;;  %v599_v31 = vpop.f32.mrf.mxu0 }
 0x1c5   : > { %v9394_v49 = vcvt.f32.s32 %v6338_v27  ;;  %v781_v45 = vmul.f32 0.0625, %v749_v40  ;;  %vm937_vm13 = vcmp.le.s32.totalorder %v8992_v62, 14  ;;  %v9412_v18 = vsel %vm1051_vm6, %v1034_v39, %v1035_v0  ;;  %1485 = vst [vmem:[#allocation2 + $0x248] sm:$0xf] %v1453_v63 }
 0x1c6   : > { %v5095_v2 = vor.u32 %v5933_v53, %v5092_v6  ;;  %v1834_v47 = vpack.c.bf16 %v1802_v32, %v1802_v32  ;;  %v5091_v39 = vor.u32 %v5937_v13, %v5090_v15  ;;  %vm11176_vm2 = vcmp.lt.s32.totalorder %v6892_v19, 7  ;;  %vm9449_vm8 = vmand %vm937_vm13, %vm969_vm1  ;;  %1580 = vst [vmem:[#allocation2 + $0x228] sm:$0xf] %v1548_v20 }
 0x1c7   : > { %v844_v4 = vmul.u32 16, %v9394_v49  ;;  %vm908_vm9 = vcmp.ge.s32.totalorder %v9394_v49, 1  ;;  %vm6340_vm15 = vcmp.lt.s32.totalorder %v781_v45, 0  ;;  %v6341_v48 = vceil.f32 %v781_v45  ;;  %1644 = vst [vmem:[#allocation2 + $0x22c] sm:$0xf] %v1612_v58 }
 0x1c8   : > { %v1229_v57 = vsel %vm908_vm9, %v9290_v46, 0.0  ;;  %v6342_v3 = vfloor.f32 %v781_v45  ;;  %v1356_v25 = vsel %vm11176_vm2, %v1323_v16, %v1324_v5  ;;  %3697 = vmatmul.bf16.gmra.mxu2 %v5095_v2  ;;  %v2057_v35 = vpack.c.bf16 %v9405_v1, %v9405_v1  ;;  %3608 = vmatmul.bf16.gmra.mxu1 %v5091_v39  ;;  %1739 = vst [vmem:[#allocation2 + $0x20c] sm:$0xf] %v1707_v54 }
 0x1c9   : > { %v9423_v44 = vsub.s32 %v9271_v41, %v844_v4  ;;  %v1261_v34 = vpack.c.bf16 %v1229_v57, %v1229_v57  ;;  %v9437_v41 = vsel %vm971_vm3, %v9412_v18, 0.0  ;;  %v1613_v46 = vpack.c.bf16 %v9353_v33, %v9353_v33  ;;  %1866 = vst [vmem:[#allocation2 + $0x1ec] sm:$0xf] %v1834_v47 }
 0x1ca   : > { %v6343_v17 = vsel %vm6340_vm15, %v6341_v48, %v6342_v3  ;;  %v9456_v55 = vsel %vm937_vm13, %v9353_v33, 0.0  ;;  %v9464_v52 = vsel %vm1002_vm4, %v1356_v25, 0.0  ;;  %v5103_v42 = vor.u32 %v5934_v14, %v5100_v37  ;;  %1962 = vst [vmem:[#allocation2 + $0x1f0] sm:$0xf] %v1930_v59  ;;  %v5128_v3 = vld [vmem:[#allocation2 + $0x144] sm:$0xf0] }
 0x1cb   : > { %vm972_vm14 = vcmp.ge.s32.totalorder %v9423_v44, 1  ;;  %vm1004_vm11 = vcmp.le.s32.totalorder %v9423_v44, 14  ;;  %1293 = vst [vmem:[#allocation2 + $0x268] sm:$0xf] %v1261_v34  ;;  %v9443_v16 = vcvt.f32.s32 %v6343_v17  ;;  %v597_v9 = vadd.f32 %v9035_v22, %v9338_v51  ;;  %v5200_v44 = vld [vmem:[#allocation2 + $0x1d4] sm:$0xf0] }
 0x1cc   : > { %vm1101_vm15 = vmand %vm908_vm9, %vm972_vm14  ;;  %v9469_v12 = vadd.s32 152, %v6892_v19  ;;  %v1549_v21 = vpack.c.bf16 %v9437_v41, %v9437_v41  ;;  %3875 = vmatmul.bf16.gmra.mxu0 %v5103_v42  ;;  %v1708_v26 = vpack.c.bf16 %v9464_v52, %v9464_v52  ;;  %v1803_v63 = vsel %vm9449_vm8, %v9412_v18, 0.0  ;;  %2089 = vst [vmem:[#allocation2 + $0x1d0] sm:$0xf] %v2057_v35  ;;  %v9536_v4 = vpop.f32.mrf.mxu0  ;;  %v5942_v52 = vld [vmem:[#allocation2 + $0x124] sm:$0xf] }
 0x1cd   : > { %v1133_v43 = vsel %vm1101_vm15, %v9324_v56, 0.0  ;;  %vm1390_vm1 = vmand %vm908_vm9, %vm1004_vm11  ;;  %v845_v28 = vmul.u32 16, %v9443_v16  ;;  %vm909_vm2 = vcmp.ge.s32.totalorder %v9443_v16, 1  ;;  %v9491_v40 = vmax.f32 %v597_v9, 0.0  ;;  %1645 = vst [vmem:[#allocation2 + $0x250] sm:$0xf] %v1613_v46 }
 0x1ce   : > { %v1165_v51 = vpack.c.bf16 %v1133_v43, %v1133_v43  ;;  %vm9484_vm15 = vmand %vm936_vm5, %vm1000_vm0  ;;  %v1230_v20 = vsel %vm909_vm2, %v9353_v33, 0.0  ;;  %v1422_v58 = vsel %vm1390_vm1, %v1356_v25, 0.0  ;;  %v718_v7 = vcvt.s32.f32 %v9469_v12  ;;  %1581 = vst [vmem:[#allocation2 + $0x24c] sm:$0xf] %v1549_v21  ;;  %v5126_v46 = vld [vmem:[#allocation2 + $0x120] sm:$0xf] }
 0x1cf   : > { %v9494_v53 = vsub.s32 %v9281_v23, %v845_v28  ;;  %v1262_v6 = vpack.c.bf16 %v1230_v20, %v1230_v20  ;;  %v1454_v27 = vpack.c.bf16 %v1422_v58, %v1422_v58  ;;  %v1036_v54 = vrot.slane %v9491_v40, 7  ;;  %1740 = vst [vmem:[#allocation2 + $0x230] sm:$0xf] %v1708_v26 }
 0x1d0   : > { %1197 = vst [vmem:[#allocation2 + $0x264] sm:$0xf] %v1165_v51  ;;  %v1325_v13 = vrot.slane %v9491_v40, 1  ;;  %v2026_v23 = vsel %vm9484_vm15, %v1356_v25, 0.0  ;;  %v750_v32 = vadd.f32 0.5, %v718_v7  ;;  %v1931_v45 = vpack.c.bf16 %v9456_v55, %v9456_v55 }
 0x1d1   : > { %vm10868_vm0 = vcmp.ge.s32.totalorder %v9494_v53, 1  ;;  %vm1005_vm5 = vcmp.le.s32.totalorder %v9494_v53, 14  ;;  %v9521_v36 = vsel %vm1051_vm6, %v1035_v0, %v1036_v54  ;;  %vm11181_vm8 = vcmp.lt.s32.totalorder %v6892_v19, 7  ;;  %1294 = vst [vmem:[#allocation2 + $0x28c] sm:$0xf] %v1262_v6 }
 0x1d2   : > { %vm1102_vm9 = vmand %vm909_vm2, %vm10868_vm0  ;;  %v1355_v59 = vsel %vm11181_vm8, %v1324_v5, %v1325_v13  ;;  %v600_v1 = vadd.f32 %v9035_v22, %v599_v31  ;;  %v1835_v15 = vpack.c.bf16 %v1803_v63, %v1803_v63  ;;  %v782_v0 = vmul.f32 0.0625, %v750_v32  ;;  %1486 = vst [vmem:[#allocation2 + $0x26c] sm:$0xf] %v1454_v27  ;;  %v5946_v31 = vld [vmem:[#allocation2 + $0x140] sm:$0xf0] }
 0x1d3   : > { %v1134_v2 = vsel %vm1102_vm9, %v9412_v18, 0.0  ;;  %vm1391_vm1 = vmand %vm909_vm2, %vm1005_vm5  ;;  %vm938_vm15 = vcmp.le.s32.totalorder %v9173_v61, 14  ;;  %v2058_v57 = vpack.c.bf16 %v2026_v23, %v2026_v23  ;;  %v1518_v18 = vsel %vm972_vm14, %v9521_v36, 0.0  ;;  %1963 = vst [vmem:[#allocation2 + $0x214] sm:$0xf] %v1931_v45 }
 0x1d4   : > { %v1166_v48 = vpack.c.bf16 %v1134_v2, %v1134_v2  ;;  %v1423_v5 = vsel %vm1391_vm1, %v1355_v59, 0.0  ;;  %vm9545_vm9 = vmand %vm938_vm15, %vm970_vm7  ;;  %vm11184_vm2 = vcmp.le.s32.totalorder %v9048_v29, 14  ;;  %vm6345_vm1 = vcmp.lt.s32.totalorder %v782_v0, 0  ;;  %1867 = vst [vmem:[#allocation2 + $0x210] sm:$0xf] %v1835_v15  ;;  %v604_v15 = vpop.f32.mrf.mxu0 }
 0x1d5   : > { %vm9553_vm8 = vmand %vm937_vm13, %vm11184_vm2  ;;  %v6346_v34 = vceil.f32 %v782_v0  ;;  %v6347_v25 = vfloor.f32 %v782_v0  ;;  %v1614_v37 = vpack.c.bf16 %v9491_v40, %v9491_v40  ;;  %v1677_v35 = vsel %vm1003_vm10, %v1355_v59, 0.0  ;;  %2090 = vst [vmem:[#allocation2 + $0x1f4] sm:$0xf] %v2058_v57  ;;  %v5136_v32 = vld [vmem:[#allocation2 + $0x14c] sm:$0xf0] }
 0x1d6   : > { %1198 = vst [vmem:[#allocation2 + $0x288] sm:$0xf] %v1166_v48  ;;  %v9564_v29 = vsel %vm938_vm15, %v9491_v40, 0.0  ;;  %v9566_v62 = vmax.f32 %v600_v1, 0.0  ;;  %v9569_v17 = vadd.s32 160, %v6892_v19  ;;  %v1455_v14 = vpack.c.bf16 %v1423_v5, %v1423_v5 }
 0x1d7   : > { %v6348_v41 = vsel %vm6345_vm1, %v6346_v34, %v6347_v25  ;;  %v1550_v8 = vpack.c.bf16 %v1518_v18, %v1518_v18  ;;  %v1804_v55 = vsel %vm9545_vm9, %v9521_v36, 0.0  ;;  %v9581_v9 = vsel %vm9553_vm8, %v1355_v59, 0.0  ;;  %v5943_v2 = vld [vmem:[#allocation2 + $0x12c] sm:$0xf]  ;;  %vm9633_vm1 = vmand %vm938_vm15, %vm1002_vm4  ;;  %1646 = vst [vmem:[#allocation2 + $0x274] sm:$0xf] %v1614_v37 }
 0x1d8   : > { %v9577_v42 = vcvt.f32.s32 %v6348_v41  ;;  %v719_v43 = vcvt.s32.f32 %v9569_v17  ;;  %v1037_v33 = vrot.slane %v9566_v62, 7  ;;  %vm939_vm7 = vcmp.le.s32.totalorder %v9255_v38, 14  ;;  %1487 = vst [vmem:[#allocation2 + $0x290] sm:$0xf] %v1455_v14 }
 0x1d9   : > { %v1326_v28 = vrot.slane %v9566_v62, 1  ;;  %v5131_v21 = vor.u32 %v5942_v52, %v5128_v3  ;;  %v5127_v50 = vor.u32 %v5946_v31, %v5126_v46  ;;  %v1709_v6 = vpack.c.bf16 %v1677_v35, %v1677_v35  ;;  %vm9610_vm9 = vmand %vm939_vm7, %vm971_vm3  ;;  %1582 = vst [vmem:[#allocation2 + $0x270] sm:$0xf] %v1550_v8 }
 0x1da   : > { %v846_v51 = vmul.u32 16, %v9577_v42  ;;  %vm910_vm13 = vcmp.ge.s32.totalorder %v9577_v42, 1  ;;  %v751_v56 = vadd.f32 0.5, %v719_v43  ;;  %v9593_v20 = vsel %vm1051_vm6, %v1036_v54, %v1037_v33 }
 0x1db   : > { %v1231_v58 = vsel %vm910_vm13, %v9491_v40, 0.0  ;;  %v1932_v26 = vpack.c.bf16 %v9564_v29, %v9564_v29  ;;  %3702 = vmatmul.bf16.gmra.mxu2 %v5131_v21  ;;  %3613 = vmatmul.bf16.gmra.mxu1 %v5127_v50  ;;  %v1519_v54 = vsel %vm10868_vm0, %v9593_v20, 0.0  ;;  %v1836_v45 = vpack.c.bf16 %v1804_v55, %v1804_v55  ;;  %1741 = vst [vmem:[#allocation2 + $0x254] sm:$0xf] %v1709_v6  ;;  %v5164_v6 = vld [vmem:[#allocation2 + $0x18c] sm:$0xf0] }
 0x1dc   : > { %v9601_v7 = vsub.s32 %v9469_v12, %v846_v51  ;;  %v1263_v27 = vpack.c.bf16 %v1231_v58, %v1231_v58  ;;  %v783_v63 = vmul.f32 0.0625, %v751_v56  ;;  %v2059_v12 = vpack.c.bf16 %v9581_v9, %v9581_v9 }
 0x1dd   : > { %vm11189_vm2 = vcmp.lt.s32.totalorder %v6892_v19, 7  ;;  %v9625_v1 = vsel %vm939_vm7, %v9566_v62, 0.0  ;;  %v1551_v48 = vpack.c.bf16 %v1519_v54, %v1519_v54  ;;  %v1805_v24 = vsel %vm9610_vm9, %v9593_v20, 0.0  ;;  %1868 = vst [vmem:[#allocation2 + $0x234] sm:$0xf] %v1836_v45  ;;  %v9697_v54 = vpop.f32.mrf.mxu0 }
 0x1de   : > { %v1354_v59 = vsel %vm11189_vm2, %v1325_v13, %v1326_v28  ;;  %vm10869_vm3 = vcmp.ge.s32.totalorder %v9601_v7, 1  ;;  %vm1006_vm8 = vcmp.le.s32.totalorder %v9601_v7, 14  ;;  %1295 = vst [vmem:[#allocation2 + $0x2b0] sm:$0xf] %v1263_v27  ;;  %vm6350_vm2 = vcmp.lt.s32.totalorder %v783_v63, 0 }
 0x1df   : > { %v6351_v13 = vceil.f32 %v783_v63  ;;  %vm1103_vm0 = vmand %vm910_vm13, %vm10869_vm3  ;;  %v6352_v0 = vfloor.f32 %v783_v63  ;;  %v5139_v57 = vor.u32 %v5943_v2, %v5136_v32  ;;  %v1678_v5 = vsel %vm1004_vm11, %v1354_v59, 0.0  ;;  %1964 = vst [vmem:[#allocation2 + $0x238] sm:$0xf] %v1932_v26  ;;  %v5951_v63 = vld [vmem:[#allocation2 + $0x16c] sm:$0xf] }
 0x1e0   : > { %v1135_v61 = vsel %vm1103_vm0, %v9521_v36, 0.0  ;;  %vm1392_vm4 = vmand %vm910_vm13, %vm1006_vm8  ;;  %v602_v18 = vadd.f32 %v9035_v22, %v9536_v4  ;;  %v9654_v47 = vadd.s32 168, %v6892_v19  ;;  %v605_v34 = vadd.f32 %v9035_v22, %v604_v15  ;;  %2091 = vst [vmem:[#allocation2 + $0x218] sm:$0xf] %v2059_v12 }
 0x1e1   : > { %v1167_v3 = vpack.c.bf16 %v1135_v61, %v1135_v61  ;;  %v6353_v39 = vsel %vm6350_vm2, %v6351_v13, %v6352_v0  ;;  %v1424_v36 = vsel %vm1392_vm4, %v1354_v59, 0.0  ;;  %3880 = vmatmul.bf16.gmra.mxu0 %v5139_v57  ;;  %v1615_v4 = vpack.c.bf16 %v9566_v62, %v9566_v62  ;;  %1583 = vst [vmem:[#allocation2 + $0x294] sm:$0xf] %v1551_v48  ;;  %v5955_v61 = vld [vmem:[#allocation2 + $0x188] sm:$0xf0] }
 0x1e2   : > { %v9658_v25 = vcvt.f32.s32 %v6353_v39  ;;  %v1456_v37 = vpack.c.bf16 %v1424_v36, %v1424_v36  ;;  %v9660_v31 = vmax.f32 %v602_v18, 0.0  ;;  %v720_v35 = vcvt.s32.f32 %v9654_v47 }
 0x1e3   : > { %1199 = vst [vmem:[#allocation2 + $0x2ac] sm:$0xf] %v1167_v3  ;;  %v1837_v29 = vpack.c.bf16 %v1805_v24, %v1805_v24  ;;  %v1933_v41 = vpack.c.bf16 %v9625_v1, %v9625_v1  ;;  %v2028_v14 = vsel %vm9633_vm1, %v1354_v59, 0.0  ;;  %v1710_v43 = vpack.c.bf16 %v1678_v5, %v1678_v5 }
 0x1e4   : > { %v847_v8 = vmul.u32 16, %v9658_v25  ;;  %vm911_vm0 = vcmp.ge.s32.totalorder %v9658_v25, 1  ;;  %v752_v55 = vadd.f32 0.5, %v720_v35  ;;  %v1038_v52 = vrot.slane %v9660_v31, 7  ;;  %1488 = vst [vmem:[#allocation2 + $0x2b4] sm:$0xf] %v1456_v37 }
 0x1e5   : > { %v1232_v9 = vsel %vm911_vm0, %v9566_v62, 0.0  ;;  %v1327_v46 = vrot.slane %v9660_v31, 1  ;;  %v9676_v21 = vmax.f32 %v605_v34, 0.0  ;;  %1647 = vst [vmem:[#allocation2 + $0x298] sm:$0xf] %v1615_v4  ;;  %v2060_v26 = vpack.c.bf16 %v2028_v14, %v2028_v14 }
 0x1e6   : > { %v9679_v50 = vsub.s32 %v9569_v17, %v847_v8  ;;  %v1264_v51 = vpack.c.bf16 %v1232_v9, %v1232_v9  ;;  %v784_v56 = vmul.f32 0.0625, %v752_v55  ;;  %v9685_v58 = vsel %vm1051_vm6, %v1037_v33, %v1038_v52  ;;  %1742 = vst [vmem:[#allocation2 + $0x278] sm:$0xf] %v1710_v43  ;;  %v5162_v37 = vld [vmem:[#allocation2 + $0x168] sm:$0xf]  ;;  %v609_v9 = vpop.f32.mrf.mxu0 }
 0x1e7   : > { %vm940_vm15 = vcmp.le.s32.totalorder %v9394_v49, 14  ;;  %vm11192_vm13 = vcmp.lt.s32.totalorder %v6892_v19, 7  ;;  %v1520_v27 = vsel %vm10869_vm3, %v9685_v58, 0.0  ;;  %vm913_vm3 = vcmp.ge.s32.totalorder %v6931_v11, 1  ;;  %1869 = vst [vmem:[#allocation2 + $0x258] sm:$0xf] %v1837_v29 }
 0x1e8   : > { %v1353_v17 = vsel %vm11192_vm13, %v1326_v28, %v1327_v46  ;;  %vm10870_vm9 = vcmp.ge.s32.totalorder %v9679_v50, 1  ;;  %vm1007_vm1 = vcmp.le.s32.totalorder %v9679_v50, 14  ;;  %1296 = vst [vmem:[#allocation2 + $0x2d4] sm:$0xf] %v1264_v51  ;;  %vm6355_vm2 = vcmp.lt.s32.totalorder %v784_v56, 0  ;;  %vm9705_vm4 = vmand %vm940_vm15, %vm972_vm14  ;;  %v6088_v28 = vld [vmem:[#allocation8 + $0x130] sm:$0xff] }
 0x1e9   : > { %v6356_v33 = vceil.f32 %v784_v56  ;;  %vm1104_vm13 = vmand %vm911_vm0, %vm10870_vm9  ;;  %v6357_v23 = vfloor.f32 %v784_v56  ;;  %v5167_v32 = vor.u32 %v5951_v63, %v5164_v6  ;;  %v1616_v12 = vpack.c.bf16 %v9660_v31, %v9660_v31  ;;  %3942 = vmatpush.bf16.msrb.mxu1 %v6088_v28  ;;  %1965 = vst [vmem:[#allocation2 + $0x25c] sm:$0xf] %v1933_v41  ;;  %v5172_v41 = vld [vmem:[#allocation2 + $0x194] sm:$0xf0]  ;;  %v5952_v56 = vld [vmem:[#allocation2 + $0x174] sm:$0xf] }
 0x1ea   : > { %v1136_v45 = vsel %vm1104_vm13, %v9593_v20, 0.0  ;;  %vm1393_vm14 = vmand %vm911_vm0, %vm1007_vm1  ;;  %v1679_v59 = vsel %vm1005_vm5, %v1353_v17, 0.0  ;;  %v1039_v1 = vrot.slane %v9676_v21, 7  ;;  %v1552_v13 = vpack.c.bf16 %v1520_v27, %v1520_v27  ;;  %2092 = vst [vmem:[#allocation2 + $0x23c] sm:$0xf] %v2060_v26 }
 0x1eb   : > { %v1168_v2 = vpack.c.bf16 %v1136_v45, %v1136_v45  ;;  %vm9728_vm13 = vmand %vm939_vm7, %vm1003_vm10  ;;  %v6358_v15 = vsel %vm6355_vm2, %v6356_v33, %v6357_v23  ;;  %v1425_v40 = vsel %vm1393_vm14, %v1353_v17, 0.0  ;;  %3707 = vmatmul.bf16.gmra.mxu2 %v5167_v32  ;;  %v1806_v24 = vsel %vm9705_vm4, %v9685_v58, 0.0  ;;  %1648 = vst [vmem:[#allocation2 + $0x2bc] sm:$0xf] %v1616_v12  ;;  %v11204_v45 = vld [vmem:[#allocation20_spill] sm:$0xff] }
 0x1ec   : > { %v9733_v0 = vcvt.f32.s32 %v6358_v15  ;;  %v1457_v48 = vpack.c.bf16 %v1425_v40, %v1425_v40  ;;  %v1063_v38 = vsel %vm1051_vm6, %v1038_v52, %v1039_v1  ;;  %vm11197_vm10 = vcmp.ge.s32.totalorder %v6944_v30, 1  ;;  %1584 = vst [vmem:[#allocation2 + $0x2b8] sm:$0xf] %v1552_v13  ;;  %v5208_v51 = vld [vmem:[#allocation2 + $0x1dc] sm:$0xf0] }
 0x1ed   : > { %vm1106_vm7 = vmand %vm913_vm3, %vm11197_vm10  ;;  %1200 = vst [vmem:[#allocation2 + $0x2d0] sm:$0xf] %v1168_v2  ;;  %v1711_v60 = vpack.c.bf16 %v1679_v59, %v1679_v59  ;;  %v1902_v57 = vsel %vm940_vm15, %v9660_v31, 0.0  ;;  %v2029_v18 = vsel %vm9728_vm13, %v1353_v17, 0.0  ;;  %v1328_v3 = vrot.slane %v9676_v21, 1 }
 0x1ee   : > { %v848_v5 = vmul.u32 16, %v9733_v0  ;;  %vm912_vm0 = vcmp.ge.s32.totalorder %v9733_v0, 1  ;;  %1489 = vst [vmem:[#allocation2 + $0x2d8] sm:$0xf] %v1457_v48  ;;  %v1838_v36 = vpack.c.bf16 %v1806_v24, %v1806_v24  ;;  %v1138_v34 = vsel %vm1106_vm7, %v1063_v38, 0.0 }
 0x1ef   : > { %v1233_v39 = vsel %vm912_vm0, %v9660_v31, 0.0  ;;  %v1934_v29 = vpack.c.bf16 %v1902_v57, %v1902_v57  ;;  %vm941_vm2 = vcmp.le.s32.totalorder %v9443_v16, 14  ;;  %1743 = vst [vmem:[#allocation2 + $0x29c] sm:$0xf] %v1711_v60  ;;  %v2061_v14 = vpack.c.bf16 %v2029_v18, %v2029_v18  ;;  %v5960_v48 = vld [vmem:[#allocation2 + $0x1b4] sm:$0xf] }
 0x1f0   : > { %v9758_v35 = vsub.s32 %v9654_v47, %v848_v5  ;;  %v1265_v4 = vpack.c.bf16 %v1233_v39, %v1233_v39  ;;  %v1234_v8 = vsel %vm913_vm3, %v9676_v21, 0.0  ;;  %v1521_v55 = vsel %vm10870_vm9, %v1063_v38, 0.0  ;;  %1870 = vst [vmem:[#allocation2 + $0x27c] sm:$0xf] %v1838_v36  ;;  %v5964_v36 = vld [vmem:[#allocation2 + $0x1d0] sm:$0xf0] }
 0x1f1   : > { %v5163_v52 = vor.u32 %v5955_v61, %v5162_v37  ;;  %v1170_v47 = vpack.c.bf16 %v1138_v34, %v1138_v34  ;;  %vm11198_vm13 = vcmp.lt.s32.totalorder %v6892_v19, 7  ;;  %vm11199_vm10 = vcmp.ge.s32.totalorder %v9494_v53, 1  ;;  %1966 = vst [vmem:[#allocation2 + $0x280] sm:$0xf] %v1934_v29  ;;  %v11213_v29 = vld [vmem:[#allocation23_spill] sm:$0xff]  ;;  %v11214_v16 = vld [vmem:[#allocation24_spill] sm:$0xff] }
 0x1f2   : > { %vm976_vm4 = vcmp.ge.s32.totalorder %v9758_v35, 1  ;;  %vm1008_vm14 = vcmp.le.s32.totalorder %v9758_v35, 14  ;;  %1297 = vst [vmem:[#allocation2 + $0x2f8] sm:$0xf] %v1265_v4  ;;  %v1352_v43 = vsel %vm11198_vm13, %v1327_v46, %v1328_v3  ;;  %vm9778_vm7 = vmand %vm941_vm2, %vm11199_vm10  ;;  %v5175_v31 = vor.u32 %v5952_v56, %v5172_v41  ;;  %v611_v41 = vpop.f32.mrf.mxu0  ;;  %v6087_v56 = vld [vmem:[#allocation8 + $0x128] sm:$0xff] }
 0x1f3   : > { %vm1105_vm9 = vmand %vm912_vm0, %vm976_vm4  ;;  %3618 = vmatmul.bf16.gmra.mxu1 %v5163_v52  ;;  %v607_v46 = vadd.f32 %v9035_v22, %v9697_v54  ;;  %v1266_v26 = vpack.c.bf16 %v1234_v8, %v1234_v8  ;;  %v1553_v17 = vpack.c.bf16 %v1521_v55, %v1521_v55  ;;  %v610_v27 = vadd.f32 %v9035_v22, %v609_v9  ;;  %v5198_v52 = vld [vmem:[#allocation2 + $0x1b0] sm:$0xf]  ;;  %v5961_v33 = vld [vmem:[#allocation2 + $0x1bc] sm:$0xf] }
 0x1f4   : > { %v1137_v6 = vsel %vm1105_vm9, %v9685_v58, 0.0  ;;  %vm1394_vm13 = vmand %vm912_vm0, %vm1008_vm14  ;;  %2093 = vst [vmem:[#allocation2 + $0x260] sm:$0xf] %v2061_v14  ;;  %v1680_v54 = vsel %vm1006_vm8, %v1352_v43, 0.0  ;;  %3885 = vmatmul.bf16.gmra.mxu0 %v5175_v31  ;;  %v1617_v22 = vpack.c.bf16 %v9676_v21, %v9676_v21  ;;  %v1807_v49 = vsel %vm9778_vm7, %v1063_v38, 0.0  ;;  %3943 = vmatpush.bf16.msrb.mxu1 %v6087_v56 }
 0x1f5   : > { %v1169_v63 = vpack.c.bf16 %v1137_v6, %v1137_v6  ;;  %vm9798_vm10 = vmand %vm940_vm15, %vm1004_vm11  ;;  %v1426_v58 = vsel %vm1394_vm13, %v1352_v43, 0.0  ;;  %v9804_v62 = vmax.f32 %v607_v46, 0.0  ;;  %1202 = vst [vmem:[#allocation2 + $0x318] sm:$0xf] %v1170_v47  ;;  %vm914_vm11 = vcmp.ge.s32.totalorder %v7006_v10, 1 }
 0x1f6   : > { %v1458_v28 = vpack.c.bf16 %v1426_v58, %v1426_v58  ;;  %v1903_v23 = vsel %vm941_vm2, %v9676_v21, 0.0  ;;  %vm11205_vm15 = vcmp.ge.s32.totalorder %v11204_v45, 1  ;;  %v9820_v59 = vmax.f32 %v610_v27, 0.0  ;;  %1298 = vst [vmem:[#allocation2 + $0x31c] sm:$0xf] %v1266_v26 }
 0x1f7   : > { %1201 = vst [vmem:[#allocation2 + $0x2f4] sm:$0xf] %v1169_v63  ;;  %v1040_v32 = vrot.slane %v9804_v62, 7  ;;  %vm1107_vm9 = vmand %vm914_vm11, %vm11205_vm15  ;;  %v1329_v12 = vrot.slane %v9804_v62, 1  ;;  %vm11206_vm0 = vcmp.le.s32.totalorder %v6944_v30, 14  ;;  %v1712_v20 = vpack.c.bf16 %v1680_v54, %v1680_v54 }
 0x1f8   : > { %vm9826_vm7 = vmand %vm913_vm3, %vm11206_vm0  ;;  %v2030_v15 = vsel %vm9798_vm10, %v1352_v43, 0.0  ;;  %1490 = vst [vmem:[#allocation2 + $0x2fc] sm:$0xf] %v1458_v28  ;;  %v1839_v40 = vpack.c.bf16 %v1807_v49, %v1807_v49  ;;  %vm11209_vm13 = vcmp.lt.s32.totalorder %v6892_v19, 7  ;;  %v1935_v24 = vpack.c.bf16 %v1903_v23, %v1903_v23  ;;  %v5236_v2 = vld [vmem:[#allocation2 + $0x21c] sm:$0xf0] }
 0x1f9   : > { %v1062_v13 = vsel %vm1051_vm6, %v1039_v1, %v1040_v32  ;;  %v1351_v11 = vsel %vm11209_vm13, %v1328_v3, %v1329_v12  ;;  %1585 = vst [vmem:[#allocation2 + $0x2dc] sm:$0xf] %v1553_v17  ;;  %v1235_v60 = vsel %vm914_vm11, %v9804_v62, 0.0  ;;  %v5203_v57 = vor.u32 %v5960_v48, %v5200_v44  ;;  %v6496_v17 = vld [vmem:[%s10780_s2] ss:$0 sm:$0xff] }
 0x1fa   : > { %v1139_v38 = vsel %vm1107_vm9, %v1062_v13, 0.0  ;;  %1649 = vst [vmem:[#allocation2 + $0x2e0] sm:$0xf] %v1617_v22  ;;  %v2062_v61 = vpack.c.bf16 %v2030_v15, %v2030_v15  ;;  %vm942_vm3 = vcmp.le.s32.totalorder %v9577_v42, 14  ;;  %v1427_v1 = vsel %vm9826_vm7, %v1351_v11, 0.0  ;;  %vm9858_vm9 = vmand %vm941_vm2, %vm1005_vm5 }
 0x1fb   : > { %v1041_v21 = vrot.slane %v9820_v59, 7  ;;  %1744 = vst [vmem:[#allocation2 + $0x2c0] sm:$0xf] %v1712_v20  ;;  %v1171_v5 = vpack.c.bf16 %v1139_v38, %v1139_v38  ;;  %v1522_v18 = vsel %vm976_vm4, %v1062_v13, 0.0  ;;  %vm11210_vm10 = vcmp.ge.s32.totalorder %v9601_v7, 1  ;;  %3712 = vmatmul.bf16.gmra.mxu2 %v5203_v57  ;;  %v11227_v7 = vld [vmem:[#allocation22_spill] sm:$0xff] }
 0x1fc   : > { %vm1776_vm15 = vmand %vm942_vm3, %vm11210_vm10  ;;  %1871 = vst [vmem:[#allocation2 + $0x2a0] sm:$0xf] %v1839_v40  ;;  %v1267_v3 = vpack.c.bf16 %v1235_v60, %v1235_v60  ;;  %v1330_v39 = vrot.slane %v9820_v59, 1  ;;  %v1459_v37 = vpack.c.bf16 %v1427_v1, %v1427_v1  ;;  %v1681_v4 = vsel %vm1007_vm1, %v1351_v11, 0.0  ;;  %v11229_v38 = vld [vmem:[#allocation19_spill] sm:$0xff]  ;;  %v11231_v60 = vld [vmem:[#allocation16_spill] sm:$0xff] }
 0x1fd   : > { %1967 = vst [vmem:[#allocation2 + $0x2a4] sm:$0xf] %v1935_v24  ;;  %vm915_vm0 = vcmp.ge.s32.totalorder %v11213_v29, 1  ;;  %v1554_v14 = vpack.c.bf16 %v1522_v18, %v1522_v18  ;;  %v1808_v8 = vsel %vm1776_vm15, %v1062_v13, 0.0  ;;  %v1061_v53 = vsel %vm1051_vm6, %v1040_v32, %v1041_v21  ;;  %v11226_v13 = vld [vmem:[#allocation18_spill] sm:$0xff] }
 0x1fe   : > { %2094 = vst [vmem:[#allocation2 + $0x284] sm:$0xf] %v2062_v61  ;;  %vm11215_vm5 = vcmp.ge.s32.totalorder %v11214_v16, 1  ;;  %v1618_v9 = vpack.c.bf16 %v9804_v62, %v9804_v62  ;;  %v1904_v47 = vsel %vm942_vm3, %v9804_v62, 0.0  ;;  %v5199_v43 = vor.u32 %v5964_v36, %v5198_v52  ;;  %v5272_v35 = vld [vmem:[#allocation2 + $0x264] sm:$0xf0] }
 0x1ff   : > { %vm9873_vm2 = vmand %vm915_vm0, %vm11215_vm5  ;;  %1203 = vst [vmem:[#allocation2 + $0x33c] sm:$0xf] %v1171_v5  ;;  %vm11218_vm7 = vcmp.le.s32.totalorder %v11204_v45, 14  ;;  %v1713_v46 = vpack.c.bf16 %v1681_v4, %v1681_v4  ;;  %v2031_v6 = vsel %vm9858_vm9, %v1351_v11, 0.0  ;;  %vm11221_vm10 = vcmp.lt.s32.totalorder %v6892_v19, 7 }
 0x200   : > { %1299 = vst [vmem:[#allocation2 + $0x340] sm:$0xf] %v1267_v3  ;;  %vm9886_vm13 = vmand %vm914_vm11, %vm11218_vm7  ;;  %v1350_v26 = vsel %vm11221_vm10, %v1329_v12, %v1330_v39  ;;  %v612_v27 = vadd.f32 %v6496_v17, %v611_v41  ;;  %v1840_v10 = vpack.c.bf16 %v1808_v8, %v1808_v8  ;;  %v1140_v63 = vsel %vm9873_vm2, %v1061_v53, 0.0  ;;  %v5969_v3 = vld [vmem:[#allocation2 + $0x1fc] sm:$0xf] }
 0x201   : > { %1491 = vst [vmem:[#allocation2 + $0x320] sm:$0xf] %v1459_v37  ;;  %v1936_v58 = vpack.c.bf16 %v1904_v47, %v1904_v47  ;;  %v1236_v54 = vsel %vm915_vm0, %v9820_v59, 0.0  ;;  %v5211_v62 = vor.u32 %v5961_v33, %v5208_v51  ;;  %v2063_v22 = vpack.c.bf16 %v2031_v6, %v2031_v6  ;;  %vm9920_vm2 = vmand %vm942_vm3, %vm1006_vm8  ;;  %v5973_v51 = vld [vmem:[#allocation2 + $0x218] sm:$0xf0] }
 0x202   : > { %1586 = vst [vmem:[#allocation2 + $0x300] sm:$0xf] %v1554_v14  ;;  %v9904_v28 = vmax.f32 %v612_v27, 0.0  ;;  %vm943_vm11 = vcmp.le.s32.totalorder %v9658_v25, 14  ;;  %v1428_v49 = vsel %vm9886_vm13, %v1350_v26, 0.0  ;;  %v1172_v44 = vpack.c.bf16 %v1140_v63, %v1140_v63 }
 0x203   : > { %3623 = vmatmul.bf16.gmra.mxu1 %v5199_v43  ;;  %1650 = vst [vmem:[#allocation2 + $0x304] sm:$0xf] %v1618_v9  ;;  %vm11222_vm15 = vcmp.ge.s32.totalorder %v6944_v30, 1  ;;  %vm11223_vm9 = vcmp.ge.s32.totalorder %v9679_v50, 1  ;;  %v1268_v12 = vpack.c.bf16 %v1236_v54, %v1236_v54  ;;  %v1460_v15 = vpack.c.bf16 %v1428_v49, %v1428_v49  ;;  %v9994_v27 = vld [vmem:[%s10782_s4] ss:$0 sm:$0xff] }
 0x204   : > { %1745 = vst [vmem:[#allocation2 + $0x2e4] sm:$0xf] %v1713_v46  ;;  %v1523_v23 = vsel %vm11222_vm15, %v1061_v53, 0.0  ;;  %vm1777_vm5 = vmand %vm943_vm11, %vm11223_vm9  ;;  %3890 = vmatmul.bf16.gmra.mxu0 %v5211_v62  ;;  %v1042_v32 = vrot.slane %v9904_v28, 7  ;;  %v1682_v40 = vsel %vm1008_vm14, %v1350_v26, 0.0  ;;  %vm916_vm7 = vcmp.ge.s32.totalorder %v11226_v13, 1 }
 0x205   : > { %1872 = vst [vmem:[#allocation2 + $0x2c4] sm:$0xf] %v1840_v10  ;;  %v1331_v11 = vrot.slane %v9904_v28, 1  ;;  %v1555_v48 = vpack.c.bf16 %v1523_v23, %v1523_v23  ;;  %v1809_v24 = vsel %vm1777_vm5, %v1061_v53, 0.0  ;;  %vm11228_vm8 = vcmp.ge.s32.totalorder %v11227_v7, 1 }
 0x206   : > { %1968 = vst [vmem:[#allocation2 + $0x2c8] sm:$0xf] %v1936_v58  ;;  %v9932_v42 = vsel %vm1051_vm6, %v1041_v21, %v1042_v32  ;;  %vm1109_vm3 = vmand %vm916_vm7, %vm11228_vm8  ;;  %vm11230_vm13 = vcmp.ge.s32.totalorder %v11229_v38, 1  ;;  %vm11232_vm10 = vcmp.ge.s32.totalorder %v11231_v60, 1  ;;  %v1619_v61 = vpack.c.bf16 %v9820_v59, %v9820_v59  ;;  %v11235_v21 = vld [vmem:[#allocation21_spill] sm:$0xff] }
 0x207   : > { %2095 = vst [vmem:[#allocation2 + $0x2a8] sm:$0xf] %v2063_v22  ;;  %vm9942_vm15 = vmand %vm11232_vm10, %vm11230_vm13  ;;  %v1905_v1 = vsel %vm943_vm11, %v9820_v59, 0.0  ;;  %v11236_v5 = vrot.slane %v11235_v21, 7  ;;  %v1714_v36 = vpack.c.bf16 %v1682_v40, %v1682_v40  ;;  %v2032_v34 = vsel %vm9920_vm2, %v1350_v26, 0.0  ;;  %v6086_v59 = vld [vmem:[#allocation8 + $0x120] sm:$0xff] }
 0x208   : > { %1204 = vst [vmem:[#allocation2 + $0x360] sm:$0xf] %v1172_v44  ;;  %v5239_v37 = vor.u32 %v5969_v3, %v5236_v2  ;;  %vm11237_vm9 = vcmp.le.s32.totalorder %v11214_v16, 14  ;;  %v1841_v41 = vpack.c.bf16 %v1809_v24, %v1809_v24  ;;  %v1141_v14 = vsel %vm1109_vm3, %v9932_v42, 0.0  ;;  %3944 = vmatpush.bf16.msrb.mxu1 %v6086_v59  ;;  %v5244_v46 = vld [vmem:[#allocation2 + $0x224] sm:$0xf0] }
 0x209   : > { %v9955_v18 = vsel %vm1051_vm6, %v1042_v32, %v11236_v5  ;;  %1300 = vst [vmem:[#allocation2 + $0x364] sm:$0xf] %v1268_v12  ;;  %vm9963_vm5 = vmand %vm915_vm0, %vm11237_vm9  ;;  %vm11240_vm6 = vcmp.lt.s32.totalorder %v6892_v19, 7  ;;  %v1937_v53 = vpack.c.bf16 %v1905_v1, %v1905_v1  ;;  %v11241_v29 = vrot.slane %v11235_v21, 1  ;;  %v5234_v19 = vld [vmem:[#allocation2 + $0x1f8] sm:$0xf] }
 0x20a   : > { %1492 = vst [vmem:[#allocation2 + $0x344] sm:$0xf] %v1460_v15  ;;  %v1349_v8 = vsel %vm11240_vm6, %v1330_v39, %v1331_v11  ;;  %v1142_v55 = vsel %vm9942_vm15, %v9955_v18, 0.0  ;;  %vm11242_vm0 = vmmov %vm11240_vm6  ;;  %vm11243_vm2 = vcmp.le.s32.totalorder %v11227_v7, 14  ;;  %v2064_v39 = vpack.c.bf16 %v2032_v34, %v2032_v34  ;;  %v5970_v62 = vld [vmem:[#allocation2 + $0x204] sm:$0xf] }
 0x20b   : > { %1587 = vst [vmem:[#allocation2 + $0x324] sm:$0xf] %v1555_v48  ;;  %v1348_v52 = vsel %vm11242_vm0, %v1331_v11, %v11241_v29  ;;  %vm1398_vm8 = vmand %vm916_vm7, %vm11243_vm2  ;;  %3717 = vmatmul.bf16.gmra.mxu2 %v5239_v37  ;;  %v1237_v9 = vsel %vm916_vm7, %v9904_v28, 0.0  ;;  %v1173_v47 = vpack.c.bf16 %v1141_v14, %v1141_v14  ;;  %v1429_v43 = vsel %vm9963_vm5, %v1349_v8, 0.0  ;;  %v3594_v6 = vpop.f32.mrf.mxu1  ;;  %v6097_v3 = vld [vmem:[#allocation8 + $0x178] sm:$0xff] }
 0x20c   : > { %1651 = vst [vmem:[#allocation2 + $0x328] sm:$0xf] %v1619_v61  ;;  %v1174_v56 = vpack.c.bf16 %v1142_v55, %v1142_v55  ;;  %v1430_v31 = vsel %vm1398_vm8, %v1348_v52, 0.0  ;;  %v1269_v26 = vpack.c.bf16 %v1237_v9, %v1237_v9  ;;  %vm11244_vm3 = vcmp.ge.s32.totalorder %v11204_v45, 1  ;;  %v9996_v10 = vpop.f32.mrf.mxu0  ;;  %vm10013_vm9 = vmand %vm943_vm11, %vm1007_vm1  ;;  %4030 = vmatpush.bf16.msrb.mxu2 %v6097_v3  ;;  %v5270_v34 = vld [vmem:[#allocation2 + $0x240] sm:$0xf] }
 0x20d   : > { %1746 = vst [vmem:[#allocation2 + $0x308] sm:$0xf] %v1714_v36  ;;  %v1524_v17 = vsel %vm11244_vm3, %v9932_v42, 0.0  ;;  %vm944_vm7 = vcmp.le.s32.totalorder %v9733_v0, 14  ;;  %v1461_v63 = vpack.c.bf16 %v1429_v43, %v1429_v43  ;;  %vm11245_vm13 = vcmp.ge.s32.totalorder %v11214_v16, 1  ;;  %v6085_v59 = vld [vmem:[#allocation8 + $0x118] sm:$0xff] }
 0x20e   : > { %1873 = vst [vmem:[#allocation2 + $0x2e8] sm:$0xf] %v1841_v41  ;;  %v1525_v33 = vsel %vm11245_vm13, %v9955_v18, 0.0  ;;  %v5235_v58 = vor.u32 %v5973_v51, %v5234_v19  ;;  %v1462_v54 = vpack.c.bf16 %v1430_v31, %v1430_v31  ;;  %vm1778_vm10 = vmand %vm944_vm7, %vm976_vm4  ;;  %v3595_v22 = vadd.f32 %v9994_v27, %v3594_v6  ;;  %v5982_v36 = vld [vmem:[#allocation2 + $0x260] sm:$0xf0]  ;;  %3945 = vmatpush.bf16.msrb.mxu1 %v6085_v59  ;;  %v6095_v43 = vld [vmem:[#allocation8 + $0x168] sm:$0xff] }
 0x20f   : > { %1969 = vst [vmem:[#allocation2 + $0x2ec] sm:$0xf] %v1937_v53  ;;  %v1556_v49 = vpack.c.bf16 %v1524_v17, %v1524_v17  ;;  %vm11246_vm15 = vcmp.le.s32.totalorder %v6944_v30, 14  ;;  %v5247_v23 = vor.u32 %v5970_v62, %v5244_v46  ;;  %v1557_v32 = vpack.c.bf16 %v1525_v33, %v1525_v33  ;;  %vm2002_vm5 = vmand %vm944_vm7, %vm1008_vm14  ;;  %v5414_v38 = vld [vmem:[#allocation2 + $0x360] sm:$0xf] }
 0x210   : > { %2096 = vst [vmem:[#allocation2 + $0x2cc] sm:$0xf] %v2064_v39  ;;  %v1683_v44 = vsel %vm11246_vm15, %v1349_v8, 0.0  ;;  %vm11249_vm4 = vcmp.le.s32.totalorder %v11204_v45, 14  ;;  %v1620_v30 = vpack.c.bf16 %v9904_v28, %v9904_v28  ;;  %v1810_v2 = vsel %vm1778_vm10, %v9932_v42, 0.0  ;;  %v6094_v6 = vld [vmem:[#allocation8 + $0x160] sm:$0xff] }
 0x211   : > { %1205 = vst [vmem:[#allocation2 + $0x384] sm:$0xf] %v1173_v47  ;;  %v1684_v12 = vsel %vm11249_vm4, %v1348_v52, 0.0  ;;  %v3683_v25 = vpop.f32.mrf.mxu2  ;;  %v1715_v50 = vpack.c.bf16 %v1683_v44, %v1683_v44  ;;  %v1811_v45 = vsel %vm6971_vm12, %v9955_v18, 0.0  ;;  %v1906_v13 = vsel %vm944_vm7, %v9904_v28, 0.0  ;;  %v6092_v44 = vld [vmem:[#allocation8 + $0x150] sm:$0xff] }
 0x212   : > { %1206 = vst [vmem:[#allocation2 + $0x3a8] sm:$0xf] %v1174_v56  ;;  %v10029_v15 = vadd.f32 %v3683_v25, %v3595_v22  ;;  %v1716_v40 = vpack.c.bf16 %v1684_v12, %v1684_v12  ;;  %v1842_v11 = vpack.c.bf16 %v1810_v2, %v1810_v2  ;;  %v2033_v48 = vsel %vm10013_vm9, %v1349_v8, 0.0  ;;  %v5978_v42 = vld [vmem:[#allocation2 + $0x244] sm:$0xf]  ;;  %v6091_v25 = vld [vmem:[#allocation8 + $0x148] sm:$0xff] }
 0x213   : > { %3628 = vmatmul.bf16.gmra.mxu1 %v5235_v58  ;;  %1301 = vst [vmem:[#allocation2 + $0x388] sm:$0xf] %v1269_v26  ;;  %v2034_v24 = vsel %vm2002_vm5, %v1348_v52, 0.0  ;;  %v1843_v7 = vpack.c.bf16 %v1811_v45, %v1811_v45  ;;  %v10036_v57 = vpop.f32.mrf.mxu1  ;;  %v1938_v1 = vpack.c.bf16 %v1906_v13, %v1906_v13  ;;  %v5275_v28 = vor.u32 %v5978_v42, %v5272_v35  ;;  %v5280_v37 = vld [vmem:[#allocation2 + $0x26c] sm:$0xf0] }
 0x214   : > { %1493 = vst [vmem:[#allocation2 + $0x368] sm:$0xf] %v1461_v63  ;;  %3895 = vmatmul.bf16.gmra.mxu0 %v5247_v23  ;;  %v10038_v61 = vpop.f32.mrf.mxu0  ;;  %v2065_v21 = vpack.c.bf16 %v2033_v48, %v2033_v48  ;;  %v2066_v5 = vpack.c.bf16 %v2034_v24, %v2034_v24  ;;  %v5271_v4 = vor.u32 %v5982_v36, %v5270_v34  ;;  %v5979_v41 = vld [vmem:[#allocation2 + $0x24c] sm:$0xf]  ;;  %v6096_v52 = vld [vmem:[#allocation8 + $0x170] sm:$0xff]  ;;  %v6093_v63 = vld [vmem:[#allocation8 + $0x158] sm:$0xff] }
 0x215   : > { %1494 = vst [vmem:[#allocation2 + $0x38c] sm:$0xf] %v1462_v54  ;;  %v5283_v14 = vor.u32 %v5979_v41, %v5280_v37  ;;  %v5308_v47 = vld [vmem:[#allocation2 + $0x2ac] sm:$0xf0]  ;;  %4031 = vmatpush.bf16.msrb.mxu2 %v6096_v52  ;;  %v6027_v19 = vld [vmem:[#allocation2 + $0x3c8] sm:$0xf0] }
 0x216   : > { %1588 = vst [vmem:[#allocation2 + $0x348] sm:$0xf] %v1556_v49  ;;  %v5987_v51 = vld [vmem:[#allocation2 + $0x28c] sm:$0xf]  ;;  %v5306_v33 = vld [vmem:[#allocation2 + $0x288] sm:$0xf] }
 0x217   : > { %1589 = vst [vmem:[#allocation2 + $0x36c] sm:$0xf] %v1557_v32  ;;  %v5311_v31 = vor.u32 %v5987_v51, %v5308_v47  ;;  %v5991_v17 = vld [vmem:[#allocation2 + $0x2a8] sm:$0xf0]  ;;  %v5316_v58 = vld [vmem:[#allocation2 + $0x2b4] sm:$0xf0] }
 0x218   : > { %1652 = vst [vmem:[#allocation2 + $0x34c] sm:$0xf] %v1620_v30  ;;  %v6018_v60 = vld [vmem:[#allocation2 + $0x380] sm:$0xf0]  ;;  %v5307_v54 = vor.u32 %v5991_v17, %v5306_v33  ;;  %v5988_v62 = vld [vmem:[#allocation2 + $0x294] sm:$0xf] }
 0x219   : > { %1747 = vst [vmem:[#allocation2 + $0x32c] sm:$0xf] %v1715_v50  ;;  %v5415_v0 = vor.u32 %v6018_v60, %v5414_v38  ;;  %v10040_v18 = vpop.f32.mrf.mxu2  ;;  %v5450_v9 = vld [vmem:[#allocation2 + $0x3a8] sm:$0xf]  ;;  %4032 = vmatpush.bf16.msrb.mxu2 %v6095_v43  ;;  %v5319_v49 = vor.u32 %v5988_v62, %v5316_v58  ;;  %v6084_v23 = vld [vmem:[#allocation8 + $0x110] sm:$0xff]  ;;  %v6090_v48 = vld [vmem:[#allocation8 + $0x140] sm:$0xff] }
 0x21a   : > { %1748 = vst [vmem:[#allocation2 + $0x350] sm:$0xf] %v1716_v40  ;;  %v5451_v56 = vor.u32 %v6027_v19, %v5450_v9  ;;  %v5486_v16 = vld [vmem:[#allocation2 + $0x3f0] sm:$0xf]  ;;  %v6036_v32 = vld [vmem:[#allocation2 + $0x410] sm:$0xf0]  ;;  %3946 = vmatpush.bf16.msrb.mxu1 %v6084_v23 }
 0x21b   : > { %1874 = vst [vmem:[#allocation2 + $0x30c] sm:$0xf] %v1842_v11  ;;  %3653 = vmatmul.bf16.vlgmr.msrb.gmra.mxu3 %v5415_v0  ;;  %3722 = vmatmul.bf16.gmra.mxu2 %v5275_v28  ;;  %v5344_v30 = vld [vmem:[#allocation2 + $0x2f4] sm:$0xf0]  ;;  %v6083_v50 = vld [vmem:[#allocation8 + $0x108] sm:$0xff]  ;;  %v5487_v40 = vor.u32 %v6036_v32, %v5486_v16  ;;  %v6082_v38 = vld [vmem:[#allocation8 + $0x100] sm:$0xff] }
 0x21c   : > { %1875 = vst [vmem:[#allocation2 + $0x330] sm:$0xf] %v1843_v7  ;;  %v5996_v45 = vld [vmem:[#allocation2 + $0x2d4] sm:$0xf]  ;;  %v6073_v11 = vld [vmem:[#allocation8 + $0xb8] sm:$0xff]  ;;  %v6071_v9 = vld [vmem:[#allocation8 + $0xa8] sm:$0xff] }
 0x21d   : > { %1970 = vst [vmem:[#allocation2 + $0x310] sm:$0xf] %v1938_v1  ;;  %4033 = vmatpush.bf16.msrb.mxu2 %v6094_v6  ;;  %v5347_v13 = vor.u32 %v5996_v45, %v5344_v30  ;;  %v6000_v42 = vld [vmem:[#allocation2 + $0x2f0] sm:$0xf0]  ;;  %3763 = vmatpush.bf16.msrb.mxu3 %v6073_v11  ;;  %v5342_v60 = vld [vmem:[#allocation2 + $0x2d0] sm:$0xf] }
 0x21e   : > { %2097 = vst [vmem:[#allocation2 + $0x2f0] sm:$0xf] %v2065_v21  ;;  %3947 = vmatpush.bf16.msrb.mxu1 %v6083_v50  ;;  %v5352_v1 = vld [vmem:[#allocation2 + $0x2fc] sm:$0xf0]  ;;  %v5343_v0 = vor.u32 %v6000_v42, %v5342_v60  ;;  %v5997_v21 = vld [vmem:[#allocation2 + $0x2dc] sm:$0xf] }
 0x21f   : > { %2098 = vst [vmem:[#allocation2 + $0x314] sm:$0xf] %v2066_v5  ;;  %v5355_v5 = vor.u32 %v5997_v21, %v5352_v1  ;;  %v6072_v36 = vld [vmem:[#allocation8 + $0xb0] sm:$0xff]  ;;  %v5522_v34 = vld [vmem:[#allocation2 + $0x438] sm:$0xf]  ;;  %v6070_v58 = vld [vmem:[#allocation8 + $0xa0] sm:$0xff] }
 0x220   : > { %v6045_v37 = vld [vmem:[#allocation2 + $0x458] sm:$0xf0]  ;;  %v5380_v41 = vld [vmem:[#allocation2 + $0x33c] sm:$0xf0]  ;;  %v5378_v51 = vld [vmem:[#allocation2 + $0x318] sm:$0xf] }
 0x221   : > { %v3599_v8 = vpop.f32.mrf.mxu1  ;;  %v10042_v53 = vpop.f32.mrf.mxu0  ;;  %4034 = vmatpush.bf16.msrb.mxu2 %v6093_v63  ;;  %3764 = vmatpush.bf16.msrb.mxu3 %v6072_v36  ;;  %v6009_v43 = vld [vmem:[#allocation2 + $0x338] sm:$0xf0]  ;;  %v6006_v6 = vld [vmem:[#allocation2 + $0x324] sm:$0xf]  ;;  %v5000_v62 = vld [vmem:[#allocation2 + $0x34] sm:$0xf0] }
 0x222   : > { %v3600_v55 = vadd.f32 %v9994_v27, %v3599_v8  ;;  %v3688_v29 = vpop.f32.mrf.mxu2  ;;  %3948 = vmatpush.bf16.msrb.mxu1 %v6082_v38  ;;  %v6005_v8 = vld [vmem:[#allocation2 + $0x31c] sm:$0xf]  ;;  %v5908_v23 = vld [vmem:[#allocation2 + $0x14] sm:$0xf]  ;;  %v5424_v11 = vld [vmem:[#allocation2 + $0x38c] sm:$0xf0] }
 0x223   : > { %3633 = vmatmul.bf16.gmra.mxu1 %v5271_v4  ;;  %v5003_v32 = vor.u32 %v5908_v23, %v5000_v62  ;;  %v6069_v30 = vld [vmem:[#allocation8 + $0x98] sm:$0xff]  ;;  %v6068_v38 = vld [vmem:[#allocation8 + $0x90] sm:$0xff]  ;;  %v6066_v62 = vld [vmem:[#allocation8 + $0x80] sm:$0xff] }
 0x224   : > { %3900 = vmatmul.bf16.gmra.mxu0 %v5283_v14  ;;  %v10045_v39 = vadd.f32 %v3688_v29, %v3600_v55  ;;  %v5523_v55 = vor.u32 %v6045_v37, %v5522_v34  ;;  %v5383_v29 = vor.u32 %v6005_v8, %v5380_v41  ;;  %v6113_v42 = vld [vmem:[#allocation8 + $0x1f8] sm:$0xff]  ;;  %v5452_v21 = vld [vmem:[#allocation2 + $0x3cc] sm:$0xf0]  ;;  %v6111_v8 = vld [vmem:[#allocation8 + $0x1e8] sm:$0xff] }
 0x225   : > { %4035 = vmatpush.bf16.msrb.mxu2 %v6092_v44  ;;  %3765 = vmatpush.bf16.msrb.mxu3 %v6071_v9  ;;  %v6014_v44 = vld [vmem:[#allocation2 + $0x364] sm:$0xf]  ;;  %v5917_v34 = vld [vmem:[#allocation2 + $0x5c] sm:$0xf]  ;;  %v6112_v41 = vld [vmem:[#allocation8 + $0x1f0] sm:$0xff] }
 0x226   : > { %4208 = vmatpush.bf16.msra.mxu0 %v6113_v42  ;;  %v6024_v9 = vld [vmem:[#allocation2 + $0x3b4] sm:$0xf]  ;;  %v5930_v42 = vld [vmem:[#allocation2 + $0xc0] sm:$0xf0] }
 0x227   : > { %v6032_v23 = vld [vmem:[#allocation2 + $0x3f4] sm:$0xf] }
 0x229   : > { %v10047_v46 = vpop.f32.mrf.mxu1  ;;  %v10049_v26 = vpop.f32.mrf.mxu0  ;;  %4036 = vmatpush.bf16.msrb.mxu2 %v6091_v25  ;;  %3766 = vmatpush.bf16.msrb.mxu3 %v6070_v58 }
 0x22a   : > { %v10051_v22 = vpop.f32.mrf.mxu2  ;;  %4209 = vmatpush.bf16.msra.mxu0 %v6112_v41 }
 0x22b   : > { %3658 = vmatmul.bf16.gmra.mxu3 %v5451_v56  ;;  %3727 = vmatmul.bf16.gmra.mxu2 %v5311_v31  ;;  %v5388_v56 = vld [vmem:[#allocation2 + $0x344] sm:$0xf0]  ;;  %v5379_v31 = vor.u32 %v6009_v43, %v5378_v51  ;;  %v5460_v43 = vld [vmem:[#allocation2 + $0x3d4] sm:$0xf0] }
 0x22c   : > { %v5391_v17 = vor.u32 %v6006_v6, %v5388_v56  ;;  %v5034_v51 = vld [vmem:[#allocation2 + $0x58] sm:$0xf] }
 0x22d   : > { %4037 = vmatpush.bf16.msrb.mxu2 %v6090_v48  ;;  %3767 = vmatpush.bf16.msrb.mxu3 %v6069_v30 }
 0x22e   : > { %4210 = vmatpush.bf16.msra.mxu0 %v6111_v8 }
 0x231   : > { %3768 = vmatpush.bf16.msrb.mxu3 %v6068_v38  ;;  %v6107_v38 = vld [vmem:[#allocation8 + $0x1c8] sm:$0xff] }
 0x233   : > { %3638 = vmatmul.bf16.gmra.mxu1 %v5307_v54  ;;  %v5416_v54 = vld [vmem:[#allocation2 + $0x384] sm:$0xf0] }
 0x234   : > { %3905 = vmatmul.bf16.gmra.mxu0 %v5319_v49  ;;  %v5419_v16 = vor.u32 %v6014_v44, %v5416_v54  ;;  %v5463_v54 = vor.u32 %v6024_v9, %v5460_v43  ;;  %v6109_v44 = vld [vmem:[#allocation8 + $0x1d8] sm:$0xff] }
 0x235   : > { %v3604_v12 = vpop.f32.mrf.mxu1  ;;  %v6041_v43 = vld [vmem:[#allocation2 + $0x43c] sm:$0xf] }
 0x236   : > { %v10053_v2 = vpop.f32.mrf.mxu0  ;;  %v3605_v20 = vadd.f32 %v9994_v27, %v3604_v12 }
 0x237   : > { %11251 = vst [vmem:[#allocation20_spill] sm:$0xff] %v10053_v2 }
 0x23b   : > { %3663 = vmatmul.bf16.gmra.mxu3 %v5487_v40  ;;  %3732 = vmatmul.bf16.gmra.mxu2 %v5347_v13  ;;  %v3693_v35 = vpop.f32.mrf.mxu2  ;;  %v6015_v40 = vld [vmem:[#allocation2 + $0x36c] sm:$0xf]  ;;  %v4998_v13 = vld [vmem:[#allocation2 + $0x10] sm:$0xf] }
 0x23c   : > { %v10056_v24 = vadd.f32 %v3693_v35, %v3605_v20  ;;  %v5912_v20 = vld [vmem:[#allocation2 + $0x30] sm:$0xf0]  ;;  %v5427_v48 = vor.u32 %v6015_v40, %v5424_v11 }
 0x23d   : > { %v10058_v7 = vpop.f32.mrf.mxu1  ;;  %v4999_v35 = vor.u32 %v5912_v20, %v4998_v13  ;;  %v6108_v13 = vld [vmem:[#allocation8 + $0x1d0] sm:$0xff] }
 0x23e   : > { %v10060_v28 = vpop.f32.mrf.mxu0 }
 0x23f   : > { %11252 = vst [vmem:[#allocation23_spill] sm:$0xff] %v10060_v28  ;;  %v5983_v28 = vld [vmem:[#allocation2 + $0x268] sm:$0xf0] }
 0x243   : > { %3643 = vmatmul.bf16.gmra.mxu1 %v5343_v0  ;;  %v10062_v3 = vpop.f32.mrf.mxu2  ;;  %v6023_v0 = vld [vmem:[#allocation2 + $0x3ac] sm:$0xf] }
 0x244   : > { %3910 = vmatmul.bf16.gmra.mxu0 %v5355_v5  ;;  %v5036_v5 = vld [vmem:[#allocation2 + $0x7c] sm:$0xf0]  ;;  %v5455_v37 = vor.u32 %v6023_v0, %v5452_v21 }
 0x245   : > { %v3609_v4 = vpop.f32.mrf.mxu1 }
 0x246   : > { %v3610_v14 = vadd.f32 %v9994_v27, %v3609_v4  ;;  %v5039_v4 = vor.u32 %v5917_v34, %v5036_v5  ;;  %v6033_v5 = vld [vmem:[#allocation2 + $0x3fc] sm:$0xf]  ;;  %v5496_v34 = vld [vmem:[#allocation2 + $0x41c] sm:$0xf0] }
 0x249   : > { %v10065_v52 = vpop.f32.mrf.mxu0 }
 0x24a   : > { %11253 = vst [vmem:[#allocation24_spill] sm:$0xff] %v10065_v52 }
 0x24b   : > { %3668 = vmatmul.bf16.gmra.mxu3 %v5523_v55  ;;  %3737 = vmatmul.bf16.gmra.mxu2 %v5383_v29  ;;  %v3698_v59 = vpop.f32.mrf.mxu2  ;;  %v5921_v29 = vld [vmem:[#allocation2 + $0x78] sm:$0xf0] }
 0x24c   : > { %v10067_v47 = vadd.f32 %v3698_v59, %v3610_v14  ;;  %v6067_v14 = vld [vmem:[#allocation8 + $0x88] sm:$0xff] }
 0x24d   : > { %v10069_v19 = vpop.f32.mrf.mxu1  ;;  %3769 = vmatpush.bf16.msrb.mxu3 %v6067_v14  ;;  %v6106_v14 = vld [vmem:[#allocation8 + $0x1c0] sm:$0xff] }
 0x251   : > { %v10071_v63 = vpop.f32.mrf.mxu0  ;;  %3770 = vmatpush.bf16.msrb.mxu3 %v6066_v62 }
 0x252   : > { %11254 = vst [vmem:[#allocation18_spill] sm:$0xff] %v10071_v63 }
 0x253   : > { %3648 = vmatmul.bf16.gmra.mxu1 %v5379_v31  ;;  %v10073_v33 = vpop.f32.mrf.mxu2  ;;  %v5035_v31 = vor.u32 %v5921_v29, %v5034_v51  ;;  %v6121_v29 = vld [vmem:[#allocation8 + $0x238] sm:$0xff]  ;;  %v5524_v51 = vld [vmem:[#allocation2 + $0x45c] sm:$0xf0] }
 0x254   : > { %3915 = vmatmul.bf16.gmra.mxu0 %v5391_v17  ;;  %v6110_v17 = vld [vmem:[#allocation8 + $0x1e0] sm:$0xff]  ;;  %4297 = vmatpush.bf16.msra.mxu1 %v6121_v29  ;;  %v5527_v62 = vor.u32 %v6041_v43, %v5524_v51  ;;  %v5948_v43 = vld [vmem:[#allocation2 + $0x150] sm:$0xf0] }
 0x255   : > { %4211 = vmatpush.bf16.msra.mxu0 %v6110_v17 }
 0x258   : > { %v3614_v49 = vpop.f32.mrf.mxu1 }
 0x259   : > { %v3615_v12 = vadd.f32 %v9994_v27, %v3614_v49  ;;  %4212 = vmatpush.bf16.msra.mxu0 %v6109_v44 }
 0x25b   : > { %3742 = vmatmul.bf16.vlgmr.msra.gmra.mxu3 %v5419_v16  ;;  %4038 = vmatmul.bf16.vlgmr.msrb.gmra.mxu2 %v5003_v32  ;;  %v5488_v16 = vld [vmem:[#allocation2 + $0x414] sm:$0xf0]  ;;  %v5072_v32 = vld [vmem:[#allocation2 + $0xc4] sm:$0xf0] }
 0x25c   : > { %v5491_v20 = vor.u32 %v6032_v23, %v5488_v16  ;;  %v5939_v23 = vld [vmem:[#allocation2 + $0x108] sm:$0xf0] }
 0x25d   : > { %4213 = vmatpush.bf16.msra.mxu0 %v6108_v13 }
 0x25e   : > { %v10076_v25 = vpop.f32.mrf.mxu0  ;;  %v3703_v50 = vpop.f32.mrf.mxu2 }
 0x25f   : > { %11255 = vst [vmem:[#allocation22_spill] sm:$0xff] %v10076_v25  ;;  %v10078_v45 = vadd.f32 %v3703_v50, %v3615_v12  ;;  %v5926_v50 = vld [vmem:[#allocation2 + $0xa4] sm:$0xf] }
 0x260   : > { %v10080_v60 = vpop.f32.mrf.mxu1  ;;  %v5075_v40 = vor.u32 %v5926_v50, %v5072_v32  ;;  %v5532_v50 = vld [vmem:[#allocation2 + $0x464] sm:$0xf0]  ;;  %v5954_v25 = vld [vmem:[#allocation2 + $0x184] sm:$0xf] }
 0x261   : > { %4214 = vmatpush.bf16.msra.mxu0 %v6107_v38 }
 0x263   : > { %3949 = vmatmul.bf16.vlgmr.msrb.gmra.mxu1 %v4999_v35 }
 0x264   : > { %3920 = vmatmul.bf16.gmra.mxu0 %v5427_v48  ;;  %v6105_v48 = vld [vmem:[#allocation8 + $0x1b8] sm:$0xff] }
 0x265   : > { %4119 = vmatpush.bf16.msra.mxu3 %v6105_v48  ;;  %4215 = vmatpush.bf16.msra.mxu0 %v6106_v14 }
 0x266   : > { %v10082_v1 = vpop.f32.mrf.mxu2  ;;  %v10084_v36 = vpop.f32.mrf.mxu0 }
 0x267   : > { %11256 = vst [vmem:[#allocation19_spill] sm:$0xff] %v10084_v36 }
 0x26b   : > { %3747 = vmatmul.bf16.gmra.mxu3 %v5455_v37  ;;  %4043 = vmatmul.bf16.gmra.mxu2 %v5039_v4  ;;  %v5070_v37 = vld [vmem:[#allocation2 + $0xa0] sm:$0xf] }
 0x26c   : > { %v5071_v41 = vor.u32 %v5930_v42, %v5070_v37 }
 0x26e   : > { %v3708_v55 = vpop.f32.mrf.mxu2 }
 0x270   : > { %v3619_v59 = vpop.f32.mrf.mxu1 }
 0x271   : > { %v3620_v56 = vadd.f32 %v9994_v27, %v3619_v59  ;;  %v10087_v6 = vpop.f32.mrf.mxu0 }
 0x272   : > { %11257 = vst [vmem:[#allocation16_spill] sm:$0xff] %v10087_v6  ;;  %v5980_v6 = vld [vmem:[#allocation2 + $0x254] sm:$0xf] }
 0x273   : > { %v10089_v58 = vadd.f32 %v3708_v55, %v3620_v56  ;;  %3954 = vmatmul.bf16.gmra.mxu1 %v5035_v31  ;;  %v5499_v55 = vor.u32 %v6033_v5, %v5496_v34  ;;  %v5108_v56 = vld [vmem:[#allocation2 + $0x10c] sm:$0xf0]  ;;  %v5144_v5 = vld [vmem:[#allocation2 + $0x154] sm:$0xf0] }
 0x274   : > { %3925 = vmatmul.bf16.gmra.mxu0 %v5463_v54  ;;  %v5935_v54 = vld [vmem:[#allocation2 + $0xec] sm:$0xf] }
 0x276   : > { %v3710_v49 = vpop.f32.mrf.mxu2 }
 0x278   : > { %v3621_v12 = vpop.f32.mrf.mxu1 }
 0x279   : > { %v3622_v30 = vadd.f32 %v9994_v27, %v3621_v12  ;;  %v10094_v11 = vpop.f32.mrf.mxu0 }
 0x27a   : > { %11258 = vst [vmem:[#allocation21_spill] sm:$0xff] %v10094_v11 }
 0x27b   : > { %v10092_v35 = vadd.f32 %v3710_v49, %v3622_v30  ;;  %3752 = vmatmul.bf16.gmra.mxu3 %v5491_v20  ;;  %4048 = vmatmul.bf16.gmra.mxu2 %v5075_v40  ;;  %v5111_v49 = vor.u32 %v5935_v54, %v5108_v56  ;;  %v6042_v30 = vld [vmem:[#allocation2 + $0x444] sm:$0xf]  ;;  %v5106_v20 = vld [vmem:[#allocation2 + $0xe8] sm:$0xf]  ;;  %v5008_v54 = vld [vmem:[#allocation2 + $0x3c] sm:$0xf0] }
 0x27c   : > { %v5107_v13 = vor.u32 %v5939_v23, %v5106_v20  ;;  %v5535_v42 = vor.u32 %v6042_v30, %v5532_v50  ;;  %v5909_v23 = vld [vmem:[#allocation2 + $0x1c] sm:$0xf]  ;;  %v6120_v50 = vld [vmem:[#allocation8 + $0x230] sm:$0xff] }
 0x27d   : > { %4298 = vmatpush.bf16.msra.mxu1 %v6120_v50 }
 0x27e   : > { %v3713_v0 = vpop.f32.mrf.mxu2 }
 0x280   : > { %v3624_v21 = vpop.f32.mrf.mxu1 }
 0x281   : > { %v3625_v4 = vadd.f32 %v9994_v27, %v3624_v21  ;;  %v10099_v59 = vpop.f32.mrf.mxu0  ;;  %v5911_v21 = vld [vmem:[#allocation2 + $0x28] sm:$0xf0] }
 0x282   : > { %11259 = vst [vmem:[#allocation17_spill] sm:$0xff] %v10099_v59  ;;  %v5936_v59 = vld [vmem:[#allocation2 + $0xf4] sm:$0xf] }
 0x283   : > { %v10097_v8 = vadd.f32 %v3713_v0, %v3625_v4  ;;  %3959 = vmatmul.bf16.gmra.mxu1 %v5071_v41  ;;  %v4990_v0 = vld [vmem:[#allocation2 + $0x8] sm:$0xf]  ;;  %v5944_v4 = vld [vmem:[#allocation2 + $0x134] sm:$0xf] }
 0x284   : > { %3930 = vmatmul.bf16.gmra.mxu0 %v5499_v55  ;;  %v4991_v14 = vor.u32 %v5911_v21, %v4990_v0  ;;  %v5147_v55 = vor.u32 %v5944_v4, %v5144_v5  ;;  %v5026_v21 = vld [vmem:[#allocation2 + $0x50] sm:$0xf]  ;;  %v5953_v5 = vld [vmem:[#allocation2 + $0x17c] sm:$0xf] }
 0x286   : > { %v3715_v9 = vpop.f32.mrf.mxu2 }
 0x288   : > { %v3626_v31 = vpop.f32.mrf.mxu1 }
 0x289   : > { %v3627_v17 = vadd.f32 %v9994_v27, %v3626_v31  ;;  %v10104_v32 = vpop.f32.mrf.mxu0 }
 0x28a   : > { %11260 = vst [vmem:[#allocation25_spill] sm:$0xff] %v10104_v32 }
 0x28b   : > { %v10102_v44 = vadd.f32 %v3715_v9, %v3627_v17  ;;  %3757 = vmatmul.bf16.gmra.mxu3 %v5527_v62  ;;  %4053 = vmatmul.bf16.gmra.mxu2 %v5111_v49  ;;  %v6104_v9 = vld [vmem:[#allocation8 + $0x1b0] sm:$0xff] }
 0x28c   : > { %4120 = vmatpush.bf16.msra.mxu3 %v6104_v9  ;;  %v5142_v17 = vld [vmem:[#allocation2 + $0x130] sm:$0xf] }
 0x28d   : > { %v5143_v49 = vor.u32 %v5948_v43, %v5142_v17  ;;  %v5044_v17 = vld [vmem:[#allocation2 + $0x84] sm:$0xf0] }
 0x28e   : > { %v3718_v16 = vpop.f32.mrf.mxu2 }
 0x290   : > { %v3629_v12 = vpop.f32.mrf.mxu1 }
 0x291   : > { %v3630_v40 = vadd.f32 %v9994_v27, %v3629_v12  ;;  %v10110_v41 = vpop.f32.mrf.mxu0  ;;  %v5011_v12 = vor.u32 %v5909_v23, %v5008_v54 }
 0x292   : > { %11261 = vst [vmem:[#allocation26_spill] sm:$0xff] %v10110_v41 }
 0x293   : > { %v10107_v48 = vadd.f32 %v3718_v16, %v3630_v40  ;;  %3964 = vmatmul.bf16.gmra.mxu1 %v5107_v13  ;;  %v5920_v13 = vld [vmem:[#allocation2 + $0x70] sm:$0xf0] }
 0x294   : > { %3935 = vmatmul.bf16.gmra.mxu0 %v5535_v42  ;;  %v5180_v42 = vld [vmem:[#allocation2 + $0x19c] sm:$0xf0] }
 0x296   : > { %v3720_v38 = vpop.f32.mrf.mxu2 }
 0x298   : > { %v3631_v34 = vpop.f32.mrf.mxu1 }
 0x299   : > { %v3632_v37 = vadd.f32 %v9994_v27, %v3631_v34  ;;  %v10119_v30 = vpop.f32.mrf.mxu0  ;;  %v5027_v34 = vor.u32 %v5920_v13, %v5026_v21  ;;  %v5929_v13 = vld [vmem:[#allocation2 + $0xb8] sm:$0xf0] }
 0x29a   : > { %11262 = vst [vmem:[#allocation27_spill] sm:$0xff] %v10119_v30 }
 0x29b   : > { %v10112_v29 = vadd.f32 %v3720_v38, %v3632_v37  ;;  %3771 = vmatmul.bf16.vlgmr.msrb.gmra.mxu3 %v4991_v14  ;;  %4058 = vmatmul.bf16.gmra.mxu2 %v5147_v55  ;;  %v5183_v37 = vor.u32 %v5953_v5, %v5180_v42  ;;  %v5957_v55 = vld [vmem:[#allocation2 + $0x198] sm:$0xf0]  ;;  %v5216_v42 = vld [vmem:[#allocation2 + $0x1e4] sm:$0xf0]  ;;  %v5062_v5 = vld [vmem:[#allocation2 + $0x98] sm:$0xf] }
 0x29e   : > { %v10114_v51 = vpop.f32.mrf.mxu3  ;;  %v3723_v56 = vpop.f32.mrf.mxu2 }
 0x2a0   : > { %v3634_v31 = vpop.f32.mrf.mxu1 }
 0x2a1   : > { %v3635_v62 = vadd.f32 %v9994_v27, %v3634_v31  ;;  %v10126_v14 = vpop.f32.mrf.mxu0  ;;  %v5178_v31 = vld [vmem:[#allocation2 + $0x178] sm:$0xf] }
 0x2a2   : > { %11263 = vst [vmem:[#allocation28_spill] sm:$0xff] %v10126_v14  ;;  %v5927_v14 = vld [vmem:[#allocation2 + $0xac] sm:$0xf] }
 0x2a3   : > { %v10117_v16 = vadd.f32 %v3723_v56, %v3635_v62  ;;  %3969 = vmatmul.bf16.gmra.mxu1 %v5143_v49  ;;  %v5179_v62 = vor.u32 %v5957_v55, %v5178_v31  ;;  %v5918_v49 = vld [vmem:[#allocation2 + $0x64] sm:$0xf] }
 0x2a4   : > { %4216 = vmatmul.bf16.vlgmr.msra.gmra.mxu0 %v5011_v12  ;;  %v5047_v12 = vor.u32 %v5918_v49, %v5044_v17  ;;  %v5966_v31 = vld [vmem:[#allocation2 + $0x1e0] sm:$0xf0]  ;;  %v5214_v49 = vld [vmem:[#allocation2 + $0x1c0] sm:$0xf] }
 0x2a6   : > { %v10121_v20 = vpop.f32.mrf.mxu3  ;;  %v3725_v40 = vpop.f32.mrf.mxu2 }
 0x2a8   : > { %v3636_v38 = vpop.f32.mrf.mxu1 }
 0x2a9   : > { %v3637_v0 = vadd.f32 %v9994_v27, %v3636_v38 }
 0x2ab   : > { %v10124_v4 = vadd.f32 %v3725_v40, %v3637_v0  ;;  %3776 = vmatmul.bf16.gmra.mxu3 %v5027_v34  ;;  %4063 = vmatmul.bf16.gmra.mxu2 %v5183_v37  ;;  %v10135_v0 = vpop.f32.mrf.mxu0  ;;  %v5962_v34 = vld [vmem:[#allocation2 + $0x1c4] sm:$0xf]  ;;  %v5063_v37 = vor.u32 %v5929_v13, %v5062_v5 }
 0x2ac   : > { %11264 = vst [vmem:[#allocation29_spill] sm:$0xff] %v10135_v0  ;;  %v5219_v55 = vor.u32 %v5962_v34, %v5216_v42  ;;  %v6119_v42 = vld [vmem:[#allocation8 + $0x228] sm:$0xff]  ;;  %v5938_v34 = vld [vmem:[#allocation2 + $0x100] sm:$0xf0] }
 0x2ad   : > { %4299 = vmatpush.bf16.msra.mxu1 %v6119_v42  ;;  %v5116_v42 = vld [vmem:[#allocation2 + $0x114] sm:$0xf0] }
 0x2ae   : > { %v10128_v9 = vpop.f32.mrf.mxu3  ;;  %v3728_v43 = vpop.f32.mrf.mxu2 }
 0x2b0   : > { %v3639_v56 = vpop.f32.mrf.mxu1 }
 0x2b1   : > { %v3640_v54 = vadd.f32 %v9994_v27, %v3639_v56 }
 0x2b3   : > { %v10131_v23 = vadd.f32 %v3728_v43, %v3640_v54  ;;  %3974 = vmatmul.bf16.gmra.mxu1 %v5179_v62  ;;  %v6103_v43 = vld [vmem:[#allocation8 + $0x1a8] sm:$0xff]  ;;  %v10143_v30 = vpop.f32.mrf.mxu0 }
 0x2b4   : > { %4221 = vmatmul.bf16.gmra.mxu0 %v5047_v12  ;;  %4121 = vmatpush.bf16.msra.mxu3 %v6103_v43  ;;  %v5080_v12 = vld [vmem:[#allocation2 + $0xcc] sm:$0xf0]  ;;  %11265 = vst [vmem:[#allocation30_spill] sm:$0xff] %v10143_v30 }
 0x2b6   : > { %v10133_v50 = vpop.f32.mrf.mxu3  ;;  %v3730_v40 = vpop.f32.mrf.mxu2 }
 0x2b8   : > { %v3641_v38 = vpop.f32.mrf.mxu1 }
 0x2b9   : > { %v3642_v21 = vadd.f32 %v9994_v27, %v3641_v38  ;;  %v5215_v38 = vor.u32 %v5966_v31, %v5214_v49  ;;  %v5971_v31 = vld [vmem:[#allocation2 + $0x20c] sm:$0xf] }
 0x2bb   : > { %v10138_v56 = vadd.f32 %v3730_v40, %v3642_v21  ;;  %3781 = vmatmul.bf16.gmra.mxu3 %v5063_v37  ;;  %4068 = vmatmul.bf16.gmra.mxu2 %v5219_v55  ;;  %v5083_v40 = vor.u32 %v5927_v14, %v5080_v12  ;;  %v5252_v37 = vld [vmem:[#allocation2 + $0x22c] sm:$0xf0]  ;;  %v10152_v14 = vpop.f32.mrf.mxu0 }
 0x2bc   : > { %v5255_v41 = vor.u32 %v5971_v31, %v5252_v37  ;;  %11266 = vst [vmem:[#allocation31_spill] sm:$0xff] %v10152_v14  ;;  %v5947_v37 = vld [vmem:[#allocation2 + $0x148] sm:$0xf0]  ;;  %v5134_v14 = vld [vmem:[#allocation2 + $0x128] sm:$0xf] }
 0x2be   : > { %v10140_v17 = vpop.f32.mrf.mxu3  ;;  %v3733_v54 = vpop.f32.mrf.mxu2 }
 0x2c0   : > { %v3644_v62 = vpop.f32.mrf.mxu1 }
 0x2c1   : > { %v3645_v0 = vadd.f32 %v9994_v27, %v3644_v62  ;;  %v5098_v62 = vld [vmem:[#allocation2 + $0xe0] sm:$0xf] }
 0x2c2   : > { %v5099_v49 = vor.u32 %v5938_v34, %v5098_v62 }
 0x2c3   : > { %v10145_v13 = vadd.f32 %v3733_v54, %v3645_v0  ;;  %3979 = vmatmul.bf16.gmra.mxu1 %v5215_v38  ;;  %v5975_v0 = vld [vmem:[#allocation2 + $0x228] sm:$0xf0]  ;;  %v10159_v34 = vpop.f32.mrf.mxu0 }
 0x2c4   : > { %4226 = vmatmul.bf16.gmra.mxu0 %v5083_v40  ;;  %v5250_v40 = vld [vmem:[#allocation2 + $0x208] sm:$0xf]  ;;  %11267 = vst [vmem:[#allocation32_spill] sm:$0xff] %v10159_v34  ;;  %v5152_v34 = vld [vmem:[#allocation2 + $0x15c] sm:$0xf0] }
 0x2c6   : > { %v10147_v21 = vpop.f32.mrf.mxu3  ;;  %v3735_v5 = vpop.f32.mrf.mxu2 }
 0x2c8   : > { %v3646_v55 = vpop.f32.mrf.mxu1 }
 0x2c9   : > { %v3647_v43 = vadd.f32 %v9994_v27, %v3646_v55  ;;  %v5251_v55 = vor.u32 %v5975_v0, %v5250_v40 }
 0x2cb   : > { %v10150_v30 = vadd.f32 %v3735_v5, %v3647_v43  ;;  %3786 = vmatmul.bf16.gmra.mxu3 %v5099_v49  ;;  %4073 = vmatmul.bf16.gmra.mxu2 %v5255_v41  ;;  %v5119_v5 = vor.u32 %v5936_v59, %v5116_v42  ;;  %v5288_v43 = vld [vmem:[#allocation2 + $0x274] sm:$0xf0]  ;;  %v6102_v59 = vld [vmem:[#allocation8 + $0x1a0] sm:$0xff]  ;;  %v10172_v36 = vpop.f32.mrf.mxu0 }
 0x2cc   : > { %v5291_v0 = vor.u32 %v5980_v6, %v5288_v43  ;;  %4122 = vmatpush.bf16.msra.mxu3 %v6102_v59  ;;  %11268 = vst [vmem:[#allocation33_spill] sm:$0xff] %v10172_v36  ;;  %v6118_v43 = vld [vmem:[#allocation8 + $0x220] sm:$0xff] }
 0x2cd   : > { %4300 = vmatpush.bf16.msra.mxu1 %v6118_v43  ;;  %v5322_v43 = vld [vmem:[#allocation2 + $0x298] sm:$0xf] }
 0x2ce   : > { %v10154_v54 = vpop.f32.mrf.mxu3  ;;  %v3738_v12 = vpop.f32.mrf.mxu2 }
 0x2d0   : > { %v3649_v38 = vpop.f32.mrf.mxu1 }
 0x2d1   : > { %v3650_v32 = vadd.f32 %v9994_v27, %v3649_v38  ;;  %v5135_v38 = vor.u32 %v5947_v37, %v5134_v14  ;;  %v5945_v14 = vld [vmem:[#allocation2 + $0x13c] sm:$0xf] }
 0x2d2   : > { %v5155_v37 = vor.u32 %v5945_v14, %v5152_v34  ;;  %v3660_v34 = vadd.f32 %v9994_v27, %v10128_v9  ;;  %v5965_v9 = vld [vmem:[#allocation2 + $0x1d8] sm:$0xf0] }
 0x2d3   : > { %v10157_v11 = vadd.f32 %v3738_v12, %v3650_v32  ;;  %3984 = vmatmul.bf16.gmra.mxu1 %v5251_v55  ;;  %v3655_v32 = vadd.f32 %v9994_v27, %v10114_v51  ;;  %v5984_v12 = vld [vmem:[#allocation2 + $0x270] sm:$0xf0]  ;;  %v3657_v51 = vadd.f32 %v9994_v27, %v10121_v20  ;;  %v5993_v20 = vld [vmem:[#allocation2 + $0x2b8] sm:$0xf0] }
 0x2d4   : > { %4231 = vmatmul.bf16.gmra.mxu0 %v5119_v5 }
 0x2d6   : > { %v10161_v41 = vpop.f32.mrf.mxu3  ;;  %v3740_v31 = vpop.f32.mrf.mxu2 }
 0x2d8   : > { %v3651_v62 = vpop.f32.mrf.mxu1 }
 0x2d9   : > { %v3652_v49 = vadd.f32 %v9994_v27, %v3651_v62  ;;  %v5286_v62 = vld [vmem:[#allocation2 + $0x250] sm:$0xf] }
 0x2da   : > { %v5287_v6 = vor.u32 %v5984_v12, %v5286_v62  ;;  %v10180_v62 = vpop.f32.mrf.mxu0 }
 0x2db   : > { %v10164_v40 = vadd.f32 %v3740_v31, %v3652_v49  ;;  %3791 = vmatmul.bf16.gmra.mxu3 %v5135_v38  ;;  %4078 = vmatmul.bf16.gmra.mxu2 %v5291_v0  ;;  %v5956_v49 = vld [vmem:[#allocation2 + $0x190] sm:$0xf0]  ;;  %v5324_v38 = vld [vmem:[#allocation2 + $0x2bc] sm:$0xf0]  ;;  %11269 = vst [vmem:[#allocation34_spill] sm:$0xff] %v10180_v62 }
 0x2dc   : > { %v5998_v62 = vld [vmem:[#allocation2 + $0x2e4] sm:$0xf] }
 0x2de   : > { %v3743_v42 = vpop.f32.mrf.mxu3 }
 0x2df   : > { %v10168_v55 = vadd.f32 %v3743_v42, %v3655_v32  ;;  %v5170_v32 = vld [vmem:[#allocation2 + $0x170] sm:$0xf]  ;;  %v5989_v42 = vld [vmem:[#allocation2 + $0x29c] sm:$0xf] }
 0x2e0   : > { %v10170_v5 = vpop.f32.mrf.mxu1  ;;  %v5171_v36 = vor.u32 %v5956_v49, %v5170_v32  ;;  %v5327_v12 = vor.u32 %v5989_v42, %v5324_v38  ;;  %v5360_v42 = vld [vmem:[#allocation2 + $0x304] sm:$0xf0] }
 0x2e2   : > { %v10188_v38 = vpop.f32.mrf.mxu0 }
 0x2e3   : > { %3989 = vmatmul.bf16.gmra.mxu1 %v5287_v6  ;;  %11270 = vst [vmem:[#allocation35_spill] sm:$0xff] %v10188_v38  ;;  %v5224_v38 = vld [vmem:[#allocation2 + $0x1ec] sm:$0xf0] }
 0x2e4   : > { %4236 = vmatmul.bf16.gmra.mxu0 %v5155_v37 }
 0x2e6   : > { %v3745_v31 = vpop.f32.mrf.mxu3 }
 0x2e7   : > { %v10176_v0 = vadd.f32 %v3745_v31, %v3657_v51  ;;  %v5188_v51 = vld [vmem:[#allocation2 + $0x1a4] sm:$0xf0]  ;;  %v5323_v31 = vor.u32 %v5993_v20, %v5322_v43  ;;  %v5363_v20 = vor.u32 %v5998_v62, %v5360_v42  ;;  %v3665_v43 = vadd.f32 %v9994_v27, %v10140_v17  ;;  %v6117_v62 = vld [vmem:[#allocation8 + $0x218] sm:$0xff]  ;;  %v10206_v42 = vpop.f32.mrf.mxu2 }
 0x2e8   : > { %v10178_v59 = vpop.f32.mrf.mxu1  ;;  %v5191_v49 = vor.u32 %v5954_v25, %v5188_v51  ;;  %v6101_v25 = vld [vmem:[#allocation8 + $0x198] sm:$0xff]  ;;  %v6002_v51 = vld [vmem:[#allocation2 + $0x300] sm:$0xf0]  ;;  %v3667_v17 = vadd.f32 %v9994_v27, %v10147_v21  ;;  %4301 = vmatpush.bf16.msra.mxu1 %v6117_v62 }
 0x2e9   : > { %4123 = vmatpush.bf16.msra.mxu3 %v6101_v25  ;;  %v6007_v25 = vld [vmem:[#allocation2 + $0x32c] sm:$0xf] }
 0x2eb   : > { %3796 = vmatmul.bf16.gmra.mxu3 %v5171_v36  ;;  %4083 = vmatmul.bf16.gmra.mxu2 %v5327_v12  ;;  %v3662_v36 = vadd.f32 %v9994_v27, %v10133_v50  ;;  %v10198_v50 = vpop.f32.mrf.mxu0  ;;  %v10217_v27 = vld [vmem:[%s10782_s4] ss:$0 sm:$0xff] }
 0x2ec   : > { %11271 = vst [vmem:[#allocation36_spill] sm:$0xff] %v10198_v50  ;;  %v3670_v21 = vadd.f32 %v10217_v27, %v10154_v54  ;;  %v3672_v54 = vadd.f32 %v10217_v27, %v10161_v41  ;;  %v5430_v41 = vld [vmem:[#allocation2 + $0x370] sm:$0xf] }
 0x2ee   : > { %v3748_v6 = vpop.f32.mrf.mxu3 }
 0x2ef   : > { %v10184_v14 = vadd.f32 %v3748_v6, %v3660_v34  ;;  %v5206_v6 = vld [vmem:[#allocation2 + $0x1b8] sm:$0xf]  ;;  %v10221_v62 = vpop.f32.mrf.mxu2 }
 0x2f0   : > { %v10186_v37 = vpop.f32.mrf.mxu1  ;;  %v5207_v63 = vor.u32 %v5965_v9, %v5206_v6  ;;  %v5963_v9 = vld [vmem:[#allocation2 + $0x1cc] sm:$0xf] }
 0x2f3   : > { %3994 = vmatmul.bf16.gmra.mxu1 %v5323_v31 }
 0x2f4   : > { %4241 = vmatmul.bf16.gmra.mxu0 %v5191_v49 }
 0x2f6   : > { %v3750_v32 = vpop.f32.mrf.mxu3 }
 0x2f7   : > { %v10192_v12 = vadd.f32 %v3750_v32, %v3662_v36  ;;  %v5358_v32 = vld [vmem:[#allocation2 + $0x2e0] sm:$0xf] }
 0x2f8   : > { %v10194_v34 = vpop.f32.mrf.mxu1  ;;  %v5359_v52 = vor.u32 %v6002_v51, %v5358_v32  ;;  %v10212_v51 = vpop.f32.mrf.mxu0 }
 0x2f9   : > { %11274 = vst [vmem:[#allocation39_spill] sm:$0xff] %v10212_v51  ;;  %v6129_v51 = vld [vmem:[#allocation9 + $0x38] sm:$0xff] }
 0x2fa   : > { %4502 = vmatpush.bf16.msra.mxu2 %v6129_v51 }
 0x2fb   : > { %3801 = vmatmul.bf16.gmra.mxu3 %v5207_v63  ;;  %4088 = vmatmul.bf16.gmra.mxu2 %v5363_v20  ;;  %v5227_v63 = vor.u32 %v5963_v9, %v5224_v38  ;;  %v5974_v20 = vld [vmem:[#allocation2 + $0x220] sm:$0xf0]  ;;  %v6011_v9 = vld [vmem:[#allocation2 + $0x348] sm:$0xf0] }
 0x2fe   : > { %v3753_v31 = vpop.f32.mrf.mxu3 }
 0x2ff   : > { %v10200_v49 = vadd.f32 %v3753_v31, %v3665_v43  ;;  %v5396_v43 = vld [vmem:[#allocation2 + $0x34c] sm:$0xf0] }
 0x300   : > { %v10202_v36 = vpop.f32.mrf.mxu1  ;;  %v5399_v32 = vor.u32 %v6007_v25, %v5396_v43  ;;  %v5260_v25 = vld [vmem:[#allocation2 + $0x234] sm:$0xf0] }
 0x301   : > { %11272 = vst [vmem:[#allocation37_spill] sm:$0xff] %v10202_v36  ;;  %v6016_v36 = vld [vmem:[#allocation2 + $0x374] sm:$0xf] }
 0x303   : > { %3999 = vmatmul.bf16.gmra.mxu1 %v5359_v52  ;;  %v5242_v52 = vld [vmem:[#allocation2 + $0x200] sm:$0xf] }
 0x304   : > { %4246 = vmatmul.bf16.gmra.mxu0 %v5227_v63  ;;  %v5243_v38 = vor.u32 %v5974_v20, %v5242_v52  ;;  %v5394_v20 = vld [vmem:[#allocation2 + $0x328] sm:$0xf]  ;;  %v5972_v52 = vld [vmem:[#allocation2 + $0x214] sm:$0xf] }
 0x305   : > { %v5395_v43 = vor.u32 %v6011_v9, %v5394_v20  ;;  %v5278_v9 = vld [vmem:[#allocation2 + $0x248] sm:$0xf]  ;;  %v10235_v20 = vpop.f32.mrf.mxu2 }
 0x306   : > { %v3755_v6 = vpop.f32.mrf.mxu3 }
 0x307   : > { %v10208_v31 = vadd.f32 %v3755_v6, %v3667_v17 }
 0x308   : > { %v10210_v50 = vpop.f32.mrf.mxu1 }
 0x309   : > { %11273 = vst [vmem:[#allocation38_spill] sm:$0xff] %v10210_v50 }
 0x30b   : > { %3806 = vmatmul.bf16.gmra.mxu3 %v5243_v38  ;;  %4093 = vmatmul.bf16.gmra.mxu2 %v5399_v32  ;;  %v10227_v38 = vpop.f32.mrf.mxu0  ;;  %v5263_v32 = vor.u32 %v5972_v52, %v5260_v25  ;;  %v6100_v25 = vld [vmem:[#allocation8 + $0x190] sm:$0xff] }
 0x30c   : > { %11276 = vst [vmem:[#allocation41_spill] sm:$0xff] %v10227_v38  ;;  %v5279_v38 = vor.u32 %v5983_v28, %v5278_v9  ;;  %4124 = vmatpush.bf16.msra.mxu3 %v6100_v25  ;;  %v3597_v28 = vadd.f32 %v10217_v27, %v10036_v57  ;;  %v6116_v9 = vld [vmem:[#allocation8 + $0x210] sm:$0xff] }
 0x30d   : > { %4302 = vmatpush.bf16.msra.mxu1 %v6116_v9  ;;  %v5314_v57 = vld [vmem:[#allocation2 + $0x290] sm:$0xf]  ;;  %v5332_v9 = vld [vmem:[#allocation2 + $0x2c4] sm:$0xf0] }
 0x30e   : > { %v3758_v63 = vpop.f32.mrf.mxu3 }
 0x30f   : > { %v10223_v17 = vadd.f32 %v3758_v63, %v3670_v21  ;;  %v5432_v21 = vld [vmem:[#allocation2 + $0x394] sm:$0xf0] }
 0x310   : > { %v10225_v6 = vpop.f32.mrf.mxu1 }
 0x311   : > { %11275 = vst [vmem:[#allocation40_spill] sm:$0xff] %v10225_v6 }
 0x313   : > { %4004 = vmatmul.bf16.gmra.mxu1 %v5395_v43  ;;  %v5435_v43 = vor.u32 %v6016_v36, %v5432_v21  ;;  %v10237_v52 = vpop.f32.mrf.mxu0  ;;  %v5981_v36 = vld [vmem:[#allocation2 + $0x25c] sm:$0xf]  ;;  %v10246_v21 = vpop.f32.mrf.mxu2 }
 0x314   : > { %4251 = vmatmul.bf16.gmra.mxu0 %v5263_v32  ;;  %11278 = vst [vmem:[#allocation43_spill] sm:$0xff] %v10237_v52  ;;  %v6020_v32 = vld [vmem:[#allocation2 + $0x390] sm:$0xf0]  ;;  %v6025_v52 = vld [vmem:[#allocation2 + $0x3bc] sm:$0xf] }
 0x315   : > { %11280 = vst [vmem:[#allocation45_spill] sm:$0xff] %v10246_v21 }
 0x316   : > { %v3760_v50 = vpop.f32.mrf.mxu3 }
 0x317   : > { %v10231_v63 = vadd.f32 %v3760_v50, %v3672_v54  ;;  %v5296_v54 = vld [vmem:[#allocation2 + $0x27c] sm:$0xf0] }
 0x318   : > { %v10233_v6 = vpop.f32.mrf.mxu1 }
 0x319   : > { %11277 = vst [vmem:[#allocation42_spill] sm:$0xff] %v10233_v6  ;;  %v5431_v6 = vor.u32 %v6020_v32, %v5430_v41 }
 0x31b   : > { %3811 = vmatmul.bf16.gmra.mxu3 %v5279_v38  ;;  %4098 = vmatmul.bf16.gmra.mxu2 %v5435_v43  ;;  %v5299_v38 = vor.u32 %v5981_v36, %v5296_v54  ;;  %v3686_v43 = vadd.f32 %v10040_v18, %v3597_v28  ;;  %v10249_v25 = vpop.f32.mrf.mxu0  ;;  %v10255_v36 = vpop.f32.mrf.mxu2  ;;  %v6029_v18 = vld [vmem:[#allocation2 + $0x3d8] sm:$0xf0] }
 0x31c   : > { %11281 = vst [vmem:[#allocation46_spill] sm:$0xff] %v10249_v25 }
 0x31d   : > { %11283 = vst [vmem:[#allocation48_spill] sm:$0xff] %v10255_v36 }
 0x31e   : > { %v3772_v2 = vpop.f32.mrf.mxu3 }
 0x31f   : > { %v10240_v51 = vadd.f32 %v3772_v2, %v10029_v15  ;;  %v5992_v2 = vld [vmem:[#allocation2 + $0x2b0] sm:$0xf0] }
 0x320   : > { %v10242_v50 = vpop.f32.mrf.mxu1 }
 0x321   : > { %11279 = vst [vmem:[#allocation44_spill] sm:$0xff] %v10242_v50  ;;  %v5468_v50 = vld [vmem:[#allocation2 + $0x3dc] sm:$0xf0] }
 0x322   : > { %v5471_v54 = vor.u32 %v6025_v52, %v5468_v50  ;;  %v5990_v52 = vld [vmem:[#allocation2 + $0x2a4] sm:$0xf] }
 0x323   : > { %4009 = vmatmul.bf16.gmra.mxu1 %v5431_v6  ;;  %v5315_v6 = vor.u32 %v5992_v2, %v5314_v57  ;;  %v3602_v2 = vadd.f32 %v10217_v27, %v10047_v46  ;;  %v5335_v50 = vor.u32 %v5990_v52, %v5332_v9  ;;  %v6128_v57 = vld [vmem:[#allocation9 + $0x30] sm:$0xff]  ;;  %v6038_v52 = vld [vmem:[#allocation2 + $0x420] sm:$0xf0] }
 0x324   : > { %4256 = vmatmul.bf16.gmra.mxu0 %v5299_v38  ;;  %v5466_v38 = vld [vmem:[#allocation2 + $0x3b8] sm:$0xf]  ;;  %4503 = vmatpush.bf16.msra.mxu2 %v6128_v57 }
 0x326   : > { %v3774_v15 = vpop.f32.mrf.mxu3 }
 0x327   : > { %v10251_v41 = vadd.f32 %v3774_v15, %v3686_v43  ;;  %v10262_v43 = vpop.f32.mrf.mxu0  ;;  %v5467_v15 = vor.u32 %v6029_v18, %v5466_v38  ;;  %v5350_v18 = vld [vmem:[#allocation2 + $0x2d8] sm:$0xf] }
 0x328   : > { %v10253_v32 = vpop.f32.mrf.mxu1  ;;  %11285 = vst [vmem:[#allocation50_spill] sm:$0xff] %v10262_v43 }
 0x329   : > { %11282 = vst [vmem:[#allocation47_spill] sm:$0xff] %v10253_v32  ;;  %v6001_v32 = vld [vmem:[#allocation2 + $0x2f8] sm:$0xf0] }
 0x32a   : > { %v5351_v46 = vor.u32 %v6001_v32, %v5350_v18  ;;  %v3607_v32 = vadd.f32 %v10217_v27, %v10058_v7  ;;  %v5386_v7 = vld [vmem:[#allocation2 + $0x320] sm:$0xf] }
 0x32b   : > { %3816 = vmatmul.bf16.gmra.mxu3 %v5315_v6  ;;  %4103 = vmatmul.bf16.gmra.mxu2 %v5471_v54  ;;  %v3691_v6 = vadd.f32 %v10051_v22, %v3602_v2  ;;  %v6099_v22 = vld [vmem:[#allocation8 + $0x188] sm:$0xff]  ;;  %v5502_v2 = vld [vmem:[#allocation2 + $0x400] sm:$0xf] }
 0x32c   : > { %4125 = vmatpush.bf16.msra.mxu3 %v6099_v22  ;;  %v6010_v22 = vld [vmem:[#allocation2 + $0x340] sm:$0xf0] }
 0x32e   : > { %v3777_v28 = vpop.f32.mrf.mxu3 }
 0x32f   : > { %v10258_v25 = vadd.f32 %v3777_v28, %v10045_v39  ;;  %v6034_v39 = vld [vmem:[#allocation2 + $0x404] sm:$0xf]  ;;  %v5504_v28 = vld [vmem:[#allocation2 + $0x424] sm:$0xf0]  ;;  %v10273_v9 = vpop.f32.mrf.mxu0 }
 0x330   : > { %v10260_v21 = vpop.f32.mrf.mxu1  ;;  %v5507_v43 = vor.u32 %v6034_v39, %v5504_v28  ;;  %11288 = vst [vmem:[#allocation53_spill] sm:$0xff] %v10273_v9  ;;  %v5999_v28 = vld [vmem:[#allocation2 + $0x2ec] sm:$0xf]  ;;  %v5540_v9 = vld [vmem:[#allocation2 + $0x46c] sm:$0xf0] }
 0x331   : > { %11284 = vst [vmem:[#allocation49_spill] sm:$0xff] %v10260_v21  ;;  %v10267_v21 = vpop.f32.mrf.mxu2 }
 0x332   : > { %11286 = vst [vmem:[#allocation51_spill] sm:$0xff] %v10267_v21 }
 0x333   : > { %4014 = vmatmul.bf16.gmra.mxu1 %v5467_v15  ;;  %v6115_v15 = vld [vmem:[#allocation8 + $0x208] sm:$0xff] }
 0x334   : > { %4261 = vmatmul.bf16.gmra.mxu0 %v5335_v50  ;;  %4303 = vmatpush.bf16.msra.mxu1 %v6115_v15 }
 0x336   : > { %v3779_v54 = vpop.f32.mrf.mxu3 }
 0x337   : > { %v10269_v36 = vadd.f32 %v3779_v54, %v3691_v6  ;;  %v5368_v54 = vld [vmem:[#allocation2 + $0x30c] sm:$0xf0] }
 0x338   : > { %v10271_v38 = vpop.f32.mrf.mxu1  ;;  %v5371_v18 = vor.u32 %v5999_v28, %v5368_v54  ;;  %v6047_v54 = vld [vmem:[#allocation2 + $0x468] sm:$0xf0] }
 0x339   : > { %11287 = vst [vmem:[#allocation52_spill] sm:$0xff] %v10271_v38  ;;  %v5503_v38 = vor.u32 %v6038_v52, %v5502_v2  ;;  %v10282_v39 = vpop.f32.mrf.mxu2 }
 0x33a   : > { %11290 = vst [vmem:[#allocation55_spill] sm:$0xff] %v10282_v39 }
 0x33b   : > { %3821 = vmatmul.bf16.gmra.mxu3 %v5351_v46  ;;  %4108 = vmatmul.bf16.gmra.mxu2 %v5507_v43  ;;  %v6114_v43 = vld [vmem:[#allocation8 + $0x200] sm:$0xff]  ;;  %v10284_v46 = vpop.f32.mrf.mxu0 }
 0x33c   : > { %4304 = vmatpush.bf16.msra.mxu1 %v6114_v43  ;;  %11291 = vst [vmem:[#allocation56_spill] sm:$0xff] %v10284_v46  ;;  %v6019_v46 = vld [vmem:[#allocation2 + $0x388] sm:$0xf0] }
 0x33e   : > { %v3782_v50 = vpop.f32.mrf.mxu3 }
 0x33f   : > { %v10276_v57 = vadd.f32 %v3782_v50, %v10056_v24  ;;  %v3696_v24 = vadd.f32 %v10062_v3, %v3607_v32  ;;  %v6043_v50 = vld [vmem:[#allocation2 + $0x44c] sm:$0xf] }
 0x340   : > { %v10278_v6 = vpop.f32.mrf.mxu1  ;;  %v5543_v39 = vor.u32 %v6043_v50, %v5540_v9  ;;  %v3612_v9 = vadd.f32 %v10217_v27, %v10069_v19  ;;  %v5914_v19 = vld [vmem:[#allocation2 + $0x40] sm:$0xf0] }
 0x341   : > { %11289 = vst [vmem:[#allocation54_spill] sm:$0xff] %v10278_v6  ;;  %v5387_v6 = vor.u32 %v6010_v22, %v5386_v7  ;;  %v10291_v21 = vpop.f32.mrf.mxu2  ;;  %v5422_v7 = vld [vmem:[#allocation2 + $0x368] sm:$0xf] }
 0x343   : > { %4019 = vmatmul.bf16.gmra.mxu1 %v5503_v38  ;;  %v5538_v38 = vld [vmem:[#allocation2 + $0x448] sm:$0xf]  ;;  %v10293_v28 = vpop.f32.mrf.mxu0 }
 0x344   : > { %4266 = vmatmul.bf16.gmra.mxu0 %v5371_v18  ;;  %v6008_v18 = vld [vmem:[#allocation2 + $0x334] sm:$0xf] }
 0x346   : > { %v3784_v15 = vpop.f32.mrf.mxu3 }
 0x347   : > { %v10287_v2 = vadd.f32 %v3784_v15, %v3696_v24  ;;  %v5404_v24 = vld [vmem:[#allocation2 + $0x354] sm:$0xf0]  ;;  %v5539_v15 = vor.u32 %v6047_v54, %v5538_v38  ;;  %v5423_v38 = vor.u32 %v6019_v46, %v5422_v7  ;;  %v6098_v54 = vld [vmem:[#allocation8 + $0x180] sm:$0xff] }
 0x348   : > { %v10289_v52 = vpop.f32.mrf.mxu1  ;;  %v5407_v22 = vor.u32 %v6008_v18, %v5404_v24  ;;  %4126 = vmatpush.bf16.msra.mxu3 %v6098_v54  ;;  %v5458_v54 = vld [vmem:[#allocation2 + $0x3b0] sm:$0xf] }
 0x349   : > { %11292 = vst [vmem:[#allocation57_spill] sm:$0xff] %v10289_v52 }
 0x34b   : > { %3826 = vmatmul.bf16.gmra.mxu3 %v5387_v6  ;;  %4113 = vmatmul.bf16.gmra.mxu2 %v5543_v39  ;;  %v6127_v6 = vld [vmem:[#allocation9 + $0x28] sm:$0xff]  ;;  %v3701_v39 = vadd.f32 %v10073_v33, %v3612_v9  ;;  %v5440_v9 = vld [vmem:[#allocation2 + $0x39c] sm:$0xf0] }
 0x34c   : > { %4504 = vmatpush.bf16.msra.mxu2 %v6127_v6 }
 0x34e   : > { %v3787_v3 = vpop.f32.mrf.mxu3 }
 0x34f   : > { %v10296_v32 = vadd.f32 %v3787_v3, %v10067_v47 }
 0x350   : > { %v10298_v43 = vpop.f32.mrf.mxu1 }
 0x351   : > { %11293 = vst [vmem:[#allocation58_spill] sm:$0xff] %v10298_v43  ;;  %v10307_v43 = vpop.f32.mrf.mxu0 }
 0x353   : > { %4024 = vmatmul.bf16.gmra.mxu1 %v5539_v15  ;;  %v6017_v15 = vld [vmem:[#allocation2 + $0x37c] sm:$0xf] }
 0x354   : > { %4271 = vmatmul.bf16.gmra.mxu0 %v5407_v22  ;;  %v5014_v22 = vld [vmem:[#allocation2 + $0x20] sm:$0xf]  ;;  %v5443_v46 = vor.u32 %v6017_v15, %v5440_v9  ;;  %v6026_v9 = vld [vmem:[#allocation2 + $0x3c4] sm:$0xf] }
 0x355   : > { %v5015_v6 = vor.u32 %v5914_v19, %v5014_v22  ;;  %v5923_v22 = vld [vmem:[#allocation2 + $0x88] sm:$0xf0] }
 0x356   : > { %v3789_v50 = vpop.f32.mrf.mxu3 }
 0x357   : > { %v10303_v47 = vadd.f32 %v3789_v50, %v3701_v39  ;;  %v3617_v39 = vadd.f32 %v10217_v27, %v10080_v60 }
 0x358   : > { %v10305_v3 = vpop.f32.mrf.mxu1 }
 0x359   : > { %11294 = vst [vmem:[#allocation59_spill] sm:$0xff] %v10305_v3  ;;  %v10316_v50 = vpop.f32.mrf.mxu0  ;;  %v3706_v7 = vadd.f32 %v10082_v1, %v3617_v39  ;;  %v5476_v1 = vld [vmem:[#allocation2 + $0x3e4] sm:$0xf0] }
 0x35b   : > { %3831 = vmatmul.bf16.gmra.mxu3 %v5423_v38 }
 0x35e   : > { %v3792_v18 = vpop.f32.mrf.mxu3 }
 0x35f   : > { %v10310_v24 = vadd.f32 %v3792_v18, %v10078_v45  ;;  %v6028_v45 = vld [vmem:[#allocation2 + $0x3d0] sm:$0xf0] }
 0x360   : > { %v10312_v33 = vpop.f32.mrf.mxu1  ;;  %v5459_v3 = vor.u32 %v6028_v45, %v5458_v54  ;;  %v5494_v54 = vld [vmem:[#allocation2 + $0x3f8] sm:$0xf]  ;;  %v6037_v45 = vld [vmem:[#allocation2 + $0x418] sm:$0xf0] }
 0x361   : > { %11295 = vst [vmem:[#allocation60_spill] sm:$0xff] %v10312_v33  ;;  %v10323_v19 = vpop.f32.mrf.mxu0 }
 0x363   : > { %4305 = vmatmul.bf16.vlgmr.msra.gmra.mxu1 %v5015_v6  ;;  %v5050_v6 = vld [vmem:[#allocation2 + $0x68] sm:$0xf] }
 0x364   : > { %4276 = vmatmul.bf16.gmra.mxu0 %v5443_v46  ;;  %v5051_v39 = vor.u32 %v5923_v22, %v5050_v6  ;;  %v5479_v46 = vor.u32 %v6026_v9, %v5476_v1  ;;  %v6035_v1 = vld [vmem:[#allocation2 + $0x40c] sm:$0xf]  ;;  %v5512_v6 = vld [vmem:[#allocation2 + $0x42c] sm:$0xf0] }
 0x366   : > { %v3794_v38 = vpop.f32.mrf.mxu3 }
 0x367   : > { %v10319_v18 = vadd.f32 %v3794_v38, %v3706_v7  ;;  %v6126_v7 = vld [vmem:[#allocation9 + $0x20] sm:$0xff] }
 0x368   : > { %v10321_v33 = vpop.f32.mrf.mxu1  ;;  %4505 = vmatpush.bf16.msra.mxu2 %v6126_v7 }
 0x369   : > { %11296 = vst [vmem:[#allocation61_spill] sm:$0xff] %v10321_v33  ;;  %v10330_v38 = vpop.f32.mrf.mxu0 }
 0x36b   : > { %3836 = vmatmul.bf16.gmra.mxu3 %v5459_v3 }
 0x36e   : > { %v3797_v60 = vpop.f32.mrf.mxu3 }
 0x36f   : > { %v10326_v27 = vadd.f32 %v3797_v60, %v10089_v58  ;;  %v5495_v60 = vor.u32 %v6037_v45, %v5494_v54  ;;  %v6046_v54 = vld [vmem:[#allocation2 + $0x460] sm:$0xf0] }
 0x370   : > { %v10328_v15 = vpop.f32.mrf.mxu1 }
 0x371   : > { %11297 = vst [vmem:[#allocation62_spill] sm:$0xff] %v10326_v27  ;;  %v5515_v27 = vor.u32 %v6035_v1, %v5512_v6  ;;  %v5122_v1 = vld [vmem:[#allocation2 + $0xf8] sm:$0xf] }
 0x372   : > { %11298 = vst [vmem:[#allocation63_spill] sm:$0xff] %v10328_v15  ;;  %v5932_v15 = vld [vmem:[#allocation2 + $0xd0] sm:$0xf0] }
 0x373   : > { %4310 = vmatmul.bf16.gmra.mxu1 %v5051_v39  ;;  %v5086_v39 = vld [vmem:[#allocation2 + $0xb0] sm:$0xf] }
 0x374   : > { %4281 = vmatmul.bf16.gmra.mxu0 %v5479_v46  ;;  %v10342_v46 = vpop.f32.mrf.mxu0  ;;  %v5087_v7 = vor.u32 %v5932_v15, %v5086_v39  ;;  %v6044_v39 = vld [vmem:[#allocation2 + $0x454] sm:$0xf] }
 0x376   : > { %v3799_v3 = vpop.f32.mrf.mxu3 }
 0x377   : > { %v10333_v33 = vadd.f32 %v3799_v3, %v10092_v35  ;;  %v5530_v3 = vld [vmem:[#allocation2 + $0x440] sm:$0xf] }
 0x378   : > { %v10335_v58 = vpop.f32.mrf.mxu1 }
 0x379   : > { %11299 = vst [vmem:[#allocation64_spill] sm:$0xff] %v10335_v58 }
 0x37b   : > { %3841 = vmatmul.bf16.gmra.mxu3 %v5495_v60 }
 0x37e   : > { %v3802_v52 = vpop.f32.mrf.mxu3 }
 0x37f   : > { %v10338_v22 = vadd.f32 %v3802_v52, %v10097_v8  ;;  %v5531_v8 = vor.u32 %v6046_v54, %v5530_v3  ;;  %v10349_v52 = vpop.f32.mrf.mxu0  ;;  %v5913_v54 = vld [vmem:[#allocation2 + $0x38] sm:$0xf0] }
 0x380   : > { %v10340_v9 = vpop.f32.mrf.mxu1 }
 0x381   : > { %11300 = vst [vmem:[#allocation65_spill] sm:$0xff] %v10338_v22 }
 0x382   : > { %11301 = vst [vmem:[#allocation66_spill] sm:$0xff] %v10340_v9  ;;  %v5941_v9 = vld [vmem:[#allocation2 + $0x118] sm:$0xf0] }
 0x383   : > { %4315 = vmatmul.bf16.gmra.mxu1 %v5087_v7  ;;  %v5123_v6 = vor.u32 %v5941_v9, %v5122_v1 }
 0x384   : > { %4286 = vmatmul.bf16.gmra.mxu0 %v5515_v27  ;;  %v5548_v27 = vld [vmem:[#allocation2 + $0x474] sm:$0xf0] }
 0x385   : > { %v5551_v7 = vor.u32 %v6044_v39, %v5548_v27 }
 0x386   : > { %v3804_v35 = vpop.f32.mrf.mxu3 }
 0x387   : > { %v10345_v45 = vadd.f32 %v3804_v35, %v10102_v44  ;;  %v6125_v44 = vld [vmem:[#allocation9 + $0x18] sm:$0xff]  ;;  %v10356_v35 = vpop.f32.mrf.mxu0 }
 0x388   : > { %v10347_v60 = vpop.f32.mrf.mxu1  ;;  %4506 = vmatpush.bf16.msra.mxu2 %v6125_v44  ;;  %v5922_v44 = vld [vmem:[#allocation2 + $0x80] sm:$0xf0] }
 0x389   : > { %11302 = vst [vmem:[#allocation67_spill] sm:$0xff] %v10347_v60  ;;  %v5950_v60 = vld [vmem:[#allocation2 + $0x160] sm:$0xf0] }
 0x38b   : > { %3846 = vmatmul.bf16.gmra.mxu3 %v5531_v8 }
 0x38e   : > { %v3807_v58 = vpop.f32.mrf.mxu3 }
 0x38f   : > { %v10352_v22 = vadd.f32 %v3807_v58, %v10107_v48  ;;  %v5006_v58 = vld [vmem:[#allocation2 + $0x18] sm:$0xf] }
 0x390   : > { %v10354_v15 = vpop.f32.mrf.mxu1 }
 0x391   : > { %11303 = vst [vmem:[#allocation68_spill] sm:$0xff] %v10354_v15  ;;  %v5007_v15 = vor.u32 %v5913_v54, %v5006_v58 }
 0x393   : > { %4320 = vmatmul.bf16.gmra.mxu1 %v5123_v6  ;;  %v5158_v6 = vld [vmem:[#allocation2 + $0x140] sm:$0xf] }
 0x394   : > { %4291 = vmatmul.bf16.gmra.mxu0 %v5551_v7  ;;  %v5159_v39 = vor.u32 %v5950_v60, %v5158_v6  ;;  %v6124_v6 = vld [vmem:[#allocation9 + $0x10] sm:$0xff] }
 0x395   : > { %4507 = vmatpush.bf16.msra.mxu2 %v6124_v6 }
 0x396   : > { %v3809_v3 = vpop.f32.mrf.mxu3 }
 0x397   : > { %v10359_v8 = vadd.f32 %v3809_v3, %v10112_v29 }
 0x398   : > { %v10361_v48 = vpop.f32.mrf.mxu1 }
 0x399   : > { %11304 = vst [vmem:[#allocation69_spill] sm:$0xff] %v10361_v48  ;;  %v5042_v48 = vld [vmem:[#allocation2 + $0x60] sm:$0xf] }
 0x39a   : > { %v5043_v54 = vor.u32 %v5922_v44, %v5042_v48  ;;  %v5078_v48 = vld [vmem:[#allocation2 + $0xa8] sm:$0xf] }
 0x39b   : > { %4127 = vmatmul.bf16.vlgmr.msra.gmra.mxu3 %v5007_v15  ;;  %v5959_v15 = vld [vmem:[#allocation2 + $0x1a8] sm:$0xf0] }
 0x39e   : > { %v3812_v9 = vpop.f32.mrf.mxu3 }
 0x39f   : > { %v10364_v27 = vadd.f32 %v3812_v9, %v10117_v16 }
 0x3a0   : > { %v10366_v1 = vpop.f32.mrf.mxu1 }
 0x3a1   : > { %11305 = vst [vmem:[#allocation70_spill] sm:$0xff] %v10366_v1  ;;  %v5194_v1 = vld [vmem:[#allocation2 + $0x188] sm:$0xf] }
 0x3a2   : > { %v5195_v60 = vor.u32 %v5959_v15, %v5194_v1  ;;  %v5230_v1 = vld [vmem:[#allocation2 + $0x1d0] sm:$0xf] }
 0x3a3   : > { %4325 = vmatmul.bf16.gmra.mxu1 %v5159_v39 }
 0x3a6   : > { %v3814_v7 = vpop.f32.mrf.mxu3 }
 0x3a7   : > { %v10369_v29 = vadd.f32 %v3814_v7, %v10124_v4  ;;  %v5931_v4 = vld [vmem:[#allocation2 + $0xc8] sm:$0xf0] }
 0x3a8   : > { %v10371_v3 = vpop.f32.mrf.mxu1  ;;  %v5079_v44 = vor.u32 %v5931_v4, %v5078_v48  ;;  %v5114_v4 = vld [vmem:[#allocation2 + $0xf0] sm:$0xf] }
 0x3a9   : > { %11306 = vst [vmem:[#allocation71_spill] sm:$0xff] %v10369_v29 }
 0x3aa   : > { %11307 = vst [vmem:[#allocation72_spill] sm:$0xff] %v10371_v3 }
 0x3ab   : > { %4132 = vmatmul.bf16.gmra.mxu3 %v5043_v54  ;;  %v5968_v54 = vld [vmem:[#allocation2 + $0x1f0] sm:$0xf0] }
 0x3ac   : > { %v5231_v15 = vor.u32 %v5968_v54, %v5230_v1  ;;  %v5266_v54 = vld [vmem:[#allocation2 + $0x218] sm:$0xf] }
 0x3ae   : > { %v3817_v58 = vpop.f32.mrf.mxu3 }
 0x3af   : > { %v10374_v16 = vadd.f32 %v3817_v58, %v10131_v23 }
 0x3b0   : > { %v10376_v9 = vpop.f32.mrf.mxu1 }
 0x3b1   : > { %11308 = vst [vmem:[#allocation73_spill] sm:$0xff] %v10374_v16 }
 0x3b2   : > { %11309 = vst [vmem:[#allocation74_spill] sm:$0xff] %v10376_v9 }
 0x3b3   : > { %4330 = vmatmul.bf16.gmra.mxu1 %v5195_v60  ;;  %v10388_v60 = vpop.f32.mrf.mxu2 }
 0x3b6   : > { %v3819_v39 = vpop.f32.mrf.mxu3 }
 0x3b7   : > { %v10379_v7 = vadd.f32 %v3819_v39, %v10138_v56  ;;  %v5940_v56 = vld [vmem:[#allocation2 + $0x110] sm:$0xf0] }
 0x3b8   : > { %v10381_v3 = vpop.f32.mrf.mxu1  ;;  %v5115_v48 = vor.u32 %v5940_v56, %v5114_v4  ;;  %v5150_v56 = vld [vmem:[#allocation2 + $0x138] sm:$0xf] }
 0x3b9   : > { %11310 = vst [vmem:[#allocation75_spill] sm:$0xff] %v10379_v7  ;;  %v5374_v7 = vld [vmem:[#allocation2 + $0x2f0] sm:$0xf] }
 0x3ba   : > { %11311 = vst [vmem:[#allocation76_spill] sm:$0xff] %v10381_v3 }
 0x3bb   : > { %4137 = vmatmul.bf16.gmra.mxu3 %v5079_v44  ;;  %v5977_v44 = vld [vmem:[#allocation2 + $0x238] sm:$0xf0] }
 0x3be   : > { %v3822_v23 = vpop.f32.mrf.mxu3 }
 0x3bf   : > { %v10384_v58 = vadd.f32 %v3822_v23, %v10145_v13  ;;  %v10395_v23 = vpop.f32.mrf.mxu2 }
 0x3c0   : > { %v10386_v9 = vpop.f32.mrf.mxu1 }
 0x3c1   : > { %11312 = vst [vmem:[#allocation77_spill] sm:$0xff] %v10384_v58  ;;  %v6123_v58 = vld [vmem:[#allocation9 + $0x8] sm:$0xff] }
 0x3c2   : > { %11313 = vst [vmem:[#allocation78_spill] sm:$0xff] %v10386_v9  ;;  %4508 = vmatpush.bf16.msra.mxu2 %v6123_v58 }
 0x3c3   : > { %4335 = vmatmul.bf16.gmra.mxu1 %v5231_v15  ;;  %v5267_v15 = vor.u32 %v5977_v44, %v5266_v54  ;;  %v5302_v44 = vld [vmem:[#allocation2 + $0x260] sm:$0xf] }
 0x3c6   : > { %v3824_v6 = vpop.f32.mrf.mxu3 }
 0x3c7   : > { %v10391_v39 = vadd.f32 %v3824_v6, %v10150_v30  ;;  %v5949_v6 = vld [vmem:[#allocation2 + $0x158] sm:$0xf0]  ;;  %v10405_v4 = vpop.f32.mrf.mxu2 }
 0x3c8   : > { %v10393_v3 = vpop.f32.mrf.mxu1 }
 0x3c9   : > { %11314 = vst [vmem:[#allocation79_spill] sm:$0xff] %v10391_v39 }
 0x3ca   : > { %11315 = vst [vmem:[#allocation80_spill] sm:$0xff] %v10393_v3 }
 0x3cb   : > { %4142 = vmatmul.bf16.gmra.mxu3 %v5115_v48  ;;  %v5151_v48 = vor.u32 %v5949_v6, %v5150_v56  ;;  %v5186_v6 = vld [vmem:[#allocation2 + $0x180] sm:$0xf] }
 0x3ce   : > { %v3827_v13 = vpop.f32.mrf.mxu3 }
 0x3cf   : > { %v10398_v9 = vadd.f32 %v3827_v13, %v10157_v11  ;;  %v5986_v11 = vld [vmem:[#allocation2 + $0x280] sm:$0xf0]  ;;  %v10412_v58 = vpop.f32.mrf.mxu2 }
 0x3d0   : > { %v10400_v1 = vpop.f32.mrf.mxu1  ;;  %v5303_v54 = vor.u32 %v5986_v11, %v5302_v44  ;;  %v5338_v44 = vld [vmem:[#allocation2 + $0x2a8] sm:$0xf] }
 0x3d1   : > { %11316 = vst [vmem:[#allocation81_spill] sm:$0xff] %v10398_v9  ;;  %v5995_v9 = vld [vmem:[#allocation2 + $0x2c8] sm:$0xf0] }
 0x3d2   : > { %11317 = vst [vmem:[#allocation82_spill] sm:$0xff] %v10400_v1 }
 0x3d3   : > { %4340 = vmatmul.bf16.gmra.mxu1 %v5267_v15 }
 0x3d6   : > { %v3829_v30 = vpop.f32.mrf.mxu3 }
 0x3d7   : > { %v10403_v3 = vadd.f32 %v3829_v30, %v10164_v40  ;;  %v5958_v30 = vld [vmem:[#allocation2 + $0x1a0] sm:$0xf0] }
 0x3d8   : > { %v10407_v39 = vpop.f32.mrf.mxu1  ;;  %v5187_v56 = vor.u32 %v5958_v30, %v5186_v6 }
 0x3d9   : > { %11318 = vst [vmem:[#allocation83_spill] sm:$0xff] %v10403_v3 }
 0x3da   : > { %11319 = vst [vmem:[#allocation84_spill] sm:$0xff] %v10407_v39 }
 0x3db   : > { %4147 = vmatmul.bf16.gmra.mxu3 %v5151_v48  ;;  %v10419_v48 = vpop.f32.mrf.mxu2 }
 0x3de   : > { %v3832_v13 = vpop.f32.mrf.mxu3 }
 0x3df   : > { %v10410_v1 = vadd.f32 %v3832_v13, %v10168_v55 }
 0x3e0   : > { %v10414_v15 = vpop.f32.mrf.mxu1 }
 0x3e1   : > { %11320 = vst [vmem:[#allocation85_spill] sm:$0xff] %v10410_v1  ;;  %v6122_v1 = vld [vmem:[#allocation9] sm:$0xff] }
 0x3e2   : > { %4509 = vmatpush.bf16.msra.mxu2 %v6122_v1 }
 0x3e3   : > { %4345 = vmatmul.bf16.gmra.mxu1 %v5303_v54  ;;  %v5339_v54 = vor.u32 %v5995_v9, %v5338_v44 }
 0x3e6   : > { %v3834_v40 = vpop.f32.mrf.mxu3 }
 0x3e7   : > { %v10417_v3 = vadd.f32 %v3834_v40, %v10176_v0  ;;  %v5967_v0 = vld [vmem:[#allocation2 + $0x1e8] sm:$0xf0]  ;;  %v10426_v40 = vpop.f32.mrf.mxu2 }
 0x3e8   : > { %v10421_v55 = vpop.f32.mrf.mxu1 }
 0x3e9   : > { %11321 = vst [vmem:[#allocation86_spill] sm:$0xff] %v10417_v3 }
 0x3eb   : > { %4152 = vmatmul.bf16.gmra.mxu3 %v5187_v56  ;;  %v5222_v56 = vld [vmem:[#allocation2 + $0x1c8] sm:$0xf] }
 0x3ec   : > { %v5223_v3 = vor.u32 %v5967_v0, %v5222_v56 }
 0x3ee   : > { %v3837_v13 = vpop.f32.mrf.mxu3 }
 0x3ef   : > { %v10424_v11 = vadd.f32 %v3837_v13, %v10184_v14  ;;  %v6004_v14 = vld [vmem:[#allocation2 + $0x310] sm:$0xf0]  ;;  %v10436_v1 = vpop.f32.mrf.mxu2 }
 0x3f0   : > { %v10431_v6 = vpop.f32.mrf.mxu1  ;;  %v5375_v44 = vor.u32 %v6004_v14, %v5374_v7 }
 0x3f1   : > { %11322 = vst [vmem:[#allocation87_spill] sm:$0xff] %v10424_v11 }
 0x3f3   : > { %4350 = vmatmul.bf16.gmra.mxu1 %v5339_v54 }
 0x3f6   : > { %v3839_v39 = vpop.f32.mrf.mxu3 }
 0x3f7   : > { %v10429_v30 = vadd.f32 %v3839_v39, %v10192_v12  ;;  %v5976_v12 = vld [vmem:[#allocation2 + $0x230] sm:$0xf0] }
 0x3f8   : > { %v10438_v54 = vpop.f32.mrf.mxu1 }
 0x3f9   : > { %11323 = vst [vmem:[#allocation88_spill] sm:$0xff] %v10429_v30  ;;  %v5258_v30 = vld [vmem:[#allocation2 + $0x210] sm:$0xf] }
 0x3fa   : > { %v5259_v0 = vor.u32 %v5976_v12, %v5258_v30  ;;  %v3862_v30 = vadd.f32 %v9996_v10, %v10240_v51 }
 0x3fb   : > { %4157 = vmatmul.bf16.gmra.mxu3 %v5223_v3  ;;  %v10443_v3 = vpop.f32.mrf.mxu2 }
 0x3fe   : > { %v3842_v13 = vpop.f32.mrf.mxu3 }
 0x3ff   : > { %v10434_v9 = vadd.f32 %v3842_v13, %v10200_v49  ;;  %v5410_v49 = vld [vmem:[#allocation2 + $0x338] sm:$0xf]  ;;  %v6013_v13 = vld [vmem:[#allocation2 + $0x358] sm:$0xf0] }
 0x400   : > { %v10445_v56 = vpop.f32.mrf.mxu1 }
 0x401   : > { %11324 = vst [vmem:[#allocation89_spill] sm:$0xff] %v10434_v9  ;;  %v5411_v9 = vor.u32 %v6013_v13, %v5410_v49  ;;  %v5446_v49 = vld [vmem:[#allocation2 + $0x380] sm:$0xf]  ;;  %v6022_v13 = vld [vmem:[#allocation2 + $0x3a0] sm:$0xf0] }
 0x402   : > { %v5447_v10 = vor.u32 %v6022_v13, %v5446_v49  ;;  %v5482_v49 = vld [vmem:[#allocation2 + $0x3c8] sm:$0xf]  ;;  %v6031_v13 = vld [vmem:[#allocation2 + $0x3e8] sm:$0xf0] }
 0x403   : > { %4355 = vmatmul.bf16.gmra.mxu1 %v5375_v44  ;;  %v10450_v44 = vpop.f32.mrf.mxu2 }
 0x404   : > { %11327 = vst [vmem:[#allocation92_spill] sm:$0xff] %v10450_v44 }
 0x406   : > { %v3844_v11 = vpop.f32.mrf.mxu3 }
 0x407   : > { %v10441_v39 = vadd.f32 %v3844_v11, %v10208_v31  ;;  %v5985_v11 = vld [vmem:[#allocation2 + $0x278] sm:$0xf0] }
 0x408   : > { %v10452_v16 = vpop.f32.mrf.mxu1 }
 0x409   : > { %11325 = vst [vmem:[#allocation90_spill] sm:$0xff] %v10441_v39 }
 0x40b   : > { %4162 = vmatmul.bf16.gmra.mxu3 %v5259_v0  ;;  %v5294_v0 = vld [vmem:[#allocation2 + $0x258] sm:$0xf] }
 0x40c   : > { %v5295_v39 = vor.u32 %v5985_v11, %v5294_v0 }
 0x40e   : > { %v3847_v7 = vpop.f32.mrf.mxu3 }
 0x40f   : > { %v10448_v14 = vadd.f32 %v3847_v7, %v10223_v17  ;;  %v3951_v17 = vadd.f32 %v10170_v5, %v3862_v30  ;;  %v5330_v30 = vld [vmem:[#allocation2 + $0x2a0] sm:$0xf] }
 0x410   : > { %v10465_v29 = vpop.f32.mrf.mxu1 }
 0x411   : > { %11326 = vst [vmem:[#allocation91_spill] sm:$0xff] %v10448_v14  ;;  %v10462_v14 = vpop.f32.mrf.mxu2  ;;  %v4040_v44 = vadd.f32 %v10206_v42, %v3951_v17 }
 0x413   : > { %4360 = vmatmul.bf16.gmra.mxu1 %v5411_v9  ;;  %v3864_v9 = vadd.f32 %v10038_v61, %v10251_v41  ;;  %v5994_v61 = vld [vmem:[#allocation2 + $0x2c0] sm:$0xf0]  ;;  %v3867_v41 = vadd.f32 %v10042_v53, %v10258_v25 }
 0x414   : > { %v5331_v17 = vor.u32 %v5994_v61, %v5330_v30  ;;  %v6003_v61 = vld [vmem:[#allocation2 + $0x308] sm:$0xf0]  ;;  %v5366_v30 = vld [vmem:[#allocation2 + $0x2e8] sm:$0xf] }
 0x415   : > { %v3953_v51 = vadd.f32 %v10178_v59, %v3864_v9  ;;  %v3869_v9 = vadd.f32 %v10049_v26, %v10269_v36  ;;  %v11328_v36 = vld [vmem:[#allocation45_spill] sm:$0xff] }
 0x416   : > { %v3849_v31 = vpop.f32.mrf.mxu3 }
 0x417   : > { %v10457_v12 = vadd.f32 %v3849_v31, %v10231_v63  ;;  %v4042_v5 = vadd.f32 %v10221_v62, %v3953_v51  ;;  %v3956_v62 = vadd.f32 %v10186_v37, %v3867_v41  ;;  %v3958_v51 = vadd.f32 %v10194_v34, %v3869_v9  ;;  %v11331_v9 = vld [vmem:[#allocation23_spill] sm:$0xff] }
 0x418   : > { %v10476_v59 = vpop.f32.mrf.mxu1 }
 0x419   : > { %v10472_v0 = vpop.f32.mrf.mxu2 }
 0x41b   : > { %4167 = vmatmul.bf16.gmra.mxu3 %v5295_v39 }
 0x41e   : > { %v4128_v7 = vpop.f32.mrf.mxu3 }
 0x41f   : > { %v4129_v63 = vadd.f32 %v4128_v7, %v4040_v44 }
 0x421   : > { %v4218_v39 = vadd.f32 %v10293_v28, %v4129_v63  ;;  %v10486_v37 = vpop.f32.mrf.mxu2 }
 0x423   : > { %4365 = vmatmul.bf16.gmra.mxu1 %v5447_v10  ;;  %v4307_v42 = vadd.f32 %v10414_v15, %v4218_v39  ;;  %v4045_v15 = vadd.f32 %v10235_v20, %v3956_v62  ;;  %v10488_v39 = vpop.f32.mrf.mxu1  ;;  %v11329_v20 = vld [vmem:[#allocation20_spill] sm:$0xff] }
 0x424   : > { %v3872_v41 = vadd.f32 %v11329_v20, %v10276_v57  ;;  %v5402_v20 = vld [vmem:[#allocation2 + $0x330] sm:$0xf] }
 0x425   : > { %v4386_v53 = vmax.f32 %v4307_v42, 0.0 }
 0x426   : > { %v4130_v31 = vpop.f32.mrf.mxu3 }
 0x427   : > { %v4131_v11 = vadd.f32 %v4130_v31, %v4042_v5  ;;  %v4047_v5 = vadd.f32 %v11328_v36, %v3958_v51  ;;  %v11333_v51 = vld [vmem:[#allocation38_spill] sm:$0xff]  ;;  %v11334_v36 = vld [vmem:[#allocation51_spill] sm:$0xff] }
 0x429   : > { %v4220_v44 = vadd.f32 %v10307_v43, %v4131_v11  ;;  %v5483_v43 = vor.u32 %v6031_v13, %v5482_v49  ;;  %v5518_v49 = vld [vmem:[#allocation2 + $0x410] sm:$0xf]  ;;  %v6040_v13 = vld [vmem:[#allocation2 + $0x430] sm:$0xf0] }
 0x42b   : > { %v4309_v28 = vadd.f32 %v10421_v55, %v4220_v44  ;;  %4172 = vmatmul.bf16.gmra.mxu3 %v5331_v17  ;;  %v10484_v55 = vpop.f32.mrf.mxu0  ;;  %v5367_v44 = vor.u32 %v6003_v61, %v5366_v30 }
 0x42d   : > { %v4387_v25 = vmax.f32 %v4309_v28, 0.0  ;;  %v11330_v28 = vld [vmem:[#allocation37_spill] sm:$0xff] }
 0x42e   : > { %v4133_v7 = vpop.f32.mrf.mxu3  ;;  %v3961_v62 = vadd.f32 %v11330_v28, %v3872_v41  ;;  %v11335_v41 = vld [vmem:[#allocation24_spill] sm:$0xff] }
 0x42f   : > { %v4418_v10 = vpack.c.bf16 %v4387_v25, %v4386_v53  ;;  %v4134_v63 = vadd.f32 %v4133_v7, %v4045_v15  ;;  %v3874_v53 = vadd.f32 %v11331_v9, %v10287_v2  ;;  %v10502_v25 = vpop.f32.mrf.mxu2  ;;  %v11336_v9 = vld [vmem:[#allocation40_spill] sm:$0xff] }
 0x431   : > { %4510 = vmatmul.bf16.vlgmr.msra.gmra.mxu2 %v4418_v10  ;;  %v4223_v26 = vadd.f32 %v10316_v50, %v4134_v63  ;;  %v11332_v10 = vld [vmem:[#allocation48_spill] sm:$0xff] }
 0x432   : > { %v4050_v15 = vadd.f32 %v11332_v10, %v3961_v62  ;;  %v11338_v10 = vld [vmem:[#allocation55_spill] sm:$0xff] }
 0x433   : > { %4370 = vmatmul.bf16.gmra.mxu1 %v5483_v43  ;;  %v4312_v34 = vadd.f32 %v10431_v6, %v4223_v26  ;;  %v10498_v50 = vpop.f32.mrf.mxu0  ;;  %v10504_v6 = vpop.f32.mrf.mxu1  ;;  %v5519_v43 = vor.u32 %v6040_v13, %v5518_v49  ;;  %v3963_v26 = vadd.f32 %v11333_v51, %v3874_v53  ;;  %v6049_v13 = vld [vmem:[#allocation2 + $0x478] sm:$0xf0]  ;;  %v11339_v51 = vld [vmem:[#allocation42_spill] sm:$0xff] }
 0x435   : > { %v4388_v57 = vmax.f32 %v4312_v34, 0.0 }
 0x436   : > { %v4135_v31 = vpop.f32.mrf.mxu3 }
 0x437   : > { %v4136_v11 = vadd.f32 %v4135_v31, %v4047_v5  ;;  %v4052_v5 = vadd.f32 %v11334_v36, %v3963_v26  ;;  %v10514_v30 = vpop.f32.mrf.mxu2 }
 0x439   : > { %v4225_v42 = vadd.f32 %v10323_v19, %v4136_v11  ;;  %v3877_v11 = vadd.f32 %v11335_v41, %v10296_v32  ;;  %v11340_v41 = vld [vmem:[#allocation22_spill] sm:$0xff] }
 0x43b   : > { %v4314_v17 = vadd.f32 %v10438_v54, %v4225_v42  ;;  %4177 = vmatmul.bf16.gmra.mxu3 %v5367_v44  ;;  %v10510_v31 = vpop.f32.mrf.mxu0  ;;  %v10516_v42 = vpop.f32.mrf.mxu1  ;;  %v6012_v44 = vld [vmem:[#allocation2 + $0x350] sm:$0xf0]  ;;  %v3966_v53 = vadd.f32 %v11336_v9, %v3877_v11  ;;  %v3882_v11 = vadd.f32 %v11340_v41, %v10310_v24 }
 0x43d   : > { %v4389_v7 = vmax.f32 %v4314_v17, 0.0 }
 0x43e   : > { %v4138_v19 = vpop.f32.mrf.mxu3 }
 0x43f   : > { %v4419_v54 = vpack.c.bf16 %v4389_v7, %v4388_v57  ;;  %v4139_v63 = vadd.f32 %v4138_v19, %v4050_v15  ;;  %v11337_v57 = vld [vmem:[#allocation18_spill] sm:$0xff]  ;;  %v4055_v15 = vadd.f32 %v11338_v10, %v3966_v53 }
 0x440   : > { %v3879_v49 = vadd.f32 %v11337_v57, %v10303_v47  ;;  %v11342_v57 = vld [vmem:[#allocation19_spill] sm:$0xff] }
 0x441   : > { %4515 = vmatmul.bf16.gmra.mxu2 %v4419_v54  ;;  %v4228_v2 = vadd.f32 %v10330_v38, %v4139_v63  ;;  %v5403_v38 = vor.u32 %v6012_v44, %v5402_v20  ;;  %v5554_v54 = vld [vmem:[#allocation2 + $0x458] sm:$0xf]  ;;  %v10527_v63 = vpop.f32.mrf.mxu2  ;;  %v6021_v20 = vld [vmem:[#allocation2 + $0x398] sm:$0xf0]  ;;  %v3884_v24 = vadd.f32 %v11342_v57, %v10319_v18 }
 0x442   : > { %v3968_v26 = vadd.f32 %v11339_v51, %v3879_v49  ;;  %v6030_v51 = vld [vmem:[#allocation2 + $0x3e0] sm:$0xf0] }
 0x443   : > { %4375 = vmatmul.bf16.gmra.mxu1 %v5519_v43  ;;  %v4317_v17 = vadd.f32 %v10445_v56, %v4228_v2  ;;  %v10525_v56 = vpop.f32.mrf.mxu0  ;;  %v10530_v2 = vpop.f32.mrf.mxu1 }
 0x444   : > { %v4057_v36 = vadd.f32 %v10291_v21, %v3968_v26  ;;  %v11341_v21 = vld [vmem:[#allocation44_spill] sm:$0xff]  ;;  %v11344_v26 = vld [vmem:[#allocation62_spill] sm:$0xff] }
 0x445   : > { %v4390_v32 = vmax.f32 %v4317_v17, 0.0  ;;  %v3971_v9 = vadd.f32 %v11341_v21, %v3882_v11  ;;  %v11346_v11 = vld [vmem:[#allocation49_spill] sm:$0xff] }
 0x446   : > { %v4140_v61 = vpop.f32.mrf.mxu3 }
 0x447   : > { %v4141_v34 = vadd.f32 %v4140_v61, %v4052_v5  ;;  %v5438_v61 = vld [vmem:[#allocation2 + $0x378] sm:$0xf] }
 0x449   : > { %v4230_v28 = vadd.f32 %v10342_v46, %v4141_v34  ;;  %v5555_v46 = vor.u32 %v6049_v13, %v5554_v54 }
 0x44b   : > { %v4319_v62 = vadd.f32 %v10452_v16, %v4230_v28  ;;  %4182 = vmatmul.bf16.gmra.mxu3 %v5403_v38  ;;  %v5439_v28 = vor.u32 %v6021_v20, %v5438_v61  ;;  %v10538_v38 = vpop.f32.mrf.mxu0  ;;  %v10544_v53 = vpop.f32.mrf.mxu1 }
 0x44d   : > { %v4391_v7 = vmax.f32 %v4319_v62, 0.0  ;;  %v10540_v62 = vpop.f32.mrf.mxu2 }
 0x44e   : > { %v4143_v19 = vpop.f32.mrf.mxu3 }
 0x44f   : > { %v4420_v43 = vpack.c.bf16 %v4391_v7, %v4390_v32  ;;  %v4144_v16 = vadd.f32 %v4143_v19, %v4055_v15  ;;  %v11343_v19 = vld [vmem:[#allocation47_spill] sm:$0xff] }
 0x450   : > { %v3973_v10 = vadd.f32 %v11343_v19, %v3884_v24 }
 0x451   : > { %4520 = vmatmul.bf16.gmra.mxu2 %v4420_v43  ;;  %v4233_v47 = vadd.f32 %v10349_v52, %v4144_v16  ;;  %v5474_v16 = vld [vmem:[#allocation2 + $0x3c0] sm:$0xf] }
 0x452   : > { %v4062_v43 = vadd.f32 %v10395_v23, %v3973_v10  ;;  %v5475_v20 = vor.u32 %v6030_v51, %v5474_v16  ;;  %v11347_v23 = vld [vmem:[#allocation21_spill] sm:$0xff] }
 0x453   : > { %4380 = vmatmul.bf16.gmra.mxu1 %v5555_v46  ;;  %v4322_v44 = vadd.f32 %v10465_v29, %v4233_v47  ;;  %v10550_v15 = vpop.f32.mrf.mxu0  ;;  %v4338_v46 = vpop.f32.mrf.mxu1  ;;  %v11345_v47 = vld [vmem:[#allocation16_spill] sm:$0xff] }
 0x455   : > { %v4392_v49 = vmax.f32 %v4322_v44, 0.0 }
 0x456   : > { %v4145_v5 = vpop.f32.mrf.mxu3 }
 0x457   : > { %v4146_v34 = vadd.f32 %v4145_v5, %v4057_v36 }
 0x459   : > { %v4235_v17 = vadd.f32 %v10356_v35, %v4146_v34  ;;  %v4060_v35 = vadd.f32 %v10388_v60, %v3971_v9  ;;  %v3887_v60 = vadd.f32 %v11345_v47, %v11344_v26  ;;  %v3889_v34 = vadd.f32 %v11347_v23, %v10333_v33  ;;  %v11352_v47 = vld [vmem:[#allocation25_spill] sm:$0xff] }
 0x45b   : > { %v4324_v52 = vadd.f32 %v10476_v59, %v4235_v17  ;;  %4187 = vmatmul.bf16.gmra.mxu3 %v5439_v28  ;;  %v10552_v59 = vpop.f32.mrf.mxu2  ;;  %v4252_v28 = vpop.f32.mrf.mxu0 }
 0x45c   : > { %v10567_v57 = vpop.f32.mrf.mxu1 }
 0x45d   : > { %v4393_v32 = vmax.f32 %v4324_v52, 0.0 }
 0x45e   : > { %v4148_v29 = vpop.f32.mrf.mxu3 }
 0x45f   : > { %v4421_v13 = vpack.c.bf16 %v4393_v32, %v4392_v49  ;;  %v4149_v7 = vadd.f32 %v4148_v29, %v4060_v35  ;;  %v5510_v29 = vld [vmem:[#allocation2 + $0x408] sm:$0xf]  ;;  %v6039_v35 = vld [vmem:[#allocation2 + $0x428] sm:$0xf0] }
 0x460   : > { %v5511_v16 = vor.u32 %v6039_v35, %v5510_v29 }
 0x461   : > { %4525 = vmatmul.bf16.gmra.mxu2 %v4421_v13  ;;  %v4238_v54 = vadd.f32 %v10484_v55, %v4149_v7  ;;  %v3976_v55 = vadd.f32 %v11346_v11, %v3887_v60  ;;  %v11349_v13 = vld [vmem:[#allocation65_spill] sm:$0xff]  ;;  %v3894_v60 = vadd.f32 %v11352_v47, %v10345_v45  ;;  %v5546_v45 = vld [vmem:[#allocation2 + $0x450] sm:$0xf] }
 0x462   : > { %v11350_v7 = vld [vmem:[#allocation17_spill] sm:$0xff] }
 0x463   : > { %v4327_v5 = vadd.f32 %v10488_v39, %v4238_v54  ;;  %v10564_v21 = vpop.f32.mrf.mxu2  ;;  %v4065_v9 = vadd.f32 %v10405_v4, %v3976_v55  ;;  %v3892_v19 = vadd.f32 %v11350_v7, %v11349_v13  ;;  %v4254_v54 = vpop.f32.mrf.mxu0 }
 0x464   : > { %v4343_v51 = vpop.f32.mrf.mxu1 }
 0x465   : > { %v4394_v44 = vmax.f32 %v4327_v5, 0.0 }
 0x466   : > { %v4150_v18 = vpop.f32.mrf.mxu3 }
 0x467   : > { %v4151_v36 = vadd.f32 %v4150_v18, %v4062_v43 }
 0x469   : > { %v4240_v61 = vadd.f32 %v10498_v50, %v4151_v36 }
 0x46b   : > { %v4329_v41 = vadd.f32 %v10504_v6, %v4240_v61  ;;  %4192 = vmatmul.bf16.gmra.mxu3 %v5475_v20  ;;  %v11348_v6 = vld [vmem:[#allocation52_spill] sm:$0xff]  ;;  %v10574_v4 = vpop.f32.mrf.mxu2  ;;  %v4257_v55 = vpop.f32.mrf.mxu0 }
 0x46c   : > { %v3978_v24 = vadd.f32 %v11348_v6, %v3889_v34 }
 0x46d   : > { %v4395_v17 = vmax.f32 %v4329_v41, 0.0 }
 0x46e   : > { %v4153_v52 = vpop.f32.mrf.mxu3  ;;  %v4067_v32 = vadd.f32 %v10412_v58, %v3978_v24  ;;  %v11351_v58 = vld [vmem:[#allocation54_spill] sm:$0xff] }
 0x46f   : > { %v4422_v39 = vpack.c.bf16 %v4395_v17, %v4394_v44  ;;  %v4154_v50 = vadd.f32 %v4153_v52, %v4065_v9  ;;  %v3981_v26 = vadd.f32 %v11351_v58, %v3892_v19  ;;  %v11354_v52 = vld [vmem:[#allocation26_spill] sm:$0xff] }
 0x470   : > { %v3897_v9 = vadd.f32 %v11354_v52, %v10352_v22 }
 0x471   : > { %4530 = vmatmul.bf16.gmra.mxu2 %v4422_v39  ;;  %v4243_v49 = vadd.f32 %v10510_v31, %v4154_v50  ;;  %v4070_v20 = vadd.f32 %v10419_v48, %v3981_v26  ;;  %v6048_v48 = vld [vmem:[#allocation2 + $0x470] sm:$0xf0] }
 0x472   : > { %v5547_v24 = vor.u32 %v6048_v48, %v5546_v45 }
 0x473   : > { %v4332_v43 = vadd.f32 %v10516_v42, %v4243_v49  ;;  %v11353_v42 = vld [vmem:[#allocation57_spill] sm:$0xff]  ;;  %v10584_v23 = vpop.f32.mrf.mxu2  ;;  %v4259_v29 = vpop.f32.mrf.mxu0 }
 0x475   : > { %v4396_v36 = vmax.f32 %v4332_v43, 0.0 }
 0x476   : > { %v4155_v33 = vpop.f32.mrf.mxu3 }
 0x477   : > { %v4156_v10 = vadd.f32 %v4155_v33, %v4067_v32  ;;  %v11355_v32 = vld [vmem:[#allocation58_spill] sm:$0xff] }
 0x478   : > { %v3986_v33 = vadd.f32 %v11355_v32, %v3897_v9  ;;  %v11363_v9 = vld [vmem:[#allocation61_spill] sm:$0xff] }
 0x479   : > { %v4245_v18 = vadd.f32 %v10525_v56, %v4156_v10  ;;  %v3983_v56 = vadd.f32 %v11353_v42, %v3894_v60  ;;  %v11361_v42 = vld [vmem:[#allocation29_spill] sm:$0xff] }
 0x47a   : > { %v4075_v10 = vadd.f32 %v10436_v1, %v3986_v33 }
 0x47b   : > { %v4334_v31 = vadd.f32 %v10530_v2, %v4245_v18  ;;  %4197 = vmatmul.bf16.gmra.mxu3 %v5511_v16  ;;  %v4346_v2 = vpop.f32.mrf.mxu1  ;;  %v4072_v44 = vadd.f32 %v10426_v40, %v3983_v56  ;;  %v10595_v35 = vpop.f32.mrf.mxu2 }
 0x47d   : > { %v4397_v5 = vmax.f32 %v4334_v31, 0.0  ;;  %v4262_v31 = vpop.f32.mrf.mxu0 }
 0x47e   : > { %v4158_v61 = vpop.f32.mrf.mxu3 }
 0x47f   : > { %v4423_v41 = vpack.c.bf16 %v4397_v5, %v4396_v36  ;;  %v4159_v11 = vadd.f32 %v4158_v61, %v4070_v20  ;;  %v11359_v20 = vld [vmem:[#allocation60_spill] sm:$0xff] }
 0x481   : > { %4535 = vmatmul.bf16.gmra.mxu2 %v4423_v41  ;;  %v4248_v34 = vadd.f32 %v10538_v38, %v4159_v11  ;;  %v11356_v38 = vld [vmem:[#allocation27_spill] sm:$0xff] }
 0x482   : > { %v3899_v40 = vadd.f32 %v11356_v38, %v10359_v8  ;;  %v11358_v8 = vld [vmem:[#allocation28_spill] sm:$0xff]  ;;  %v11360_v11 = vld [vmem:[#allocation71_spill] sm:$0xff] }
 0x483   : > { %v4337_v50 = vadd.f32 %v10544_v53, %v4248_v34  ;;  %v4348_v22 = vpop.f32.mrf.mxu1  ;;  %v3902_v26 = vadd.f32 %v11358_v8, %v10364_v27  ;;  %v10602_v60 = vpop.f32.mrf.mxu2 }
 0x485   : > { %v4398_v13 = vmax.f32 %v4337_v50, 0.0  ;;  %v3991_v41 = vadd.f32 %v11359_v20, %v3902_v26  ;;  %v4264_v27 = vpop.f32.mrf.mxu0 }
 0x486   : > { %v4160_v17 = vpop.f32.mrf.mxu3 }
 0x487   : > { %v4161_v39 = vadd.f32 %v4160_v17, %v4072_v44  ;;  %v11362_v44 = vld [vmem:[#allocation92_spill] sm:$0xff] }
 0x488   : > { %v4080_v17 = vadd.f32 %v11362_v44, %v3991_v41 }
 0x489   : > { %v4250_v6 = vadd.f32 %v10550_v15, %v4161_v39  ;;  %v11357_v15 = vld [vmem:[#allocation59_spill] sm:$0xff] }
 0x48b   : > { %v4339_v49 = vadd.f32 %v4338_v46, %v4250_v6  ;;  %4202 = vmatmul.bf16.gmra.mxu3 %v5547_v24  ;;  %v3988_v46 = vadd.f32 %v11357_v15, %v3899_v40  ;;  %v4351_v36 = vpop.f32.mrf.mxu1  ;;  %v10610_v48 = vpop.f32.mrf.mxu2  ;;  %v11364_v6 = vld [vmem:[#allocation73_spill] sm:$0xff]  ;;  %v11365_v24 = vld [vmem:[#allocation30_spill] sm:$0xff]  ;;  %v11368_v15 = vld [vmem:[#allocation31_spill] sm:$0xff] }
 0x48d   : > { %v4399_v7 = vmax.f32 %v4339_v49, 0.0  ;;  %v4077_v16 = vadd.f32 %v10443_v3, %v3988_v46  ;;  %v3907_v49 = vadd.f32 %v11365_v24, %v11364_v6  ;;  %v4267_v40 = vpop.f32.mrf.mxu0 }
 0x48e   : > { %v4163_v19 = vpop.f32.mrf.mxu3 }
 0x48f   : > { %v4424_v53 = vpack.c.bf16 %v4399_v7, %v4398_v13  ;;  %v4164_v43 = vadd.f32 %v4163_v19, %v4075_v10  ;;  %v11366_v7 = vld [vmem:[#allocation63_spill] sm:$0xff] }
 0x490   : > { %v3996_v19 = vadd.f32 %v11366_v7, %v3907_v49 }
 0x491   : > { %4540 = vmatmul.bf16.gmra.mxu2 %v4424_v53  ;;  %v4253_v18 = vadd.f32 %v4252_v28, %v4164_v43  ;;  %v3904_v28 = vadd.f32 %v11361_v42, %v11360_v11  ;;  %v11367_v43 = vld [vmem:[#allocation75_spill] sm:$0xff]  ;;  %v11371_v42 = vld [vmem:[#allocation84_spill] sm:$0xff] }
 0x492   : > { %v3909_v46 = vadd.f32 %v11368_v15, %v11367_v43 }
 0x493   : > { %v4342_v5 = vadd.f32 %v10567_v57, %v4253_v18  ;;  %v3993_v39 = vadd.f32 %v11363_v9, %v3904_v28  ;;  %v4353_v57 = vpop.f32.mrf.mxu1  ;;  %v4116_v10 = vpop.f32.mrf.mxu2 }
 0x495   : > { %v4400_v56 = vmax.f32 %v4342_v5, 0.0 }
 0x496   : > { %v4165_v58 = vpop.f32.mrf.mxu3 }
 0x497   : > { %v4166_v47 = vadd.f32 %v4165_v58, %v4077_v16  ;;  %v4085_v16 = vadd.f32 %v10472_v0, %v3996_v19  ;;  %v349_v0 = vld [vmem:[%s6868_s23] sm:$0xff]  }
 0x499   : > { %v4255_v1 = vadd.f32 %v4254_v54, %v4166_v47  ;;  %v4269_v47 = vpop.f32.mrf.mxu0 }
 0x49b   : > { %v4344_v61 = vadd.f32 %v4343_v51, %v4255_v1  ;;  %v4082_v51 = vadd.f32 %v10462_v14, %v3993_v39  ;;  %v4356_v53 = vpop.f32.mrf.mxu1  ;;  %v4592_v39 = vunpack.c.h.bf16 %v349_v0 }
 0x49d   : > { %v4401_v3 = vmax.f32 %v4344_v61, 0.0  ;;  %v10625_v61 = vld [vmem:[%s10784_s6] ss:$0 sm:$0xff] }
 0x49e   : > { %v4168_v34 = vpop.f32.mrf.mxu3 }
 0x49f   : > { %v4425_v45 = vpack.c.bf16 %v4401_v3, %v4400_v56  ;;  %v4169_v52 = vadd.f32 %v4168_v34, %v4080_v17  ;;  %v11372_v56 = vld [vmem:[#allocation77_spill] sm:$0xff]  ;;  %v11373_v3 = vld [vmem:[#allocation32_spill] sm:$0xff] }
 0x4a0   : > { %v3912_v34 = vadd.f32 %v11373_v3, %v11372_v56  ;;  %v11380_v3 = vld [vmem:[#allocation68_spill] sm:$0xff] }
 0x4a1   : > { %4545 = vmatmul.bf16.gmra.mxu2 %v4425_v45  ;;  %v4258_v54 = vadd.f32 %v4257_v55, %v4169_v52  ;;  %v4591_v45 = vunpack.c.l.bf16 %v349_v0 }
 0x4a3   : > { %v4347_v33 = vadd.f32 %v4346_v2, %v4258_v54  ;;  %v11369_v2 = vld [vmem:[#allocation64_spill] sm:$0xff]  ;;  %v4358_v41 = vpop.f32.mrf.mxu1  ;;  %v11374_v54 = vld [vmem:[#allocation66_spill] sm:$0xff] }
 0x4a5   : > { %v4402_v55 = vmax.f32 %v4347_v33, 0.0 }
 0x4a6   : > { %v4170_v50 = vpop.f32.mrf.mxu3 }
 0x4a7   : > { %v4171_v32 = vadd.f32 %v4170_v50, %v4082_v51  ;;  %v11375_v51 = vld [vmem:[#allocation79_spill] sm:$0xff]  ;;  %v11376_v50 = vld [vmem:[#allocation33_spill] sm:$0xff] }
 0x4a8   : > { %v3914_v6 = vadd.f32 %v11376_v50, %v11375_v51  ;;  %v11383_v50 = vld [vmem:[#allocation69_spill] sm:$0xff] }
 0x4a9   : > { %v4260_v38 = vadd.f32 %v4259_v29, %v4171_v32  ;;  %v3998_v29 = vadd.f32 %v11369_v2, %v3909_v46  ;;  %v11377_v46 = vld [vmem:[#allocation67_spill] sm:$0xff]  ;;  %v11378_v2 = vld [vmem:[#allocation81_spill] sm:$0xff] }
 0x4ab   : > { %v4349_v13 = vadd.f32 %v4348_v22, %v4260_v38  ;;  %v11370_v22 = vld [vmem:[#allocation56_spill] sm:$0xff]  ;;  %v4087_v20 = vadd.f32 %v10486_v37, %v3998_v29  ;;  %v4001_v37 = vadd.f32 %v11374_v54, %v3912_v34  ;;  %v4361_v19 = vpop.f32.mrf.mxu1  ;;  %v11379_v29 = vld [vmem:[#allocation34_spill] sm:$0xff] }
 0x4ac   : > { %v3939_v26 = vadd.f32 %v11370_v22, %v10457_v12  ;;  %v3917_v22 = vadd.f32 %v11379_v29, %v11378_v2  ;;  %v11388_v2 = vld [vmem:[#allocation39_spill] sm:$0xff] }
 0x4ad   : > { %v4403_v18 = vmax.f32 %v4349_v13, 0.0  ;;  %v4272_v13 = vpop.f32.mrf.mxu0 }
 0x4ae   : > { %v4173_v14 = vpop.f32.mrf.mxu3  ;;  %v4028_v28 = vadd.f32 %v11371_v42, %v3939_v26  ;;  %v4006_v34 = vadd.f32 %v11380_v3, %v3917_v22 }
 0x4af   : > { %v4426_v58 = vpack.c.bf16 %v4403_v18, %v4402_v55  ;;  %v4174_v8 = vadd.f32 %v4173_v14, %v4085_v16  ;;  %v4003_v55 = vadd.f32 %v11377_v46, %v3914_v6 }
 0x4b0   : > { %v10632_v12 = vadd.f32 %v4116_v10, %v4028_v28 }
 0x4b1   : > { %4550 = vmatmul.bf16.gmra.mxu2 %v4426_v58  ;;  %v4263_v1 = vadd.f32 %v4262_v31, %v4174_v8  ;;  %v4092_v58 = vadd.f32 %v10514_v30, %v4003_v55  ;;  %v351_v8 = vld [vmem:[%s6868_s23 + $0x8] sm:$0xff]  }
 0x4b2   : > { %v4593_v0 = vunpack.c.l.bf16 %v351_v8  ;;  %v4594_v56 = vunpack.c.h.bf16 %v351_v8 }
 0x4b3   : > { %v4352_v17 = vadd.f32 %v4351_v36, %v4263_v1  ;;  %v4363_v42 = vpop.f32.mrf.mxu1 }
 0x4b4   : > { %v4511_v5 = vpop.f32.mrf.mxu2 }
 0x4b5   : > { %v4512_v31 = vadd.f32 %v10625_v61, %v4511_v5  ;;  %v4404_v49 = vmax.f32 %v4352_v17, 0.0  ;;  %v4274_v5 = vpop.f32.mrf.mxu0 }
 0x4b6   : > { %v4175_v11 = vpop.f32.mrf.mxu3 }
 0x4b7   : > { %v4176_v44 = vadd.f32 %v4175_v11, %v4087_v20  ;;  %v4623_v32 = vadd.f32 %v4591_v45, %v4512_v31 }
 0x4b9   : > { %v4265_v52 = vadd.f32 %v4264_v27, %v4176_v44  ;;  %v4090_v27 = vadd.f32 %v10502_v25, %v4001_v37  ;;  %v4655_v10 = vmax.f32 %v4623_v32, 0.0  ;;  %v11382_v44 = vld [vmem:[#allocation35_spill] sm:$0xff] }
 0x4bb   : > { %v4354_v9 = vadd.f32 %v4353_v57, %v4265_v52  ;;  %v4366_v32 = vpop.f32.mrf.mxu1 }
 0x4bc   : > { %v4513_v24 = vpop.f32.mrf.mxu2 }
 0x4bd   : > { %v4405_v33 = vmax.f32 %v4354_v9, 0.0  ;;  %v4514_v38 = vadd.f32 %v10625_v61, %v4513_v24  ;;  %v4277_v24 = vpop.f32.mrf.mxu0 }
 0x4be   : > { %v4178_v36 = vpop.f32.mrf.mxu3 }
 0x4bf   : > { %v4624_v7 = vadd.f32 %v4592_v39, %v4514_v38  ;;  %v4427_v57 = vpack.c.bf16 %v4405_v33, %v4404_v49  ;;  %v4179_v15 = vadd.f32 %v4178_v36, %v4090_v27 }
 0x4c1   : > { %v4656_v43 = vmax.f32 %v4624_v7, 0.0  ;;  %4555 = vmatmul.bf16.gmra.mxu2 %v4427_v57  ;;  %v4268_v16 = vadd.f32 %v4267_v40, %v4179_v15  ;;  %v11381_v40 = vld [vmem:[#allocation83_spill] sm:$0xff]  ;;  %v353_v7 = vld [vmem:[%s6868_s23 + $0x10] sm:$0xff]   ;;  %v11384_v57 = vld [vmem:[#allocation85_spill] sm:$0xff] }
 0x4c2   : > { %v3919_v30 = vadd.f32 %v11382_v44, %v11381_v40  ;;  %v4595_v55 = vunpack.c.l.bf16 %v353_v7 }
 0x4c3   : > { %v6134_v18 = vpack.c.bf16 %v4656_v43, %v4655_v10  ;;  %v4357_v1 = vadd.f32 %v4356_v53, %v4268_v16  ;;  %v11385_v10 = vld [vmem:[#allocation36_spill] sm:$0xff]  ;;  %v4596_v16 = vunpack.c.h.bf16 %v353_v7 }
 0x4c4   : > { %v4516_v14 = vpop.f32.mrf.mxu2  ;;  %v4008_v6 = vadd.f32 %v11383_v50, %v3919_v30 }
 0x4c5   : > { %6135 = vst [vmem:[%s10643_s19] sm:$0xff] %v6134_v18   ;;  %v4517_v20 = vadd.f32 %v10625_v61, %v4516_v14  ;;  %v4406_v31 = vmax.f32 %v4357_v1, 0.0  ;;  %v4279_v29 = vpop.f32.mrf.mxu0 }
 0x4c6   : > { %v4180_v25 = vpop.f32.mrf.mxu3  ;;  %v4097_v36 = vadd.f32 %v10540_v62, %v4008_v6 }
 0x4c7   : > { %v4181_v26 = vadd.f32 %v4180_v25, %v4092_v58  ;;  %v4625_v45 = vadd.f32 %v4593_v0, %v4517_v20  ;;  %v11386_v58 = vld [vmem:[#allocation70_spill] sm:$0xff] }
 0x4c8   : > { %v11387_v25 = vld [vmem:[#allocation86_spill] sm:$0xff] }
 0x4c9   : > { %v4270_v11 = vadd.f32 %v4269_v47, %v4181_v26  ;;  %v4095_v47 = vadd.f32 %v10527_v63, %v4006_v34  ;;  %v3922_v63 = vadd.f32 %v11385_v10, %v11384_v57  ;;  %v11389_v34 = vld [vmem:[#allocation72_spill] sm:$0xff] }
 0x4cb   : > { %v4359_v28 = vadd.f32 %v4358_v41, %v4270_v11  ;;  %v4657_v41 = vmax.f32 %v4625_v45, 0.0  ;;  %v4011_v8 = vadd.f32 %v11386_v58, %v3922_v63  ;;  %v11395_v58 = vld [vmem:[#allocation76_spill] sm:$0xff] }
 0x4cc   : > { %v4518_v17 = vpop.f32.mrf.mxu2 }
 0x4cd   : > { %v4407_v52 = vmax.f32 %v4359_v28, 0.0  ;;  %v4519_v9 = vadd.f32 %v10625_v61, %v4518_v17  ;;  %v4282_v45 = vpop.f32.mrf.mxu0 }
 0x4ce   : > { %v4183_v53 = vpop.f32.mrf.mxu3 }
 0x4cf   : > { %v4626_v39 = vadd.f32 %v4594_v56, %v4519_v9  ;;  %v4428_v54 = vpack.c.bf16 %v4407_v52, %v4406_v31  ;;  %v4184_v51 = vadd.f32 %v4183_v53, %v4095_v47  ;;  %v355_v52 = vld [vmem:[%s6868_s23 + $0x18] sm:$0xff]  }
 0x4d0   : > { %v11390_v53 = vld [vmem:[#allocation87_spill] sm:$0xff] }
 0x4d1   : > { %v4658_v37 = vmax.f32 %v4626_v39, 0.0  ;;  %4560 = vmatmul.bf16.gmra.mxu2 %v4428_v54  ;;  %v4273_v38 = vadd.f32 %v4272_v13, %v4184_v51  ;;  %v3924_v13 = vadd.f32 %v11388_v2, %v11387_v25  ;;  %v11391_v39 = vld [vmem:[#allocation41_spill] sm:$0xff]  ;;  %v4597_v51 = vunpack.c.l.bf16 %v355_v52 }
 0x4d2   : > { %v3927_v47 = vadd.f32 %v11391_v39, %v11390_v53 }
 0x4d3   : > { %v6139_v49 = vpack.c.bf16 %v4658_v37, %v4657_v41  ;;  %v4362_v15 = vadd.f32 %v4361_v19, %v4273_v38  ;;  %v4368_v19 = vpop.f32.mrf.mxu1  ;;  %v4013_v40 = vadd.f32 %v11389_v34, %v3924_v13  ;;  %v11398_v34 = vld [vmem:[#allocation78_spill] sm:$0xff] }
 0x4d4   : > { %v4521_v33 = vpop.f32.mrf.mxu2 }
 0x4d5   : > { %6211 = vst [vmem:[%s10643_s19 + $0x8] sm:$0xff] %v6139_v49   ;;  %v4522_v46 = vadd.f32 %v10625_v61, %v4521_v33  ;;  %v4408_v22 = vmax.f32 %v4362_v15, 0.0  ;;  %v4102_v31 = vadd.f32 %v10564_v21, %v4013_v40  ;;  %v4598_v49 = vunpack.c.h.bf16 %v355_v52  ;;  %v11392_v33 = vld [vmem:[#allocation74_spill] sm:$0xff] }
 0x4d6   : > { %v4185_v27 = vpop.f32.mrf.mxu3  ;;  %v4016_v38 = vadd.f32 %v11392_v33, %v3927_v47 }
 0x4d7   : > { %v4186_v43 = vadd.f32 %v4185_v27, %v4097_v36  ;;  %v4627_v26 = vadd.f32 %v4595_v55, %v4522_v46  ;;  %v11394_v36 = vld [vmem:[#allocation43_spill] sm:$0xff]  ;;  %v4284_v55 = vpop.f32.mrf.mxu0 }
 0x4d8   : > { %v4105_v15 = vadd.f32 %v10574_v4, %v4016_v38 }
 0x4d9   : > { %v4275_v18 = vadd.f32 %v4274_v5, %v4186_v43  ;;  %v4100_v5 = vadd.f32 %v10552_v59, %v4011_v8  ;;  %v4659_v28 = vmax.f32 %v4627_v26, 0.0 }
 0x4db   : > { %v4364_v14 = vadd.f32 %v4363_v42, %v4275_v18  ;;  %v4371_v54 = vpop.f32.mrf.mxu1 }
 0x4dc   : > { %v4523_v62 = vpop.f32.mrf.mxu2 }
 0x4dd   : > { %v4409_v1 = vmax.f32 %v4364_v14, 0.0  ;;  %v4524_v20 = vadd.f32 %v10625_v61, %v4523_v62 }
 0x4de   : > { %v4188_v0 = vpop.f32.mrf.mxu3 }
 0x4df   : > { %v4628_v11 = vadd.f32 %v4596_v16, %v4524_v20  ;;  %v4429_v42 = vpack.c.bf16 %v4409_v1, %v4408_v22  ;;  %v4189_v3 = vadd.f32 %v4188_v0, %v4100_v5  ;;  %v357_v22 = vld [vmem:[%s6868_s23 + $0x20] sm:$0xff]   ;;  %v11396_v1 = vld [vmem:[#allocation89_spill] sm:$0xff]  ;;  %v11397_v20 = vld [vmem:[#allocation46_spill] sm:$0xff] }
 0x4e0   : > { %v3932_v4 = vadd.f32 %v11397_v20, %v11396_v1  ;;  %v4599_v5 = vunpack.c.l.bf16 %v357_v22 }
 0x4e1   : > { %v4660_v56 = vmax.f32 %v4628_v11, 0.0  ;;  %4565 = vmatmul.bf16.gmra.mxu2 %v4429_v42  ;;  %v4278_v17 = vadd.f32 %v4277_v24, %v4189_v3  ;;  %v11393_v24 = vld [vmem:[#allocation88_spill] sm:$0xff]  ;;  %v4600_v3 = vunpack.c.h.bf16 %v357_v22 }
 0x4e2   : > { %v3929_v21 = vadd.f32 %v11394_v36, %v11393_v24  ;;  %v4021_v40 = vadd.f32 %v11398_v34, %v3932_v4 }
 0x4e3   : > { %v6144_v44 = vpack.c.bf16 %v4660_v56, %v4659_v28  ;;  %v4367_v41 = vadd.f32 %v4366_v32, %v4278_v17  ;;  %v4373_v25 = vpop.f32.mrf.mxu1  ;;  %v4287_v28 = vpop.f32.mrf.mxu0 }
 0x4e4   : > { %v4526_v30 = vpop.f32.mrf.mxu2  ;;  %v4018_v8 = vadd.f32 %v11395_v58, %v3929_v21 }
 0x4e5   : > { %6212 = vst [vmem:[%s10643_s19 + $0x10] sm:$0xff] %v6144_v44   ;;  %v4527_v37 = vadd.f32 %v10625_v61, %v4526_v30  ;;  %v4410_v27 = vmax.f32 %v4367_v41, 0.0  ;;  %v11399_v44 = vld [vmem:[#allocation90_spill] sm:$0xff] }
 0x4e6   : > { %v4190_v9 = vpop.f32.mrf.mxu3  ;;  %v4107_v62 = vadd.f32 %v10584_v23, %v4018_v8  ;;  %v11400_v30 = vld [vmem:[#allocation50_spill] sm:$0xff] }
 0x4e7   : > { %v4191_v59 = vadd.f32 %v4190_v9, %v4102_v31  ;;  %v4629_v57 = vadd.f32 %v4597_v51, %v4527_v37  ;;  %v3934_v17 = vadd.f32 %v11400_v30, %v11399_v44 }
 0x4e9   : > { %v4280_v50 = vadd.f32 %v4279_v29, %v4191_v59  ;;  %v4661_v18 = vmax.f32 %v4629_v57, 0.0  ;;  %v4110_v59 = vadd.f32 %v10595_v35, %v4021_v40  ;;  %v11402_v57 = vld [vmem:[#allocation91_spill] sm:$0xff] }
 0x4eb   : > { %v4369_v6 = vadd.f32 %v4368_v19, %v4280_v50  ;;  %v4376_v23 = vpop.f32.mrf.mxu1  ;;  %v11401_v50 = vld [vmem:[#allocation80_spill] sm:$0xff]  ;;  %v4289_v33 = vpop.f32.mrf.mxu0 }
 0x4ec   : > { %v4528_v7 = vpop.f32.mrf.mxu2 }
 0x4ed   : > { %v4411_v10 = vmax.f32 %v4369_v6, 0.0  ;;  %v4529_v63 = vadd.f32 %v10625_v61, %v4528_v7  ;;  %v4023_v6 = vadd.f32 %v11401_v50, %v3934_v17  ;;  %v359_v7 = vld [vmem:[%s6868_s23 + $0x28] sm:$0xff]  }
 0x4ee   : > { %v4193_v43 = vpop.f32.mrf.mxu3 }
 0x4ef   : > { %v4630_v32 = vadd.f32 %v4598_v49, %v4529_v63  ;;  %v4430_v46 = vpack.c.bf16 %v4411_v10, %v4410_v27  ;;  %v4194_v16 = vadd.f32 %v4193_v43, %v4105_v15  ;;  %v4112_v36 = vadd.f32 %v10602_v60, %v4023_v6  ;;  %v11403_v10 = vld [vmem:[#allocation53_spill] sm:$0xff] }
 0x4f0   : > { %v3937_v35 = vadd.f32 %v11403_v10, %v11402_v57  ;;  %v4601_v15 = vunpack.c.l.bf16 %v359_v7  ;;  %v365_v57 = vld [vmem:[%s6868_s23 + $0x40] sm:$0xff]  }
 0x4f1   : > { %v4662_v14 = vmax.f32 %v4630_v32, 0.0  ;;  %4570 = vmatmul.bf16.gmra.mxu2 %v4430_v46  ;;  %v4283_v29 = vadd.f32 %v4282_v45, %v4194_v16 }
 0x4f3   : > { %v6149_v2 = vpack.c.bf16 %v4662_v14, %v4661_v18  ;;  %v4372_v0 = vadd.f32 %v4371_v54, %v4283_v29  ;;  %v4378_v21 = vpop.f32.mrf.mxu1  ;;  %v4602_v18 = vunpack.c.h.bf16 %v359_v7  ;;  %v11404_v14 = vld [vmem:[#allocation82_spill] sm:$0xff] }
 0x4f4   : > { %v4531_v13 = vpop.f32.mrf.mxu2  ;;  %v4026_v16 = vadd.f32 %v11404_v14, %v3937_v35  ;;  %v4607_v35 = vunpack.c.l.bf16 %v365_v57 }
 0x4f5   : > { %6213 = vst [vmem:[%s10643_s19 + $0x18] sm:$0xff] %v6149_v2   ;;  %v4532_v11 = vadd.f32 %v10625_v61, %v4531_v13  ;;  %v4412_v45 = vmax.f32 %v4372_v0, 0.0  ;;  %v4292_v13 = vpop.f32.mrf.mxu0 }
 0x4f6   : > { %v4195_v26 = vpop.f32.mrf.mxu3  ;;  %v4115_v22 = vadd.f32 %v10610_v48, %v4026_v16 }
 0x4f7   : > { %v4196_v19 = vadd.f32 %v4195_v26, %v4107_v62  ;;  %v4631_v52 = vadd.f32 %v4599_v5, %v4532_v11 }
 0x4f9   : > { %v4285_v42 = vadd.f32 %v4284_v55, %v4196_v19  ;;  %v4663_v41 = vmax.f32 %v4631_v52, 0.0 }
 0x4fb   : > { %v4374_v56 = vadd.f32 %v4373_v25, %v4285_v42  ;;  %v4381_v1 = vpop.f32.mrf.mxu1  ;;  %v361_v42 = vld [vmem:[%s6868_s23 + $0x30] sm:$0xff]  }
 0x4fc   : > { %v4533_v31 = vpop.f32.mrf.mxu2  ;;  %v4603_v44 = vunpack.c.l.bf16 %v361_v42 }
 0x4fd   : > { %v4413_v9 = vmax.f32 %v4374_v56, 0.0  ;;  %v4534_v53 = vadd.f32 %v10625_v61, %v4533_v31 }
 0x4fe   : > { %v4198_v39 = vpop.f32.mrf.mxu3 }
 0x4ff   : > { %v4632_v47 = vadd.f32 %v4600_v3, %v4534_v53  ;;  %v4431_v54 = vpack.c.bf16 %v4413_v9, %v4412_v45  ;;  %v4199_v51 = vadd.f32 %v4198_v39, %v4110_v59  ;;  %v4294_v3 = vpop.f32.mrf.mxu0 }
 0x501   : > { %v4664_v37 = vmax.f32 %v4632_v47, 0.0  ;;  %4575 = vmatmul.bf16.gmra.mxu2 %v4431_v54  ;;  %v4288_v24 = vadd.f32 %v4287_v28, %v4199_v51 }
 0x503   : > { %v6154_v49 = vpack.c.bf16 %v4664_v37, %v4663_v41  ;;  %v4377_v43 = vadd.f32 %v4376_v23, %v4288_v24  ;;  %v4383_v30 = vpop.f32.mrf.mxu1  ;;  %v4604_v23 = vunpack.c.h.bf16 %v361_v42  ;;  %v363_v37 = vld [vmem:[%s6868_s23 + $0x38] sm:$0xff]  }
 0x504   : > { %v4536_v38 = vpop.f32.mrf.mxu2  ;;  %v4605_v50 = vunpack.c.l.bf16 %v363_v37  ;;  %v4606_v6 = vunpack.c.h.bf16 %v363_v37 }
 0x505   : > { %6214 = vst [vmem:[%s10643_s19 + $0x20] sm:$0xff] %v6154_v49   ;;  %v4537_v32 = vadd.f32 %v10625_v61, %v4536_v38  ;;  %v4414_v8 = vmax.f32 %v4377_v43, 0.0 }
 0x506   : > { %v4200_v27 = vpop.f32.mrf.mxu3 }
 0x507   : > { %v4201_v63 = vadd.f32 %v4200_v27, %v4112_v36  ;;  %v4633_v60 = vadd.f32 %v4601_v15, %v4537_v32 }
 0x509   : > { %v4290_v46 = vadd.f32 %v4289_v33, %v4201_v63  ;;  %v4665_v20 = vmax.f32 %v4633_v60, 0.0  ;;  %v4608_v63 = vunpack.c.h.bf16 %v365_v57 }
 0x50b   : > { %v4379_v55 = vadd.f32 %v4378_v21, %v4290_v46 }
 0x50c   : > { %v4538_v58 = vpop.f32.mrf.mxu2 }
 0x50d   : > { %v4415_v25 = vmax.f32 %v4379_v55, 0.0  ;;  %v4539_v2 = vadd.f32 %v10625_v61, %v4538_v58  ;;  %v367_v58 = vld [vmem:[%s6868_s23 + $0x48] sm:$0xff]  }
 0x50e   : > { %v4203_v29 = vpop.f32.mrf.mxu3  ;;  %v4609_v60 = vunpack.c.l.bf16 %v367_v58 }
 0x50f   : > { %v4634_v62 = vadd.f32 %v4602_v18, %v4539_v2  ;;  %v4432_v26 = vpack.c.bf16 %v4415_v25, %v4414_v8  ;;  %v4204_v19 = vadd.f32 %v4203_v29, %v4115_v22  ;;  %v4610_v25 = vunpack.c.h.bf16 %v367_v58 }
 0x511   : > { %v4666_v4 = vmax.f32 %v4634_v62, 0.0  ;;  %4580 = vmatmul.bf16.gmra.mxu2 %v4432_v26  ;;  %v4293_v5 = vadd.f32 %v4292_v13, %v4204_v19 }
 0x513   : > { %v6159_v0 = vpack.c.bf16 %v4666_v4, %v4665_v20  ;;  %v4382_v34 = vadd.f32 %v4381_v1, %v4293_v5  ;;  %v369_v4 = vld [vmem:[%s6868_s23 + $0x50] sm:$0xff]  }
 0x514   : > { %v4541_v11 = vpop.f32.mrf.mxu2 }
 0x515   : > { %6215 = vst [vmem:[%s10643_s19 + $0x28] sm:$0xff] %v6159_v0   ;;  %v4542_v40 = vadd.f32 %v10625_v61, %v4541_v11  ;;  %v4416_v45 = vmax.f32 %v4382_v34, 0.0  ;;  %v4611_v0 = vunpack.c.l.bf16 %v369_v4  ;;  %v4612_v11 = vunpack.c.h.bf16 %v369_v4 }
 0x516   : > { %v4205_v28 = vpop.f32.mrf.mxu3 }
 0x517   : > { %v4206_v56 = vadd.f32 %v4205_v28, %v10632_v12  ;;  %v4635_v52 = vadd.f32 %v4603_v44, %v4542_v40 }
 0x519   : > { %v4295_v48 = vadd.f32 %v4294_v3, %v4206_v56  ;;  %v4667_v12 = vmax.f32 %v4635_v52, 0.0 }
 0x51b   : > { %v4384_v17 = vadd.f32 %v4383_v30, %v4295_v48  ;;  %v371_v48 = vld [vmem:[%s6868_s23 + $0x58] sm:$0xff]  }
 0x51c   : > { %v4543_v31 = vpop.f32.mrf.mxu2 }
 0x51d   : > { %v4417_v9 = vmax.f32 %v4384_v17, 0.0  ;;  %v4544_v53 = vadd.f32 %v10625_v61, %v4543_v31  ;;  %v4613_v17 = vunpack.c.l.bf16 %v371_v48 }
 0x51f   : > { %v4636_v39 = vadd.f32 %v4604_v23, %v4544_v53  ;;  %v4433_v47 = vpack.c.bf16 %v4417_v9, %v4416_v45  ;;  %v4614_v23 = vunpack.c.h.bf16 %v371_v48 }
 0x521   : > { %v4668_v59 = vmax.f32 %v4636_v39, 0.0  ;;  %4585 = vmatmul.bf16.gmra.mxu2 %v4433_v47 }
 0x523   : > { %v6164_v54 = vpack.c.bf16 %v4668_v59, %v4667_v12  ;;  %v373_v59 = vld [vmem:[%s6868_s23 + $0x60] sm:$0xff]  }
 0x524   : > { %v4546_v41 = vpop.f32.mrf.mxu2  ;;  %v4616_v37 = vunpack.c.h.bf16 %v373_v59 }
 0x525   : > { %6216 = vst [vmem:[%s10643_s19 + $0x30] sm:$0xff] %v6164_v54   ;;  %v4547_v51 = vadd.f32 %v10625_v61, %v4546_v41  ;;  %v4615_v41 = vunpack.c.l.bf16 %v373_v59 }
 0x527   : > { %v4637_v33 = vadd.f32 %v4605_v50, %v4547_v51 }
 0x529   : > { %v4669_v36 = vmax.f32 %v4637_v33, 0.0 }
 0x52c   : > { %v4548_v49 = vpop.f32.mrf.mxu2 }
 0x52d   : > { %v4549_v38 = vadd.f32 %v10625_v61, %v4548_v49 }
 0x52f   : > { %v4638_v24 = vadd.f32 %v4606_v6, %v4549_v38 }
 0x531   : > { %v4670_v21 = vmax.f32 %v4638_v24, 0.0 }
 0x533   : > { %v6169_v7 = vpack.c.bf16 %v4670_v21, %v4669_v36  ;;  %v375_v21 = vld [vmem:[%s6868_s23 + $0x68] sm:$0xff]  }
 0x534   : > { %v4551_v27 = vpop.f32.mrf.mxu2  ;;  %v4618_v57 = vunpack.c.h.bf16 %v375_v21 }
 0x535   : > { %6217 = vst [vmem:[%s10643_s19 + $0x38] sm:$0xff] %v6169_v7   ;;  %v4552_v10 = vadd.f32 %v10625_v61, %v4551_v27  ;;  %v4617_v27 = vunpack.c.l.bf16 %v375_v21 }
 0x537   : > { %v4639_v32 = vadd.f32 %v4607_v35, %v4552_v10 }
 0x539   : > { %v4671_v55 = vmax.f32 %v4639_v32, 0.0 }
 0x53c   : > { %v4553_v43 = vpop.f32.mrf.mxu2 }
 0x53d   : > { %v4554_v15 = vadd.f32 %v10625_v61, %v4553_v43 }
 0x53f   : > { %v4640_v46 = vadd.f32 %v4608_v63, %v4554_v15 }
 0x541   : > { %v4672_v18 = vmax.f32 %v4640_v46, 0.0 }
 0x543   : > { %v6174_v14 = vpack.c.bf16 %v4672_v18, %v4671_v55  ;;  %v377_v18 = vld [vmem:[%s6868_s23 + $0x70] sm:$0xff]  }
 0x544   : > { %v4556_v16 = vpop.f32.mrf.mxu2  ;;  %v4620_v58 = vunpack.c.h.bf16 %v377_v18 }
 0x545   : > { %6218 = vst [vmem:[%s10643_s19 + $0x40] sm:$0xff] %v6174_v14   ;;  %v4557_v8 = vadd.f32 %v10625_v61, %v4556_v16  ;;  %v4619_v16 = vunpack.c.l.bf16 %v377_v18 }
 0x547   : > { %v4641_v13 = vadd.f32 %v4609_v60, %v4557_v8 }
 0x549   : > { %v4673_v22 = vmax.f32 %v4641_v13, 0.0 }
 0x54c   : > { %v4558_v2 = vpop.f32.mrf.mxu2 }
 0x54d   : > { %v4559_v29 = vadd.f32 %v10625_v61, %v4558_v2 }
 0x54f   : > { %v4642_v62 = vadd.f32 %v4610_v25, %v4559_v29 }
 0x551   : > { %v4674_v26 = vmax.f32 %v4642_v62, 0.0 }
 0x553   : > { %v6179_v1 = vpack.c.bf16 %v4674_v26, %v4673_v22  ;;  %v379_v26 = vld [vmem:[%s6868_s23 + $0x78] sm:$0xff]   ;;  %s6632_s23 = sshra.s32 %s4767_s29, 4  ;;  %s6633_s23 = int_to_ptr.hbm [resolvable:$true] %s6632_s23 }
 0x554   : > { %v4561_v20 = vpop.f32.mrf.mxu2  ;;  %v4622_v4 = vunpack.c.h.bf16 %v379_v26  ;;  %s6634_s9 = scalar_lea.hbm %s6633_s23, 128  ;;  %p6639_p11 = scmp.lt.s32.totalorder %s6633_s23, %s10785_s7 }
 0x555   : > { %6219 = vst [vmem:[%s10643_s19 + $0x48] sm:$0xff] %v6179_v1   ;;  %v4562_v19 = vadd.f32 %v10625_v61, %v4561_v20  ;;  %v4621_v20 = vunpack.c.l.bf16 %v379_v26  ;;  %p6635_p1 = scmp.ne.s32.totalorder %s6633_s23, %s6634_s9  ;;  %p6640_p9 = scmp.lt.s32.totalorder %s6638_s20, %s6634_s9 }
 0x557   : > { %v4643_v42 = vadd.f32 %v4611_v0, %v4562_v19  ;;  %p6636_p4 = pnand %p6635_p1, %p6832_p3  ;;  %p6641_p2 = por %p6640_p9, %p6639_p11 }
 0x559   : > { %v4675_v3 = vmax.f32 %v4643_v42, 0.0  ;;  %p6637_p8 = pneg %p6636_p4 }
 0x55b   : > { %p6642_p10 = pnand %p6641_p2, %p6637_p8 }
 0x55c   : > { %v4563_v5 = vpop.f32.mrf.mxu2 }
 0x55d   : > { %v4564_v28 = vadd.f32 %v10625_v61, %v4563_v5 }
 0x55f   : > { %v4644_v56 = vadd.f32 %v4612_v11, %v4564_v28 }
 0x561   : > { %v4676_v34 = vmax.f32 %v4644_v56, 0.0 }
 0x563   : > { %v6184_v40 = vpack.c.bf16 %v4676_v34, %v4675_v3 }
 0x564   : > { %v4566_v44 = vpop.f32.mrf.mxu2 }
 0x565   : > { %6220 = vst [vmem:[%s10643_s19 + $0x50] sm:$0xff] %v6184_v40   ;;  %v4567_v30 = vadd.f32 %v10625_v61, %v4566_v44 }
 0x567   : > { %v4645_v45 = vadd.f32 %v4613_v17, %v4567_v30 }
 0x569   : > { %v4677_v53 = vmax.f32 %v4645_v45, 0.0 }
 0x56c   : > { %v4568_v31 = vpop.f32.mrf.mxu2 }
 0x56d   : > { %v4569_v52 = vadd.f32 %v10625_v61, %v4568_v31 }
 0x56f   : > { %v4646_v9 = vadd.f32 %v4614_v23, %v4569_v52 }
 0x571   : > { %v4678_v39 = vmax.f32 %v4646_v9, 0.0 }
 0x573   : > { %v6189_v47 = vpack.c.bf16 %v4678_v39, %v4677_v53 }
 0x574   : > { %v4571_v12 = vpop.f32.mrf.mxu2 }
 0x575   : > { %6221 = vst [vmem:[%s10643_s19 + $0x58] sm:$0xff] %v6189_v47   ;;  %v4572_v54 = vadd.f32 %v10625_v61, %v4571_v12 }
 0x577   : > { %v4647_v50 = vadd.f32 %v4615_v41, %v4572_v54 }
 0x579   : > { %v4679_v33 = vmax.f32 %v4647_v50, 0.0 }
 0x57c   : > { %v4573_v51 = vpop.f32.mrf.mxu2 }
 0x57d   : > { %v4574_v6 = vadd.f32 %v10625_v61, %v4573_v51 }
 0x57f   : > { %v4648_v49 = vadd.f32 %v4616_v37, %v4574_v6 }
 0x581   : > { %v4680_v38 = vmax.f32 %v4648_v49, 0.0 }
 0x583   : > { %v6194_v24 = vpack.c.bf16 %v4680_v38, %v4679_v33 }
 0x584   : > { %v4576_v36 = vpop.f32.mrf.mxu2 }
 0x585   : > { %6222 = vst [vmem:[%s10643_s19 + $0x60] sm:$0xff] %v6194_v24   ;;  %v4577_v7 = vadd.f32 %v10625_v61, %v4576_v36 }
 0x587   : > { %v4649_v35 = vadd.f32 %v4617_v27, %v4577_v7 }
 0x589   : > { %v4681_v32 = vmax.f32 %v4649_v35, 0.0 }
 0x58c   : > { %v4578_v10 = vpop.f32.mrf.mxu2 }
 0x58d   : > { %v4579_v63 = vadd.f32 %v10625_v61, %v4578_v10 }
 0x58f   : > { %v4650_v43 = vadd.f32 %v4618_v57, %v4579_v63 }
 0x591   : > { %v4682_v15 = vmax.f32 %v4650_v43, 0.0 }
 0x593   : > { %v6199_v46 = vpack.c.bf16 %v4682_v15, %v4681_v32 }
 0x594   : > { %v4581_v55 = vpop.f32.mrf.mxu2 }
 0x595   : > { %6223 = vst [vmem:[%s10643_s19 + $0x68] sm:$0xff] %v6199_v46   ;;  %v4582_v14 = vadd.f32 %v10625_v61, %v4581_v55 }
 0x597   : > { %v4651_v60 = vadd.f32 %v4619_v16, %v4582_v14 }
 0x599   : > { %v4683_v13 = vmax.f32 %v4651_v60, 0.0 }
 0x59c   : > { %v4583_v8 = vpop.f32.mrf.mxu2 }
 0x59d   : > { %v4584_v25 = vadd.f32 %v10625_v61, %v4583_v8 }
 0x59f   : > { %v4652_v2 = vadd.f32 %v4620_v58, %v4584_v25 }
 0x5a1   : > { %v4684_v29 = vmax.f32 %v4652_v2, 0.0 }
 0x5a3   : > { %v6204_v62 = vpack.c.bf16 %v4684_v29, %v4683_v13 }
 0x5a4   : > { %v4586_v22 = vpop.f32.mrf.mxu2 }
 0x5a5   : > { %6224 = vst [vmem:[%s10643_s19 + $0x70] sm:$0xff] %v6204_v62   ;;  %v4587_v1 = vadd.f32 %v10625_v61, %v4586_v22 }
 0x5a7   : > { %v4653_v0 = vadd.f32 %v4621_v20, %v4587_v1 }
 0x5a9   : > { %v4685_v42 = vmax.f32 %v4653_v0, 0.0 }
 0x5ac   : > { %v4588_v19 = vpop.f32.mrf.mxu2 }
 0x5ad   : > { %v4589_v11 = vadd.f32 %v10625_v61, %v4588_v19 }
 0x5af   : > { %v4654_v5 = vadd.f32 %v4622_v4, %v4589_v11 }
 0x5b1   : > { %v4686_v28 = vmax.f32 %v4654_v5, 0.0 }
 0x5b3   : > { %v6209_v56 = vpack.c.bf16 %v4686_v28, %v4685_v42 }
 0x5b5   : > { %6225 = vst [vmem:[%s10643_s19 + $0x78] sm:$0xff] %v6209_v56  }
 0x5b6   : > { %6645 = shalt.err (!%p6642_p10)
}
 0x5b7   : > { %s6699_s15 = smov 64   ;;  %s6700_s19 = smov 4  }
 0x5b8   : > { %6424 = dma.vmem_to_hbm [thread:$0]  (%p6832_p3), %s4765_s22, 2048, %s4767_s29, %s4752_s28, %s6699_s15, %s6699_s15, %s6700_s19  }
 0x5b9 PF: > { %s4781_s1 = sand.u32 1, %s6680_s24   ;;  %p11405_p12 = scmp.ge.s32.totalorder %s6692_s27, 2 }
 0x5ba   : > { %s4782_s10 = scalar_lea.sflag [#allocation5], %s4781_s1 }
 0x5bb   : > { %p6441_p13 = pnand %p11405_p12, %p6776_p6 }
 0x5bd   : > { %p6442_p0 = pneg %p6441_p13 }
 0x5bf   : > { %6675 = dma.done.wait (%p6442_p0), %s4782_s10, 2048  }
 0x5c0   : > { %6677 = vsyncadd (%p6442_p0), %s4782_s10, 4294965248  ;;  %p22_p5 = scmp.ge.s32.totalorder %s6814_s13, 4   ;;  %s11406_s24 = smov %s6684_s25 }
 0x5c1   : > { %s11407_s25 = smov %s6688_s26  ;;  %s11408_s26 = smov %s6828_s17 }
 0x5c2   : > { %s11409_s27 = smov %s6814_s13  ;;  %24 = sbr.rel (!%p22_p5) target bundleno = 9 (0x9), region = 105 }
 0x5c7   :  { %4788 = vsyncpa [#allocation4], 1 }
 0x5c8   :  { %4790 = vsyncpa [#allocation4 + $0x1], 1 }
 0x5c9   :  { %4791 = vsyncpa [#allocation7], 1 }
 0x5ca   :  { %4792 = vsyncpa [#allocation10], 1 }
 0x5cb   :  { %4793 = vsyncpa [#allocation5], 1 }
 0x5cc   :  { %4795 = vsyncpa [#allocation5 + $0x1], 1 }

</bundles_post_ra>
